<compile_context>
chip_gen: v7x
topology: tpu7x:2x2x1
jax: 0.10.0
libtpu: 0.0.40
codegen_flags: <defaults>
</compile_context>

<pallas_src>
import functools

import numpy as np
import jax
import jax.numpy as jnp
from jax.experimental import pallas as pl
from jax.experimental.pallas import tpu as pltpu

WIN_SIZE = 11
WIN_SIGMA = 1.5
DATA_RANGE = 1.0
K1, K2 = 0.01, 0.03
C1 = (K1 * DATA_RANGE) ** 2
C2 = (K2 * DATA_RANGE) ** 2


def _gauss_taps(size, sigma):
    coords = np.arange(size, dtype=np.float64) - size // 2
    g = np.exp(-(coords ** 2) / (2.0 * float(sigma) ** 2))
    g = (g / g.sum()).astype(np.float32)
    return g


def _band_matrices(H, W, win, sigma):
    """Dense banded matrices (pure-JAX reference uses both; kernel only needs gw)."""
    g = jnp.asarray(_gauss_taps(win, sigma))
    Ho, Wo = H - win + 1, W - win + 1
    i = jnp.arange(Ho)[:, None]
    j = jnp.arange(H)[None, :]
    k = j - i
    gh = jnp.where((k >= 0) & (k < win), g[jnp.clip(k, 0, win - 1)], 0.0)    # (Ho, H)
    jj = jnp.arange(W)[:, None]
    ii = jnp.arange(Wo)[None, :]
    kk = jj - ii
    gw = jnp.where((kk >= 0) & (kk < win), g[jnp.clip(kk, 0, win - 1)], 0.0)  # (W, Wo)
    return gh.astype(jnp.float32), gw.astype(jnp.float32)


def _bcms_stats_kernel(x_ref, y_ref, gw_ref, out_ref, *, channels, taps):
    """Fused single-pass per-image statistics.

    For every image in the block, lanes 0..3 of its (8,128) output row hold
    [ssim_mean, sum|d|, sum d^2, sum |d|^3].
    """
    nb, ch_rows, W = x_ref.shape
    C = channels
    H = ch_rows // C
    Wo = gw_ref.shape[1]
    Ho = H - WIN_SIZE + 1

    x = x_ref[...].astype(jnp.float32)          # (nb, C*H, W)
    y = y_ref[...].astype(jnp.float32)
    gwm = gw_ref[...]                           # (W, Wo)

    # ---- L1 / L2 / |d|^3 per-image sums (single pass, deferred reductions) ----
    diff = x - y
    l1 = jnp.abs(diff)
    l2 = diff * diff
    l3 = l1 * l2

    def per_image_sum(a):                       # (nb, R, L) -> (nb, 1, 1)
        return jnp.sum(jnp.sum(a, axis=2, keepdims=True), axis=1, keepdims=True)

    l1_sum = per_image_sum(l1)
    l2_sum = per_image_sum(l2)
    l3_sum = per_image_sum(l3)

    # ---- separable 'valid' Gaussian filter for SSIM (4 passes, not 5) ----
    x2 = x.reshape(nb * C * H, W)
    y2 = y.reshape(nb * C * H, W)
    sq = x2 * x2 + y2 * y2                      # filtered jointly -> sigma1_sq + sigma2_sq
    xy = x2 * y2

    def gfilt(img2):                            # (nb*C*H, W) -> (nb, C, Ho, Wo)
        # W direction: one fat MXU matmul (all images & channels stacked on sublanes).
        t = jnp.dot(img2, gwm, preferred_element_type=jnp.float32)    # (nb*C*H, Wo)
        t4 = t.reshape(nb, C, H, Wo)
        # H direction: 11 shifted multiply-adds (band-aware, VPU/XLU).
        a = taps[0] * t4[:, :, 0:Ho, :]
        for k in range(1, WIN_SIZE):
            a = a + taps[k] * t4[:, :, k:k + Ho, :]
        return a                                 # (nb, C, Ho, Wo)

    mu1 = gfilt(x2)
    mu2 = gfilt(y2)
    e_sq = gfilt(sq)                             # E[x^2 + y^2]
    e_xy = gfilt(xy)                             # E[x*y]

    mu1_mu2 = mu1 * mu2
    mu_sq = mu1 * mu1 + mu2 * mu2
    sigma_sum = e_sq - mu_sq                     # sigma1_sq + sigma2_sq
    sigma12 = e_xy - mu1_mu2
    num = (2.0 * mu1_mu2 + C1) * (2.0 * sigma12 + C2)
    den = (mu_sq + C1) * (sigma_sum + C2)
    ssim_map = num * pl.reciprocal(den, approx=True)                  # (nb, C, Ho, Wo)

    s = jnp.sum(ssim_map, axis=3, keepdims=True)
    s = jnp.sum(s, axis=2, keepdims=True)
    s = jnp.sum(s, axis=1, keepdims=True)                             # (nb, 1, 1, 1)
    ssim_val = s[:, 0] * (1.0 / float(C * Ho * Wo))                   # (nb, 1, 1)

    # ---- pack 4 per-image scalars into lanes 0..3 of one output tile ----
    lane = jax.lax.broadcasted_iota(jnp.int32, (nb, 8, 128), 2)
    packed = jnp.where(lane == 0, ssim_val,
             jnp.where(lane == 1, l1_sum,
             jnp.where(lane == 2, l2_sum, l3_sum)))
    out_ref[...] = packed.astype(jnp.float32)


@jax.jit
def bcms_loss(x, gt):
    N, C, H, W = x.shape
    assert H >= WIN_SIZE and W >= WIN_SIZE, "image smaller than SSIM window"
    Ho, Wo = H - WIN_SIZE + 1, W - WIN_SIZE + 1

    taps = tuple(float(v) for v in _gauss_taps(WIN_SIZE, WIN_SIGMA))
    _, gw = _band_matrices(H, W, WIN_SIZE, WIN_SIGMA)                 # (W, Wo)

    # Images per grid step: large enough to amortize per-step overhead while the
    # double-buffered input blocks plus in-kernel intermediates stay inside scoped VMEM
    # on every generation (vmem_limit_bytes below lifts v5e's 16 MiB default).
    item = x.dtype.itemsize
    per_image_bytes = C * H * W * item
    target_block_bytes = 512 * 1024
    nb = int(max(1, min(N, target_block_bytes // max(per_image_bytes, 1))))
    # TODO(synk): for large images (per_image_bytes >> 512 KiB) tile H inside the
    # kernel with a win-1 = 10 row halo instead of whole-image blocks.

    n_pad = ((N + nb - 1) // nb) * nb
    xr = x.reshape(N, C * H, W)
    gtr = gt.reshape(N, C * H, W)
    if n_pad != N:
        pad = ((0, n_pad - N), (0, 0), (0, 0))
        xr = jnp.pad(xr, pad)
        gtr = jnp.pad(gtr, pad)

    kernel = functools.partial(_bcms_stats_kernel, channels=C, taps=taps)

    flops_per_img = (2 * 4 * C * H * W * Wo              # W-direction matmuls (4 passes)
                     + 2 * WIN_SIZE * 4 * C * Ho * Wo    # H-direction taps
                     + 30 * C * H * W)                   # elementwise + reductions
    cost = pl.CostEstimate(
        flops=int(n_pad * flops_per_img),
        transcendentals=int(n_pad * C * Ho * Wo),        # approx reciprocal on EUP
        bytes_accessed=int(2 * n_pad * C * H * W * item + n_pad * 8 * 128 * 4 + W * Wo * 4),
    )

    out = pl.pallas_call(
        kernel,
        out_shape=jax.ShapeDtypeStruct((n_pad, 8, 128), jnp.float32),
        grid=(n_pad // nb,),
        in_specs=[
            pl.BlockSpec((nb, C * H, W), lambda i: (i, 0, 0)),
            pl.BlockSpec((nb, C * H, W), lambda i: (i, 0, 0)),
            pl.BlockSpec((W, Wo), lambda i: (0, 0)),
        ],
        out_specs=pl.BlockSpec((nb, 8, 128), lambda i: (i, 0, 0)),
        compiler_params=pltpu.CompilerParams(
            dimension_semantics=("parallel",),
            vmem_limit_bytes=32 * 1024 * 1024,
        ),
        cost_estimate=cost,
    )(xr, gtr, gw)

    stats = out[:N, 0, :]                      # (N, 128); lanes 0..3 are the stats
    ssim = stats[:, 0]
    l1_sums = stats[:, 1]
    l2_sums = stats[:, 2]
    l3_sums = stats[:, 3]

    nelem = jnp.float32(N * C * H * W)
    chw = jnp.float32(C * H * W)
    eps = jnp.float32(1e-8)

    w_1 = jnp.sum(l1_sums) / nelem             # mean |x - gt|
    w_2 = jnp.sum(l2_sums) / nelem             # mean (x - gt)^2
    ssim_loss = 1.0 - ssim                     # per-image
    w_s = jnp.mean(ssim_loss)
    ssim_m = jnp.mean(ssim)

    # Per-image closed form of sum(term1 + term2) with ind == 1:
    #   sum(term1) = sl * (L1/w1 + L2/w2 + eps*C*H*W)
    #   sum(term2) = (sl/ws) * L1 + L3/w2 + eps * L1,   L3 = sum |d|^3
    per_image = (ssim_loss * (l1_sums / w_1 + l2_sums / w_2 + eps * chw)
                 + (ssim_loss / w_s) * l1_sums + l3_sums / w_2 + eps * l1_sums)
    loss = jnp.sum(per_image) / nelem

    return {
        "Loss": loss,
        "l1_loss": w_1,
        "mse_loss": w_2,
        "ssim_loss": w_s,
        "ssim": ssim_m,
    }


def _reference_loss(x, gt):
    """Pure-JAX reference (same math, no Pallas)."""
    N, C, H, W = x.shape
    gh, gw = _band_matrices(H, W, WIN_SIZE, WIN_SIGMA)
    diff = x - gt
    l1 = jnp.abs(diff)
    l2 = diff * diff
    gf = lambda a: jnp.einsum("ph,nchw,wq->ncpq", gh, a, gw,
                              precision=jax.lax.Precision.HIGHEST)
    mu1, mu2 = gf(x), gf(gt)
    s1 = gf(x * x) - mu1 * mu1
    s2 = gf(gt * gt) - mu2 * mu2
    s12 = gf(x * gt) - mu1 * mu2
    cs = (2 * s12 + C2) / (s1 + s2 + C2)
    sm = ((2 * mu1 * mu2 + C1) / (mu1 * mu1 + mu2 * mu2 + C1)) * cs
    ssim = sm.mean(axis=(1, 2, 3))
    sl = (1.0 - ssim)[:, None, None, None]
    w1, w2, ws = l1.mean(), l2.mean(), (1.0 - ssim).mean()
    loss = sl * (l1 / w1 + l2 / w2 + 1e-8) + l1 * (sl / ws + l2 / w2 + 1e-8)
    return loss.mean()


if __name__ == "__main__":
    key = jax.random.PRNGKey(0)
    kx, kg = jax.random.split(key)
    N, C, H, W = 2, 4, 16, 16
    x = jax.random.uniform(kx, (N, C, H, W), dtype=jnp.float32)
    gt = jax.random.uniform(kg, (N, C, H, W), dtype=jnp.float32)

    out = bcms_loss(x, gt)
    out = jax.tree_util.tree_map(jax.block_until_ready, out)

    ref = float(_reference_loss(x, gt))
    got = float(out["Loss"])
    assert abs(got - ref) <= 5e-2 * max(1.0, abs(ref)), (got, ref)

    print("KERNEL_OK")
</pallas_src>

<mosaic_0001>
module attributes {stable_mosaic.version = 11 : i64} {
  func.func @_bcms_stats_kernel(%arg0: i32, %arg1: memref<2x64x16xf32, #tpu.memory_space<vmem>>, %arg2: memref<2x64x16xf32, #tpu.memory_space<vmem>>, %arg3: memref<16x6xf32, #tpu.memory_space<vmem>>, %arg4: memref<2x8x128xf32, #tpu.memory_space<vmem>>) attributes {dimension_semantics = [#tpu.dimension_semantics<parallel>], iteration_bounds = array<i64: 1>, scalar_prefetch = 0 : i64, scratch_operands = 0 : i64, tpu.core_type = #tpu.core_type<tc>, window_params = [{transform_indices = @transform_0, window_bounds = array<i64: 2, 64, 16>}, {transform_indices = @transform_1, window_bounds = array<i64: 2, 64, 16>}, {pipeline_mode = #tpu.pipeline_mode<synchronous>, transform_indices = @transform_2, window_bounds = array<i64: 16, 6>}, {transform_indices = @transform_3, window_bounds = array<i64: 2, 8, 128>}]} {
    %c0 = arith.constant 0 : index
    %c0_0 = arith.constant 0 : index
    %c0_1 = arith.constant 0 : index
    %0 = vector.load %arg1[%c0, %c0_0, %c0_1] : memref<2x64x16xf32, #tpu.memory_space<vmem>>, vector<2x64x16xf32>
    %c0_2 = arith.constant 0 : index
    %c0_3 = arith.constant 0 : index
    %c0_4 = arith.constant 0 : index
    %1 = vector.load %arg2[%c0_2, %c0_3, %c0_4] : memref<2x64x16xf32, #tpu.memory_space<vmem>>, vector<2x64x16xf32>
    %c0_5 = arith.constant 0 : index
    %c0_6 = arith.constant 0 : index
    %2 = vector.load %arg3[%c0_5, %c0_6] : memref<16x6xf32, #tpu.memory_space<vmem>>, vector<16x6xf32>
    %3 = arith.subf %0, %1 : vector<2x64x16xf32>
    %4 = math.absf %3 : vector<2x64x16xf32>
    %5 = arith.mulf %3, %3 : vector<2x64x16xf32>
    %6 = arith.mulf %4, %5 : vector<2x64x16xf32>
    %cst = arith.constant dense<0.000000e+00> : vector<2x64xf32>
    %7 = vector.multi_reduction <add>, %4, %cst [2] : vector<2x64x16xf32> to vector<2x64xf32>
    %8 = vector.shape_cast %7 : vector<2x64xf32> to vector<2x64x1xf32>
    %cst_7 = arith.constant dense<0.000000e+00> : vector<2x1xf32>
    %9 = vector.multi_reduction <add>, %8, %cst_7 [1] : vector<2x64x1xf32> to vector<2x1xf32>
    %10 = vector.shape_cast %9 : vector<2x1xf32> to vector<2x1x1xf32>
    %cst_8 = arith.constant dense<0.000000e+00> : vector<2x64xf32>
    %11 = vector.multi_reduction <add>, %5, %cst_8 [2] : vector<2x64x16xf32> to vector<2x64xf32>
    %12 = vector.shape_cast %11 : vector<2x64xf32> to vector<2x64x1xf32>
    %cst_9 = arith.constant dense<0.000000e+00> : vector<2x1xf32>
    %13 = vector.multi_reduction <add>, %12, %cst_9 [1] : vector<2x64x1xf32> to vector<2x1xf32>
    %14 = vector.shape_cast %13 : vector<2x1xf32> to vector<2x1x1xf32>
    %cst_10 = arith.constant dense<0.000000e+00> : vector<2x64xf32>
    %15 = vector.multi_reduction <add>, %6, %cst_10 [2] : vector<2x64x16xf32> to vector<2x64xf32>
    %16 = vector.shape_cast %15 : vector<2x64xf32> to vector<2x64x1xf32>
    %cst_11 = arith.constant dense<0.000000e+00> : vector<2x1xf32>
    %17 = vector.multi_reduction <add>, %16, %cst_11 [1] : vector<2x64x1xf32> to vector<2x1xf32>
    %18 = vector.shape_cast %17 : vector<2x1xf32> to vector<2x1x1xf32>
    %19 = vector.shape_cast %0 : vector<2x64x16xf32> to vector<128x16xf32>
    %20 = vector.shape_cast %1 : vector<2x64x16xf32> to vector<128x16xf32>
    %21 = arith.mulf %19, %19 : vector<128x16xf32>
    %22 = arith.mulf %20, %20 : vector<128x16xf32>
    %23 = arith.addf %21, %22 : vector<128x16xf32>
    %24 = arith.mulf %19, %20 : vector<128x16xf32>
    %cst_12 = arith.constant dense<0.000000e+00> : vector<128x6xf32>
    %25 = tpu.matmul %19, %2, %cst_12 {dimension_numbers = #tpu.dot_dimension_numbers<[1], [0], [0], [1], [0, 0, 1, 1], [], []>} : vector<128x16xf32>, vector<16x6xf32>, vector<128x6xf32> -> vector<128x6xf32>
    %26 = vector.shape_cast %25 : vector<128x6xf32> to vector<2x4x16x6xf32>
    %27 = vector.extract_strided_slice %26 {offsets = [0, 0, 0, 0], sizes = [2, 4, 6, 6], strides = [1, 1, 1, 1]} : vector<2x4x16x6xf32> to vector<2x4x6x6xf32>
    %cst_13 = arith.constant 0.00102838012 : f32
    %28 = vector.broadcast %cst_13 : f32 to vector<2x4x6x6xf32>
    %29 = arith.mulf %28, %27 : vector<2x4x6x6xf32>
    %30 = vector.extract_strided_slice %26 {offsets = [0, 0, 1, 0], sizes = [2, 4, 6, 6], strides = [1, 1, 1, 1]} : vector<2x4x16x6xf32> to vector<2x4x6x6xf32>
    %cst_14 = arith.constant 0.00759875821 : f32
    %31 = vector.broadcast %cst_14 : f32 to vector<2x4x6x6xf32>
    %32 = arith.mulf %31, %30 : vector<2x4x6x6xf32>
    %33 = arith.addf %29, %32 : vector<2x4x6x6xf32>
    %34 = vector.extract_strided_slice %26 {offsets = [0, 0, 2, 0], sizes = [2, 4, 6, 6], strides = [1, 1, 1, 1]} : vector<2x4x16x6xf32> to vector<2x4x6x6xf32>
    %cst_15 = arith.constant 0.0360007733 : f32
    %35 = vector.broadcast %cst_15 : f32 to vector<2x4x6x6xf32>
    %36 = arith.mulf %35, %34 : vector<2x4x6x6xf32>
    %37 = arith.addf %33, %36 : vector<2x4x6x6xf32>
    %38 = vector.extract_strided_slice %26 {offsets = [0, 0, 3, 0], sizes = [2, 4, 6, 6], strides = [1, 1, 1, 1]} : vector<2x4x16x6xf32> to vector<2x4x6x6xf32>
    %cst_16 = arith.constant 0.109360687 : f32
    %39 = vector.broadcast %cst_16 : f32 to vector<2x4x6x6xf32>
    %40 = arith.mulf %39, %38 : vector<2x4x6x6xf32>
    %41 = arith.addf %37, %40 : vector<2x4x6x6xf32>
    %42 = vector.extract_strided_slice %26 {offsets = [0, 0, 4, 0], sizes = [2, 4, 6, 6], strides = [1, 1, 1, 1]} : vector<2x4x16x6xf32> to vector<2x4x6x6xf32>
    %cst_17 = arith.constant 0.213005543 : f32
    %43 = vector.broadcast %cst_17 : f32 to vector<2x4x6x6xf32>
    %44 = arith.mulf %43, %42 : vector<2x4x6x6xf32>
    %45 = arith.addf %41, %44 : vector<2x4x6x6xf32>
    %46 = vector.extract_strided_slice %26 {offsets = [0, 0, 5, 0], sizes = [2, 4, 6, 6], strides = [1, 1, 1, 1]} : vector<2x4x16x6xf32> to vector<2x4x6x6xf32>
    %cst_18 = arith.constant 0.266011715 : f32
    %47 = vector.broadcast %cst_18 : f32 to vector<2x4x6x6xf32>
    %48 = arith.mulf %47, %46 : vector<2x4x6x6xf32>
    %49 = arith.addf %45, %48 : vector<2x4x6x6xf32>
    %50 = vector.extract_strided_slice %26 {offsets = [0, 0, 6, 0], sizes = [2, 4, 6, 6], strides = [1, 1, 1, 1]} : vector<2x4x16x6xf32> to vector<2x4x6x6xf32>
    %cst_19 = arith.constant 0.213005543 : f32
    %51 = vector.broadcast %cst_19 : f32 to vector<2x4x6x6xf32>
    %52 = arith.mulf %51, %50 : vector<2x4x6x6xf32>
    %53 = arith.addf %49, %52 : vector<2x4x6x6xf32>
    %54 = vector.extract_strided_slice %26 {offsets = [0, 0, 7, 0], sizes = [2, 4, 6, 6], strides = [1, 1, 1, 1]} : vector<2x4x16x6xf32> to vector<2x4x6x6xf32>
    %cst_20 = arith.constant 0.109360687 : f32
    %55 = vector.broadcast %cst_20 : f32 to vector<2x4x6x6xf32>
    %56 = arith.mulf %55, %54 : vector<2x4x6x6xf32>
    %57 = arith.addf %53, %56 : vector<2x4x6x6xf32>
    %58 = vector.extract_strided_slice %26 {offsets = [0, 0, 8, 0], sizes = [2, 4, 6, 6], strides = [1, 1, 1, 1]} : vector<2x4x16x6xf32> to vector<2x4x6x6xf32>
    %cst_21 = arith.constant 0.0360007733 : f32
    %59 = vector.broadcast %cst_21 : f32 to vector<2x4x6x6xf32>
    %60 = arith.mulf %59, %58 : vector<2x4x6x6xf32>
    %61 = arith.addf %57, %60 : vector<2x4x6x6xf32>
    %62 = vector.extract_strided_slice %26 {offsets = [0, 0, 9, 0], sizes = [2, 4, 6, 6], strides = [1, 1, 1, 1]} : vector<2x4x16x6xf32> to vector<2x4x6x6xf32>
    %cst_22 = arith.constant 0.00759875821 : f32
    %63 = vector.broadcast %cst_22 : f32 to vector<2x4x6x6xf32>
    %64 = arith.mulf %63, %62 : vector<2x4x6x6xf32>
    %65 = arith.addf %61, %64 : vector<2x4x6x6xf32>
    %66 = vector.extract_strided_slice %26 {offsets = [0, 0, 10, 0], sizes = [2, 4, 6, 6], strides = [1, 1, 1, 1]} : vector<2x4x16x6xf32> to vector<2x4x6x6xf32>
    %cst_23 = arith.constant 0.00102838012 : f32
    %67 = vector.broadcast %cst_23 : f32 to vector<2x4x6x6xf32>
    %68 = arith.mulf %67, %66 : vector<2x4x6x6xf32>
    %69 = arith.addf %65, %68 : vector<2x4x6x6xf32>
    %cst_24 = arith.constant dense<0.000000e+00> : vector<128x6xf32>
    %70 = tpu.matmul %20, %2, %cst_24 {dimension_numbers = #tpu.dot_dimension_numbers<[1], [0], [0], [1], [0, 0, 1, 1], [], []>} : vector<128x16xf32>, vector<16x6xf32>, vector<128x6xf32> -> vector<128x6xf32>
    %71 = vector.shape_cast %70 : vector<128x6xf32> to vector<2x4x16x6xf32>
    %72 = vector.extract_strided_slice %71 {offsets = [0, 0, 0, 0], sizes = [2, 4, 6, 6], strides = [1, 1, 1, 1]} : vector<2x4x16x6xf32> to vector<2x4x6x6xf32>
    %cst_25 = arith.constant 0.00102838012 : f32
    %73 = vector.broadcast %cst_25 : f32 to vector<2x4x6x6xf32>
    %74 = arith.mulf %73, %72 : vector<2x4x6x6xf32>
    %75 = vector.extract_strided_slice %71 {offsets = [0, 0, 1, 0], sizes = [2, 4, 6, 6], strides = [1, 1, 1, 1]} : vector<2x4x16x6xf32> to vector<2x4x6x6xf32>
    %cst_26 = arith.constant 0.00759875821 : f32
    %76 = vector.broadcast %cst_26 : f32 to vector<2x4x6x6xf32>
    %77 = arith.mulf %76, %75 : vector<2x4x6x6xf32>
    %78 = arith.addf %74, %77 : vector<2x4x6x6xf32>
    %79 = vector.extract_strided_slice %71 {offsets = [0, 0, 2, 0], sizes = [2, 4, 6, 6], strides = [1, 1, 1, 1]} : vector<2x4x16x6xf32> to vector<2x4x6x6xf32>
    %cst_27 = arith.constant 0.0360007733 : f32
    %80 = vector.broadcast %cst_27 : f32 to vector<2x4x6x6xf32>
    %81 = arith.mulf %80, %79 : vector<2x4x6x6xf32>
    %82 = arith.addf %78, %81 : vector<2x4x6x6xf32>
    %83 = vector.extract_strided_slice %71 {offsets = [0, 0, 3, 0], sizes = [2, 4, 6, 6], strides = [1, 1, 1, 1]} : vector<2x4x16x6xf32> to vector<2x4x6x6xf32>
    %cst_28 = arith.constant 0.109360687 : f32
    %84 = vector.broadcast %cst_28 : f32 to vector<2x4x6x6xf32>
    %85 = arith.mulf %84, %83 : vector<2x4x6x6xf32>
    %86 = arith.addf %82, %85 : vector<2x4x6x6xf32>
    %87 = vector.extract_strided_slice %71 {offsets = [0, 0, 4, 0], sizes = [2, 4, 6, 6], strides = [1, 1, 1, 1]} : vector<2x4x16x6xf32> to vector<2x4x6x6xf32>
    %cst_29 = arith.constant 0.213005543 : f32
    %88 = vector.broadcast %cst_29 : f32 to vector<2x4x6x6xf32>
    %89 = arith.mulf %88, %87 : vector<2x4x6x6xf32>
    %90 = arith.addf %86, %89 : vector<2x4x6x6xf32>
    %91 = vector.extract_strided_slice %71 {offsets = [0, 0, 5, 0], sizes = [2, 4, 6, 6], strides = [1, 1, 1, 1]} : vector<2x4x16x6xf32> to vector<2x4x6x6xf32>
    %cst_30 = arith.constant 0.266011715 : f32
    %92 = vector.broadcast %cst_30 : f32 to vector<2x4x6x6xf32>
    %93 = arith.mulf %92, %91 : vector<2x4x6x6xf32>
    %94 = arith.addf %90, %93 : vector<2x4x6x6xf32>
    %95 = vector.extract_strided_slice %71 {offsets = [0, 0, 6, 0], sizes = [2, 4, 6, 6], strides = [1, 1, 1, 1]} : vector<2x4x16x6xf32> to vector<2x4x6x6xf32>
    %cst_31 = arith.constant 0.213005543 : f32
    %96 = vector.broadcast %cst_31 : f32 to vector<2x4x6x6xf32>
    %97 = arith.mulf %96, %95 : vector<2x4x6x6xf32>
    %98 = arith.addf %94, %97 : vector<2x4x6x6xf32>
    %99 = vector.extract_strided_slice %71 {offsets = [0, 0, 7, 0], sizes = [2, 4, 6, 6], strides = [1, 1, 1, 1]} : vector<2x4x16x6xf32> to vector<2x4x6x6xf32>
    %cst_32 = arith.constant 0.109360687 : f32
    %100 = vector.broadcast %cst_32 : f32 to vector<2x4x6x6xf32>
    %101 = arith.mulf %100, %99 : vector<2x4x6x6xf32>
    %102 = arith.addf %98, %101 : vector<2x4x6x6xf32>
    %103 = vector.extract_strided_slice %71 {offsets = [0, 0, 8, 0], sizes = [2, 4, 6, 6], strides = [1, 1, 1, 1]} : vector<2x4x16x6xf32> to vector<2x4x6x6xf32>
    %cst_33 = arith.constant 0.0360007733 : f32
    %104 = vector.broadcast %cst_33 : f32 to vector<2x4x6x6xf32>
    %105 = arith.mulf %104, %103 : vector<2x4x6x6xf32>
    %106 = arith.addf %102, %105 : vector<2x4x6x6xf32>
    %107 = vector.extract_strided_slice %71 {offsets = [0, 0, 9, 0], sizes = [2, 4, 6, 6], strides = [1, 1, 1, 1]} : vector<2x4x16x6xf32> to vector<2x4x6x6xf32>
    %cst_34 = arith.constant 0.00759875821 : f32
    %108 = vector.broadcast %cst_34 : f32 to vector<2x4x6x6xf32>
    %109 = arith.mulf %108, %107 : vector<2x4x6x6xf32>
    %110 = arith.addf %106, %109 : vector<2x4x6x6xf32>
    %111 = vector.extract_strided_slice %71 {offsets = [0, 0, 10, 0], sizes = [2, 4, 6, 6], strides = [1, 1, 1, 1]} : vector<2x4x16x6xf32> to vector<2x4x6x6xf32>
    %cst_35 = arith.constant 0.00102838012 : f32
    %112 = vector.broadcast %cst_35 : f32 to vector<2x4x6x6xf32>
    %113 = arith.mulf %112, %111 : vector<2x4x6x6xf32>
    %114 = arith.addf %110, %113 : vector<2x4x6x6xf32>
    %cst_36 = arith.constant dense<0.000000e+00> : vector<128x6xf32>
    %115 = tpu.matmul %23, %2, %cst_36 {dimension_numbers = #tpu.dot_dimension_numbers<[1], [0], [0], [1], [0, 0, 1, 1], [], []>} : vector<128x16xf32>, vector<16x6xf32>, vector<128x6xf32> -> vector<128x6xf32>
    %116 = vector.shape_cast %115 : vector<128x6xf32> to vector<2x4x16x6xf32>
    %117 = vector.extract_strided_slice %116 {offsets = [0, 0, 0, 0], sizes = [2, 4, 6, 6], strides = [1, 1, 1, 1]} : vector<2x4x16x6xf32> to vector<2x4x6x6xf32>
    %cst_37 = arith.constant 0.00102838012 : f32
    %118 = vector.broadcast %cst_37 : f32 to vector<2x4x6x6xf32>
    %119 = arith.mulf %118, %117 : vector<2x4x6x6xf32>
    %120 = vector.extract_strided_slice %116 {offsets = [0, 0, 1, 0], sizes = [2, 4, 6, 6], strides = [1, 1, 1, 1]} : vector<2x4x16x6xf32> to vector<2x4x6x6xf32>
    %cst_38 = arith.constant 0.00759875821 : f32
    %121 = vector.broadcast %cst_38 : f32 to vector<2x4x6x6xf32>
    %122 = arith.mulf %121, %120 : vector<2x4x6x6xf32>
    %123 = arith.addf %119, %122 : vector<2x4x6x6xf32>
    %124 = vector.extract_strided_slice %116 {offsets = [0, 0, 2, 0], sizes = [2, 4, 6, 6], strides = [1, 1, 1, 1]} : vector<2x4x16x6xf32> to vector<2x4x6x6xf32>
    %cst_39 = arith.constant 0.0360007733 : f32
    %125 = vector.broadcast %cst_39 : f32 to vector<2x4x6x6xf32>
    %126 = arith.mulf %125, %124 : vector<2x4x6x6xf32>
    %127 = arith.addf %123, %126 : vector<2x4x6x6xf32>
    %128 = vector.extract_strided_slice %116 {offsets = [0, 0, 3, 0], sizes = [2, 4, 6, 6], strides = [1, 1, 1, 1]} : vector<2x4x16x6xf32> to vector<2x4x6x6xf32>
    %cst_40 = arith.constant 0.109360687 : f32
    %129 = vector.broadcast %cst_40 : f32 to vector<2x4x6x6xf32>
    %130 = arith.mulf %129, %128 : vector<2x4x6x6xf32>
    %131 = arith.addf %127, %130 : vector<2x4x6x6xf32>
    %132 = vector.extract_strided_slice %116 {offsets = [0, 0, 4, 0], sizes = [2, 4, 6, 6], strides = [1, 1, 1, 1]} : vector<2x4x16x6xf32> to vector<2x4x6x6xf32>
    %cst_41 = arith.constant 0.213005543 : f32
    %133 = vector.broadcast %cst_41 : f32 to vector<2x4x6x6xf32>
    %134 = arith.mulf %133, %132 : vector<2x4x6x6xf32>
    %135 = arith.addf %131, %134 : vector<2x4x6x6xf32>
    %136 = vector.extract_strided_slice %116 {offsets = [0, 0, 5, 0], sizes = [2, 4, 6, 6], strides = [1, 1, 1, 1]} : vector<2x4x16x6xf32> to vector<2x4x6x6xf32>
    %cst_42 = arith.constant 0.266011715 : f32
    %137 = vector.broadcast %cst_42 : f32 to vector<2x4x6x6xf32>
    %138 = arith.mulf %137, %136 : vector<2x4x6x6xf32>
    %139 = arith.addf %135, %138 : vector<2x4x6x6xf32>
    %140 = vector.extract_strided_slice %116 {offsets = [0, 0, 6, 0], sizes = [2, 4, 6, 6], strides = [1, 1, 1, 1]} : vector<2x4x16x6xf32> to vector<2x4x6x6xf32>
    %cst_43 = arith.constant 0.213005543 : f32
    %141 = vector.broadcast %cst_43 : f32 to vector<2x4x6x6xf32>
    %142 = arith.mulf %141, %140 : vector<2x4x6x6xf32>
    %143 = arith.addf %139, %142 : vector<2x4x6x6xf32>
    %144 = vector.extract_strided_slice %116 {offsets = [0, 0, 7, 0], sizes = [2, 4, 6, 6], strides = [1, 1, 1, 1]} : vector<2x4x16x6xf32> to vector<2x4x6x6xf32>
    %cst_44 = arith.constant 0.109360687 : f32
    %145 = vector.broadcast %cst_44 : f32 to vector<2x4x6x6xf32>
    %146 = arith.mulf %145, %144 : vector<2x4x6x6xf32>
    %147 = arith.addf %143, %146 : vector<2x4x6x6xf32>
    %148 = vector.extract_strided_slice %116 {offsets = [0, 0, 8, 0], sizes = [2, 4, 6, 6], strides = [1, 1, 1, 1]} : vector<2x4x16x6xf32> to vector<2x4x6x6xf32>
    %cst_45 = arith.constant 0.0360007733 : f32
    %149 = vector.broadcast %cst_45 : f32 to vector<2x4x6x6xf32>
    %150 = arith.mulf %149, %148 : vector<2x4x6x6xf32>
    %151 = arith.addf %147, %150 : vector<2x4x6x6xf32>
    %152 = vector.extract_strided_slice %116 {offsets = [0, 0, 9, 0], sizes = [2, 4, 6, 6], strides = [1, 1, 1, 1]} : vector<2x4x16x6xf32> to vector<2x4x6x6xf32>
    %cst_46 = arith.constant 0.00759875821 : f32
    %153 = vector.broadcast %cst_46 : f32 to vector<2x4x6x6xf32>
    %154 = arith.mulf %153, %152 : vector<2x4x6x6xf32>
    %155 = arith.addf %151, %154 : vector<2x4x6x6xf32>
    %156 = vector.extract_strided_slice %116 {offsets = [0, 0, 10, 0], sizes = [2, 4, 6, 6], strides = [1, 1, 1, 1]} : vector<2x4x16x6xf32> to vector<2x4x6x6xf32>
    %cst_47 = arith.constant 0.00102838012 : f32
    %157 = vector.broadcast %cst_47 : f32 to vector<2x4x6x6xf32>
    %158 = arith.mulf %157, %156 : vector<2x4x6x6xf32>
    %159 = arith.addf %155, %158 : vector<2x4x6x6xf32>
    %cst_48 = arith.constant dense<0.000000e+00> : vector<128x6xf32>
    %160 = tpu.matmul %24, %2, %cst_48 {dimension_numbers = #tpu.dot_dimension_numbers<[1], [0], [0], [1], [0, 0, 1, 1], [], []>} : vector<128x16xf32>, vector<16x6xf32>, vector<128x6xf32> -> vector<128x6xf32>
    %161 = vector.shape_cast %160 : vector<128x6xf32> to vector<2x4x16x6xf32>
    %162 = vector.extract_strided_slice %161 {offsets = [0, 0, 0, 0], sizes = [2, 4, 6, 6], strides = [1, 1, 1, 1]} : vector<2x4x16x6xf32> to vector<2x4x6x6xf32>
    %cst_49 = arith.constant 0.00102838012 : f32
    %163 = vector.broadcast %cst_49 : f32 to vector<2x4x6x6xf32>
    %164 = arith.mulf %163, %162 : vector<2x4x6x6xf32>
    %165 = vector.extract_strided_slice %161 {offsets = [0, 0, 1, 0], sizes = [2, 4, 6, 6], strides = [1, 1, 1, 1]} : vector<2x4x16x6xf32> to vector<2x4x6x6xf32>
    %cst_50 = arith.constant 0.00759875821 : f32
    %166 = vector.broadcast %cst_50 : f32 to vector<2x4x6x6xf32>
    %167 = arith.mulf %166, %165 : vector<2x4x6x6xf32>
    %168 = arith.addf %164, %167 : vector<2x4x6x6xf32>
    %169 = vector.extract_strided_slice %161 {offsets = [0, 0, 2, 0], sizes = [2, 4, 6, 6], strides = [1, 1, 1, 1]} : vector<2x4x16x6xf32> to vector<2x4x6x6xf32>
    %cst_51 = arith.constant 0.0360007733 : f32
    %170 = vector.broadcast %cst_51 : f32 to vector<2x4x6x6xf32>
    %171 = arith.mulf %170, %169 : vector<2x4x6x6xf32>
    %172 = arith.addf %168, %171 : vector<2x4x6x6xf32>
    %173 = vector.extract_strided_slice %161 {offsets = [0, 0, 3, 0], sizes = [2, 4, 6, 6], strides = [1, 1, 1, 1]} : vector<2x4x16x6xf32> to vector<2x4x6x6xf32>
    %cst_52 = arith.constant 0.109360687 : f32
    %174 = vector.broadcast %cst_52 : f32 to vector<2x4x6x6xf32>
    %175 = arith.mulf %174, %173 : vector<2x4x6x6xf32>
    %176 = arith.addf %172, %175 : vector<2x4x6x6xf32>
    %177 = vector.extract_strided_slice %161 {offsets = [0, 0, 4, 0], sizes = [2, 4, 6, 6], strides = [1, 1, 1, 1]} : vector<2x4x16x6xf32> to vector<2x4x6x6xf32>
    %cst_53 = arith.constant 0.213005543 : f32
    %178 = vector.broadcast %cst_53 : f32 to vector<2x4x6x6xf32>
    %179 = arith.mulf %178, %177 : vector<2x4x6x6xf32>
    %180 = arith.addf %176, %179 : vector<2x4x6x6xf32>
    %181 = vector.extract_strided_slice %161 {offsets = [0, 0, 5, 0], sizes = [2, 4, 6, 6], strides = [1, 1, 1, 1]} : vector<2x4x16x6xf32> to vector<2x4x6x6xf32>
    %cst_54 = arith.constant 0.266011715 : f32
    %182 = vector.broadcast %cst_54 : f32 to vector<2x4x6x6xf32>
    %183 = arith.mulf %182, %181 : vector<2x4x6x6xf32>
    %184 = arith.addf %180, %183 : vector<2x4x6x6xf32>
    %185 = vector.extract_strided_slice %161 {offsets = [0, 0, 6, 0], sizes = [2, 4, 6, 6], strides = [1, 1, 1, 1]} : vector<2x4x16x6xf32> to vector<2x4x6x6xf32>
    %cst_55 = arith.constant 0.213005543 : f32
    %186 = vector.broadcast %cst_55 : f32 to vector<2x4x6x6xf32>
    %187 = arith.mulf %186, %185 : vector<2x4x6x6xf32>
    %188 = arith.addf %184, %187 : vector<2x4x6x6xf32>
    %189 = vector.extract_strided_slice %161 {offsets = [0, 0, 7, 0], sizes = [2, 4, 6, 6], strides = [1, 1, 1, 1]} : vector<2x4x16x6xf32> to vector<2x4x6x6xf32>
    %cst_56 = arith.constant 0.109360687 : f32
    %190 = vector.broadcast %cst_56 : f32 to vector<2x4x6x6xf32>
    %191 = arith.mulf %190, %189 : vector<2x4x6x6xf32>
    %192 = arith.addf %188, %191 : vector<2x4x6x6xf32>
    %193 = vector.extract_strided_slice %161 {offsets = [0, 0, 8, 0], sizes = [2, 4, 6, 6], strides = [1, 1, 1, 1]} : vector<2x4x16x6xf32> to vector<2x4x6x6xf32>
    %cst_57 = arith.constant 0.0360007733 : f32
    %194 = vector.broadcast %cst_57 : f32 to vector<2x4x6x6xf32>
    %195 = arith.mulf %194, %193 : vector<2x4x6x6xf32>
    %196 = arith.addf %192, %195 : vector<2x4x6x6xf32>
    %197 = vector.extract_strided_slice %161 {offsets = [0, 0, 9, 0], sizes = [2, 4, 6, 6], strides = [1, 1, 1, 1]} : vector<2x4x16x6xf32> to vector<2x4x6x6xf32>
    %cst_58 = arith.constant 0.00759875821 : f32
    %198 = vector.broadcast %cst_58 : f32 to vector<2x4x6x6xf32>
    %199 = arith.mulf %198, %197 : vector<2x4x6x6xf32>
    %200 = arith.addf %196, %199 : vector<2x4x6x6xf32>
    %201 = vector.extract_strided_slice %161 {offsets = [0, 0, 10, 0], sizes = [2, 4, 6, 6], strides = [1, 1, 1, 1]} : vector<2x4x16x6xf32> to vector<2x4x6x6xf32>
    %cst_59 = arith.constant 0.00102838012 : f32
    %202 = vector.broadcast %cst_59 : f32 to vector<2x4x6x6xf32>
    %203 = arith.mulf %202, %201 : vector<2x4x6x6xf32>
    %204 = arith.addf %200, %203 : vector<2x4x6x6xf32>
    %205 = arith.mulf %69, %114 : vector<2x4x6x6xf32>
    %206 = arith.mulf %69, %69 : vector<2x4x6x6xf32>
    %207 = arith.mulf %114, %114 : vector<2x4x6x6xf32>
    %208 = arith.addf %206, %207 : vector<2x4x6x6xf32>
    %209 = arith.subf %159, %208 : vector<2x4x6x6xf32>
    %210 = arith.subf %204, %205 : vector<2x4x6x6xf32>
    %cst_60 = arith.constant 2.000000e+00 : f32
    %211 = vector.broadcast %cst_60 : f32 to vector<2x4x6x6xf32>
    %212 = arith.mulf %211, %205 : vector<2x4x6x6xf32>
    %cst_61 = arith.constant 9.99999974E-5 : f32
    %213 = vector.broadcast %cst_61 : f32 to vector<2x4x6x6xf32>
    %214 = arith.addf %212, %213 : vector<2x4x6x6xf32>
    %cst_62 = arith.constant 2.000000e+00 : f32
    %215 = vector.broadcast %cst_62 : f32 to vector<2x4x6x6xf32>
    %216 = arith.mulf %215, %210 : vector<2x4x6x6xf32>
    %cst_63 = arith.constant 8.99999984E-4 : f32
    %217 = vector.broadcast %cst_63 : f32 to vector<2x4x6x6xf32>
    %218 = arith.addf %216, %217 : vector<2x4x6x6xf32>
    %219 = arith.mulf %214, %218 : vector<2x4x6x6xf32>
    %cst_64 = arith.constant 9.99999974E-5 : f32
    %220 = vector.broadcast %cst_64 : f32 to vector<2x4x6x6xf32>
    %221 = arith.addf %208, %220 : vector<2x4x6x6xf32>
    %cst_65 = arith.constant 8.99999984E-4 : f32
    %222 = vector.broadcast %cst_65 : f32 to vector<2x4x6x6xf32>
    %223 = arith.addf %209, %222 : vector<2x4x6x6xf32>
    %224 = arith.mulf %221, %223 : vector<2x4x6x6xf32>
    %225 = tpu.reciprocal %224 {approx = true} : vector<2x4x6x6xf32> -> vector<2x4x6x6xf32>
    %226 = arith.mulf %219, %225 : vector<2x4x6x6xf32>
    %cst_66 = arith.constant dense<0.000000e+00> : vector<2x4x6xf32>
    %227 = vector.multi_reduction <add>, %226, %cst_66 [3] : vector<2x4x6x6xf32> to vector<2x4x6xf32>
    %228 = vector.shape_cast %227 : vector<2x4x6xf32> to vector<2x4x6x1xf32>
    %cst_67 = arith.constant dense<0.000000e+00> : vector<2x4x1xf32>
    %229 = vector.multi_reduction <add>, %228, %cst_67 [2] : vector<2x4x6x1xf32> to vector<2x4x1xf32>
    %230 = vector.shape_cast %229 : vector<2x4x1xf32> to vector<2x4x1x1xf32>
    %cst_68 = arith.constant dense<0.000000e+00> : vector<2x1x1xf32>
    %231 = vector.multi_reduction <add>, %230, %cst_68 [1] : vector<2x4x1x1xf32> to vector<2x1x1xf32>
    %232 = vector.shape_cast %231 : vector<2x1x1xf32> to vector<2x1x1x1xf32>
    %233 = vector.shape_cast %232 : vector<2x1x1x1xf32> to vector<2x1x1xf32>
    %cst_69 = arith.constant 0.0069444445 : f32
    %234 = vector.broadcast %cst_69 : f32 to vector<2x1x1xf32>
    %235 = arith.mulf %233, %234 : vector<2x1x1xf32>
    %236 = tpu.iota {dimensions = array<i32: 2>} : vector<2x8x128xi32>
    %c0_i32 = arith.constant 0 : i32
    %237 = vector.broadcast %c0_i32 : i32 to vector<2x8x128xi32>
    %238 = arith.cmpi eq, %236, %237 : vector<2x8x128xi32>
    %c1_i32 = arith.constant 1 : i32
    %239 = vector.broadcast %c1_i32 : i32 to vector<2x8x128xi32>
    %240 = arith.cmpi eq, %236, %239 : vector<2x8x128xi32>
    %c2_i32 = arith.constant 2 : i32
    %241 = vector.broadcast %c2_i32 : i32 to vector<2x8x128xi32>
    %242 = arith.cmpi eq, %236, %241 : vector<2x8x128xi32>
    %243 = vector.shape_cast %14 : vector<2x1x1xf32> to vector<2x1x1xf32>
    %244 = vector.broadcast %243 : vector<2x1x1xf32> to vector<2x8x128xf32>
    %245 = vector.shape_cast %18 : vector<2x1x1xf32> to vector<2x1x1xf32>
    %246 = vector.broadcast %245 : vector<2x1x1xf32> to vector<2x8x128xf32>
    %247 = arith.select %242, %244, %246 : vector<2x8x128xi1>, vector<2x8x128xf32>
    %248 = vector.shape_cast %10 : vector<2x1x1xf32> to vector<2x1x1xf32>
    %249 = vector.broadcast %248 : vector<2x1x1xf32> to vector<2x8x128xf32>
    %250 = arith.select %240, %249, %247 : vector<2x8x128xi1>, vector<2x8x128xf32>
    %251 = vector.shape_cast %235 : vector<2x1x1xf32> to vector<2x1x1xf32>
    %252 = vector.broadcast %251 : vector<2x1x1xf32> to vector<2x8x128xf32>
    %253 = arith.select %238, %252, %250 : vector<2x8x128xi1>, vector<2x8x128xf32>
    %c0_70 = arith.constant 0 : index
    %c0_71 = arith.constant 0 : index
    %c0_72 = arith.constant 0 : index
    %254 = vector.load %arg4[%c0_70, %c0_71, %c0_72] : memref<2x8x128xf32, #tpu.memory_space<vmem>>, vector<2x8x128xf32>
    tpu.vector_store %arg4[%c0_70, %c0_71, %c0_72], %253 {strides = array<i32>} : memref<2x8x128xf32, #tpu.memory_space<vmem>>, vector<2x8x128xf32>,
    return
  }
  func.func @transform_0(%arg0: i32) -> (i32, i32, i32) {
    %c0_i32 = arith.constant 0 : i32
    %c0_i32_0 = arith.constant 0 : i32
    %c0_i32_1 = arith.constant 0 : i32
    return %arg0, %c0_i32, %c0_i32_0 : i32, i32, i32
  }
  func.func @transform_1(%arg0: i32) -> (i32, i32, i32) {
    %c0_i32 = arith.constant 0 : i32
    %c0_i32_0 = arith.constant 0 : i32
    %c0_i32_1 = arith.constant 0 : i32
    return %arg0, %c0_i32, %c0_i32_0 : i32, i32, i32
  }
  func.func @transform_2(%arg0: i32) -> (i32, i32) {
    %c0_i32 = arith.constant 0 : i32
    %c0_i32_0 = arith.constant 0 : i32
    %c0_i32_1 = arith.constant 0 : i32
    return %c0_i32, %c0_i32_0 : i32, i32
  }
  func.func @transform_3(%arg0: i32) -> (i32, i32, i32) {
    %c0_i32 = arith.constant 0 : i32
    %c0_i32_0 = arith.constant 0 : i32
    %c0_i32_1 = arith.constant 0 : i32
    return %arg0, %c0_i32, %c0_i32_0 : i32, i32, i32
  }
}

</mosaic_0001>

<bundles_post_ra>
// kernel: bcms_loss.1
= control target key start
LH: loop header
LB: loop body
LE: loop exit
PB: predicated region body
PF: predicated region fallthrough
CT: control target
= control target key end

     0   :  { %vm112_vm0 = vcmask 130048   ;;  %vm712_vm1 = vcmask 1044480   ;;  %vm785_vm2 = vcmask 1043456   ;;  %vm858_vm3 = vcmask 1042432   ;;  %s5798_s2 = inlined_call_operand.vmem [shape: f32[16,6], index: 2, kind: input, shape index: {}]   ;;  %s5799_s0 = inlined_call_operand.vmem [shape: f32[2,64,16], index: 0, kind: input, shape index: {}]   ;;  %s5800_s1 = inlined_call_operand.vmem [shape: f32[2,64,16], index: 1, kind: input, shape index: {}]   ;;  %s5801_s3 = inlined_call_operand.vmem [shape: f32[2,8,128], index: 3, kind: output, shape index: {}]  }
   0x1   :  { %v46_v0 = vld [vmem:[%s5798_s2] sm:$0xff]  ;;  %v47_v1 = vld [vmem:[%s5798_s2 + $0x8] sm:$0xff]  ;;  %v3664_v7 = vld [vmem:[%s5799_s0 + $0x10] sm:$0xff]  ;;  %vm899_vm4 = vcmask 1041408   ;;  %vm940_vm5 = vcmask 1040384   ;;  %vm3224_vm6 = vcmask 46080  }
   0x2   :  { %v3640_v2 = vld [vmem:[%s5799_s0] sm:$0xff]  ;;  %v3579_v3 = vpack.c.bf16 %v47_v1, %v46_v0  ;;  %v3654_v5 = vld [vmem:[%s5799_s0 + $0x8] sm:$0xff]  ;;  %v3669_v8 = vld [vmem:[%s5800_s1 + $0x10] sm:$0xff]  ;;  %v337_v56 = vmul.f32 %v3664_v7, %v3664_v7  ;;  %vm3249_vm7 = vcmask 1045504  }
   0x3   :  { %3471 = vmatprep.mubr.msk.f32.mxu0 %vm112_vm0, %v3640_v2  ;;  %v3647_v4 = vld [vmem:[%s5800_s1] sm:$0xff]  ;;  %v3659_v6 = vld [vmem:[%s5800_s1 + $0x8] sm:$0xff]  ;;  %v3680_v9 = vld [vmem:[%s5799_s0 + $0x18] sm:$0xff]  ;;  %v3793_v27 = vsub.f32 %v3664_v7, %v3669_v8  ;;  %v335_v45 = vmul.f32 %v3640_v2, %v3640_v2  ;;  %v336_v49 = vmul.f32 %v3654_v5, %v3654_v5  ;;  %v353_v60 = vmul.f32 %v3669_v8, %v3669_v8 }
   0x4   :  { %3499 = vmatprep.mubr.msk.f32.mxu1 %vm112_vm0, %v3647_v4  ;;  %3580 = vmatprep.subr.bf16.mxu0 %v3579_v3  ;;  %v3685_v10 = vld [vmem:[%s5800_s1 + $0x18] sm:$0xff]  ;;  %v3692_v11 = vld [vmem:[%s5799_s0 + $0x20] sm:$0xff]  ;;  %v3710_v13 = vld [vmem:[%s5799_s0 + $0x28] sm:$0xff]  ;;  %v3775_v23 = vsub.f32 %v3640_v2, %v3647_v4  ;;  %v3789_v26 = vsub.f32 %v3654_v5, %v3659_v6  ;;  %v351_v46 = vmul.f32 %v3647_v4, %v3647_v4 }
   0x5   :  { %3584 = vmatprep.subr.bf16.mxu1 %v3579_v3  ;;  %3582 = vmatpush3.bf16.msra.mxu0 %v3579_v3  ;;  %v3697_v12 = vld [vmem:[%s5800_s1 + $0x20] sm:$0xff]  ;;  %v3715_v14 = vld [vmem:[%s5800_s1 + $0x28] sm:$0xff]  ;;  %v3720_v15 = vld [vmem:[%s5799_s0 + $0x30] sm:$0xff]  ;;  %v3797_v28 = vsub.f32 %v3680_v9, %v3685_v10  ;;  %v66_v32 = vand.u32 2147483647, %v3793_v27  ;;  %v352_v52 = vmul.f32 %v3659_v6, %v3659_v6  ;;  %v383_v0 = vmul.f32 %v3647_v4, %v3640_v2 }
   0x6   :  { %3586 = vmatpush3.bf16.msra.mxu1 %v3579_v3  ;;  %3588 = vmatprep.subr.bf16.mxu0 %v3579_v3  ;;  %v3725_v16 = vld [vmem:[%s5800_s1 + $0x30] sm:$0xff]  ;;  %v3738_v17 = vld [vmem:[%s5799_s0 + $0x38] sm:$0xff]  ;;  %v3748_v19 = vld [vmem:[%s5799_s0 + $0x40] sm:$0xff]  ;;  %v64_v29 = vand.u32 2147483647, %v3775_v23  ;;  %v3802_v30 = vsub.f32 %v3692_v11, %v3697_v12  ;;  %v3812_v33 = vsub.f32 %v3710_v13, %v3715_v14  ;;  %v80_v54 = vmul.f32 %v3775_v23, %v3775_v23 }
   0x7   :  { %3592 = vmatprep.subr.bf16.mxu1 %v3579_v3  ;;  %v3743_v18 = vld [vmem:[%s5800_s1 + $0x38] sm:$0xff]  ;;  %v3753_v20 = vld [vmem:[%s5800_s1 + $0x40] sm:$0xff]  ;;  %v3766_v21 = vld [vmem:[%s5799_s0 + $0x48] sm:$0xff]  ;;  %v65_v31 = vand.u32 2147483647, %v3789_v26  ;;  %v119_v40 = vsel %vm112_vm0, %v66_v32, 0.0  ;;  %v81_v58 = vmul.f32 %v3789_v26, %v3789_v26  ;;  %v367_v63 = vadd.f32 %v351_v46, %v335_v45 }
   0x8   :  { %3472 = vmatmul.mubr.msk.f32.vlgmr.msra.gmra.mrb[0].mxu0 %vm112_vm0, %v3654_v5  ;;  %v3771_v22 = vld [vmem:[%s5800_s1 + $0x48] sm:$0xff]  ;;  %v3780_v24 = vld [vmem:[%s5799_s0 + $0x50] sm:$0xff]  ;;  %v3821_v34 = vld [vmem:[%s5799_s0 + $0x58] sm:$0xff]  ;;  %v113_v36 = vsel %vm112_vm0, %v64_v29, 0.0  ;;  %v67_v37 = vand.u32 2147483647, %v3797_v28  ;;  %120 = vadd.xlane.f32.xlu1 %v119_v40  ;;  %v3896_v55 = vsub.f32 %v3748_v19, %v3753_v20  ;;  %v384_v1 = vmul.f32 %v3659_v6, %v3654_v5 }
   0x9   :  { %3500 = vmatmul.mubr.msk.f32.vlgmr.msra.gmra.mrb[0].mxu1 %vm112_vm0, %v3659_v6  ;;  %3590 = vmatpush3.bf16.msra.mxu0 %v3579_v3  ;;  %v3785_v25 = vld [vmem:[%s5800_s1 + $0x50] sm:$0xff]  ;;  %v3826_v35 = vld [vmem:[%s5800_s1 + $0x58] sm:$0xff]  ;;  %v3835_v38 = vld [vmem:[%s5799_s0 + $0x60] sm:$0xff]  ;;  %v116_v41 = vsel %vm112_vm0, %v65_v31, 0.0  ;;  %v68_v42 = vand.u32 2147483647, %v3802_v30  ;;  %v3911_v59 = vsub.f32 %v3766_v21, %v3771_v22  ;;  %v339_v2 = vmul.f32 %v3692_v11, %v3692_v11 }
   0xa   :  { %3474 = vmatprep.mubr.msk.f32.mxu0 %vm112_vm0, %v3664_v7  ;;  %3502 = vmatprep.mubr.msk.f32.mxu1 %vm112_vm0, %v3669_v8  ;;  %v3840_v39 = vld [vmem:[%s5800_s1 + $0x60] sm:$0xff]  ;;  %v122_v43 = vsel %vm112_vm0, %v67_v37, 0.0  ;;  %v5802_v44 = vand.u32 2147483647, %v3812_v33  ;;  %v3868_v47 = vld [vmem:[%s5799_s0 + $0x68] sm:$0xff]  ;;  %v3880_v50 = vld [vmem:[%s5799_s0 + $0x70] sm:$0xff]  ;;  %v355_v6 = vmul.f32 %v3697_v12, %v3697_v12  ;;  %v369_v45 = vadd.f32 %v353_v60, %v337_v56 }
   0xb   :  { %3594 = vmatpush3.bf16.msra.mxu1 %v3579_v3  ;;  %114 = vadd.xlane.f32.xlu0 %v113_v36  ;;  %v3873_v48 = vld [vmem:[%s5800_s1 + $0x68] sm:$0xff]  ;;  %v3885_v51 = vld [vmem:[%s5800_s1 + $0x70] sm:$0xff]  ;;  %v125_v53 = vsel %vm112_vm0, %v68_v42, 0.0  ;;  %v3922_v61 = vld [vmem:[%s5799_s0 + $0x78] sm:$0xff]  ;;  %v338_v3 = vmul.f32 %v3680_v9, %v3680_v9  ;;  %v354_v36 = vmul.f32 %v3685_v10, %v3685_v10  ;;  %v187_v40 = vsel %vm112_vm0, %v80_v54, 0.0 }
   0xc   :  { %3475 = vmatmul.mubr.msk.f32.gmra.mrb[2].mxu0 %vm112_vm0, %v3680_v9  ;;  %123 = vadd.xlane.f32.xlu1 %v122_v43  ;;  %v128_v57 = vsel %vm112_vm0, %v5802_v44, 0.0  ;;  %v3927_v62 = vld [vmem:[%s5800_s1 + $0x78] sm:$0xff]  ;;  %v368_v43 = vadd.f32 %v352_v52, %v336_v49  ;;  %v190_v4 = vsel %vm112_vm0, %v81_v58, 0.0  ;;  %v89_v5 = vmul.f32 %v3911_v59, %v3911_v59 }
   0xd   :  { %3503 = vmatmul.mubr.msk.f32.gmra.mrb[2].mxu1 %vm112_vm0, %v3685_v10  ;;  %3477 = vmatprep.mubr.msk.f32.mxu0 %vm112_vm0, %v3692_v11  ;;  %v385_v46 = vmul.f32 %v3669_v8, %v3664_v7  ;;  %v340_v49 = vmul.f32 %v3710_v13, %v3710_v13  ;;  %v356_v52 = vmul.f32 %v3715_v14, %v3715_v14  ;;  %v72_v56 = vand.u32 2147483647, %v3896_v55 }
   0xe   :  { %3505 = vmatprep.mubr.msk.f32.mxu1 %vm112_vm0, %v3697_v12  ;;  %v386_v7 = vmul.f32 %v3685_v10, %v3680_v9  ;;  %v214_v8 = vsel %vm112_vm0, %v89_v5, 0.0  ;;  %v97_v60 = vmul.f32 %v81_v58, %v65_v31  ;;  %v357_v23 = vmul.f32 %v3725_v16, %v3725_v16 }
   0xf   :  { %117 = vadd.xlane.f32.xlu0 %v116_v41  ;;  %v88_v41 = vmul.f32 %v3896_v55, %v3896_v55  ;;  %v342_v9 = vmul.f32 %v3738_v17, %v3738_v17  ;;  %v358_v10 = vmul.f32 %v3743_v18, %v3743_v18  ;;  %v343_v26 = vmul.f32 %v3748_v19, %v3748_v19 }
  0x10   :  { %3478 = vmatmul.mubr.msk.f32.gmra.mrb[4].mxu0 %vm112_vm0, %v3710_v13  ;;  %129 = vadd.xlane.f32.xlu1 %v128_v57  ;;  %v370_v57 = vadd.f32 %v354_v36, %v338_v3  ;;  %v372_v58 = vadd.f32 %v356_v52, %v340_v49  ;;  %v389_v3 = vmul.f32 %v3725_v16, %v3720_v15 }
  0x11   :  { %3506 = vmatmul.mubr.msk.f32.gmra.mrb[4].mxu1 %vm112_vm0, %v3715_v14  ;;  %3480 = vmatprep.mubr.msk.f32.mxu0 %vm112_vm0, %v3720_v15  ;;  %v211_v44 = vsel %vm112_vm0, %v88_v41, 0.0  ;;  %v104_v55 = vmul.f32 %v88_v41, %v72_v56  ;;  %v344_v36 = vmul.f32 %v3766_v21, %v3766_v21  ;;  %v374_v41 = vadd.f32 %v358_v10, %v342_v9 }
  0x12   :  { %3508 = vmatprep.mubr.msk.f32.mxu1 %vm112_vm0, %v3725_v16  ;;  %v362_v49 = vmul.f32 %v3826_v35, %v3826_v35  ;;  %v347_v52 = vmul.f32 %v3835_v38, %v3835_v38 }
  0x13   :  { %126 = vadd.xlane.f32.xlu0 %v125_v53  ;;  %v341_v53 = vmul.f32 %v3720_v15, %v3720_v15 }
  0x14   :  { %3481 = vmatmul.mubr.msk.f32.gmra.mrb[6].mxu0 %vm112_vm0, %v3738_v17  ;;  %191 = vadd.xlane.f32.xlu1 %v190_v4  ;;  %v361_v4 = vmul.f32 %v3785_v25, %v3785_v25 }
  0x15   :  { %3509 = vmatmul.mubr.msk.f32.gmra.mrb[6].mxu1 %vm112_vm0, %v3743_v18  ;;  %3483 = vmatprep.mubr.msk.f32.mxu0 %vm112_vm0, %v3748_v19 }
  0x16   :  { %3511 = vmatprep.mubr.msk.f32.mxu1 %vm112_vm0, %v3753_v20 }
  0x17   :  { %188 = vadd.xlane.f32.xlu0 %v187_v40  ;;  %v345_v40 = vmul.f32 %v3780_v24, %v3780_v24 }
  0x18   :  { %3484 = vmatmul.mubr.msk.f32.gmra.mrb[8].mxu0 %vm112_vm0, %v3766_v21  ;;  %215 = vadd.xlane.f32.xlu1 %v214_v8  ;;  %v363_v8 = vmul.f32 %v3840_v39, %v3840_v39 }
  0x19   :  { %3512 = vmatmul.mubr.msk.f32.gmra.mrb[8].mxu1 %vm112_vm0, %v3771_v22  ;;  %3486 = vmatprep.mubr.msk.f32.mxu0 %vm112_vm0, %v3780_v24 }
  0x1a   :  { %3514 = vmatprep.mubr.msk.f32.mxu1 %vm112_vm0, %v3785_v25 }
  0x1b   :  { %212 = vadd.xlane.f32.xlu0 %v211_v44 }
  0x1c   :  { %3487 = vmatmul.mubr.msk.f32.gmra.mrb[10].mxu0 %vm112_vm0, %v3821_v34 }
  0x1d   :  { %3515 = vmatmul.mubr.msk.f32.gmra.mrb[10].mxu1 %vm112_vm0, %v3826_v35  ;;  %3489 = vmatprep.mubr.msk.f32.mxu0 %vm112_vm0, %v3835_v38 }
  0x1e   :  { %3517 = vmatprep.mubr.msk.f32.mxu1 %vm112_vm0, %v3840_v39 }
  0x20   :  { %3490 = vmatmul.mubr.msk.f32.gmra.mrb[12].mxu0 %vm112_vm0, %v3868_v47 }
  0x21   :  { %3518 = vmatmul.mubr.msk.f32.gmra.mrb[12].mxu1 %vm112_vm0, %v3873_v48  ;;  %3492 = vmatprep.mubr.msk.f32.mxu0 %vm112_vm0, %v3880_v50 }
  0x22   :  { %3520 = vmatprep.mubr.msk.f32.mxu1 %vm112_vm0, %v3885_v51 }
  0x24   :  { %3493 = vmatmul.mubr.msk.f32.gmra.mrb[14].mxu0 %vm112_vm0, %v3922_v61 }
  0x25   :  { %3521 = vmatmul.mubr.msk.f32.gmra.mrb[14].mxu1 %vm112_vm0, %v3927_v62  ;;  %3527 = vmatprep.mubr.msk.f32.mxu0 %vm112_vm0, %v367_v63  ;;  %v96_v63 = vmul.f32 %v80_v54, %v64_v29  ;;  %v371_v29 = vadd.f32 %v355_v6, %v339_v2  ;;  %v387_v54 = vmul.f32 %v3697_v12, %v3692_v11  ;;  %v264_v12 = vsel %vm112_vm0, %v97_v60, 0.0 }
  0x26   :  { %3555 = vmatprep.mubr.msk.f32.mxu1 %vm112_vm0, %v383_v0  ;;  %v73_v0 = vand.u32 2147483647, %v3911_v59  ;;  %v388_v11 = vmul.f32 %v3715_v14, %v3710_v13  ;;  %v359_v59 = vmul.f32 %v3753_v20, %v3753_v20  ;;  %v360_v13 = vmul.f32 %v3771_v22, %v3771_v22  ;;  %265 = vadd.xlane.f32.xlu1 %v264_v12 }
  0x27   :  { %v261_v31 = vsel %vm112_vm0, %v96_v63, 0.0  ;;  %v285_v14 = vsel %vm112_vm0, %v104_v55, 0.0  ;;  %v391_v6 = vmul.f32 %v3753_v20, %v3748_v19  ;;  %v392_v20 = vmul.f32 %v3771_v22, %v3766_v21 }
  0x28   :  { %3528 = vmatmul.mubr.msk.f32.vlgmr.msra.gmra.mrb[16].mxu0 %vm112_vm0, %v368_v43  ;;  %v105_v44 = vmul.f32 %v89_v5, %v73_v0  ;;  %262 = vadd.xlane.f32.xlu0 %v261_v31  ;;  %v390_v43 = vmul.f32 %v3743_v18, %v3738_v17  ;;  %v375_v5 = vadd.f32 %v359_v59, %v343_v26  ;;  %v140_v63 = vsel %vm112_vm0, %v73_v0, 0.0 }
  0x29   :  { %3556 = vmatmul.mubr.msk.f32.vlgmr.msra.gmra.mrb[16].mxu1 %vm112_vm0, %v384_v1  ;;  %3530 = vmatprep.mubr.msk.f32.mxu0 %vm112_vm0, %v369_v45  ;;  %v373_v1 = vadd.f32 %v357_v23, %v341_v53  ;;  %v346_v45 = vmul.f32 %v3821_v34, %v3821_v34  ;;  %v137_v53 = vsel %vm112_vm0, %v72_v56, 0.0  ;;  %v376_v19 = vadd.f32 %v360_v13, %v344_v36 }
  0x2a   :  { %3558 = vmatprep.mubr.msk.f32.mxu1 %vm112_vm0, %v385_v46  ;;  %v288_v2 = vsel %vm112_vm0, %v105_v44, 0.0  ;;  %v58_v46 = vsub.f32 %v3780_v24, %v3785_v25  ;;  %v377_v56 = vadd.f32 %v361_v4, %v345_v40  ;;  %v393_v60 = vmul.f32 %v3785_v25, %v3780_v24 }
  0x2b   :  { %289 = vadd.xlane.f32.xlu1 %v288_v2  ;;  %v348_v23 = vmul.f32 %v3868_v47, %v3868_v47  ;;  %v364_v21 = vmul.f32 %v3873_v48, %v3873_v48  ;;  %v349_v22 = vmul.f32 %v3880_v50, %v3880_v50  ;;  %v378_v24 = vadd.f32 %v362_v49, %v346_v45 }
  0x2c   :  { %3531 = vmatmul.mubr.msk.f32.gmra.mrb[18].mxu0 %vm112_vm0, %v370_v57  ;;  %286 = vadd.xlane.f32.xlu0 %v285_v14  ;;  %v82_v57 = vmul.f32 %v3793_v27, %v3793_v27  ;;  %v394_v25 = vmul.f32 %v3826_v35, %v3821_v34  ;;  %v365_v26 = vmul.f32 %v3885_v51, %v3885_v51 }
  0x2d   :  { %3559 = vmatmul.mubr.msk.f32.gmra.mrb[18].mxu1 %vm112_vm0, %v386_v7  ;;  %3533 = vmatprep.mubr.msk.f32.mxu0 %vm112_vm0, %v371_v29  ;;  %v90_v7 = vmul.f32 %v58_v46, %v58_v46  ;;  %v74_v29 = vand.u32 2147483647, %v58_v46  ;;  %v379_v27 = vadd.f32 %v363_v8, %v347_v52  ;;  %v350_v31 = vmul.f32 %v3922_v61, %v3922_v61 }
  0x2e   :  { %3561 = vmatprep.mubr.msk.f32.mxu1 %vm112_vm0, %v387_v54  ;;  %v193_v0 = vsel %vm112_vm0, %v82_v57, 0.0  ;;  %v98_v54 = vmul.f32 %v82_v57, %v66_v32  ;;  %v395_v32 = vmul.f32 %v3840_v39, %v3835_v38  ;;  %v366_v55 = vmul.f32 %v3927_v62, %v3927_v62 }
  0x2f   :  { %141 = vadd.xlane.f32.xlu1 %v140_v63  ;;  %v217_v9 = vsel %vm112_vm0, %v90_v7, 0.0  ;;  %v106_v10 = vmul.f32 %v90_v7, %v74_v29  ;;  %v380_v12 = vadd.f32 %v364_v21, %v348_v23  ;;  %v396_v44 = vmul.f32 %v3873_v48, %v3868_v47 }
  0x30   :  { %3534 = vmatmul.mubr.msk.f32.gmra.mrb[20].mxu0 %vm112_vm0, %v372_v58  ;;  %138 = vadd.xlane.f32.xlu0 %v137_v53  ;;  %v267_v58 = vsel %vm112_vm0, %v98_v54, 0.0  ;;  %v382_v14 = vadd.f32 %v366_v55, %v350_v31  ;;  %v398_v40 = vmul.f32 %v3927_v62, %v3922_v61  ;;  %v5896_v21 = vand.u32 2147483647, %v3812_v33 }
  0x31   :  { %3562 = vmatmul.mubr.msk.f32.gmra.mrb[20].mxu1 %vm112_vm0, %v388_v11  ;;  %3536 = vmatprep.mubr.msk.f32.mxu0 %vm112_vm0, %v373_v1  ;;  %v59_v11 = vsub.f32 %v3821_v34, %v3826_v35  ;;  %v291_v59 = vsel %vm112_vm0, %v106_v10, 0.0  ;;  %v83_v1 = vmul.f32 %v3797_v28, %v3797_v28  ;;  %v397_v34 = vmul.f32 %v3885_v51, %v3880_v50 }
  0x32   :  { %3564 = vmatprep.mubr.msk.f32.mxu1 %vm112_vm0, %v389_v3  ;;  %v381_v3 = vadd.f32 %v365_v26, %v349_v22  ;;  %v143_v35 = vsel %vm112_vm0, %v74_v29, 0.0  ;;  %v60_v28 = vsub.f32 %v3835_v38, %v3840_v39  ;;  %v4125_v55 = vsub.f32 %v3738_v17, %v3743_v18 }
  0x33   :  { %218 = vadd.xlane.f32.xlu1 %v217_v9  ;;  %v91_v36 = vmul.f32 %v59_v11, %v59_v11  ;;  %v75_v13 = vand.u32 2147483647, %v59_v11 }
  0x34   :  { %3537 = vmatmul.mubr.msk.f32.gmra.mrb[22].mxu0 %vm112_vm0, %v374_v41  ;;  %194 = vadd.xlane.f32.xlu0 %v193_v0  ;;  %v196_v41 = vsel %vm112_vm0, %v83_v1, 0.0  ;;  %v92_v46 = vmul.f32 %v60_v28, %v60_v28  ;;  %v76_v49 = vand.u32 2147483647, %v60_v28  ;;  %5897 = vst [vmem:[#allocation2_spill] sm:$0xff] %v4125_v55 }
  0x35   :  { %3565 = vmatmul.mubr.msk.f32.gmra.mrb[22].mxu1 %vm112_vm0, %v390_v43  ;;  %3539 = vmatprep.mubr.msk.f32.mxu0 %vm112_vm0, %v375_v5  ;;  %v99_v43 = vmul.f32 %v83_v1, %v67_v37  ;;  %v220_v2 = vsel %vm112_vm0, %v91_v36, 0.0  ;;  %v107_v4 = vmul.f32 %v91_v36, %v75_v13  ;;  %v146_v45 = vsel %vm112_vm0, %v75_v13, 0.0 }
  0x36   :  { %3567 = vmatprep.mubr.msk.f32.mxu1 %vm112_vm0, %v391_v6  ;;  %v84_v6 = vmul.f32 %v3802_v30, %v3802_v30  ;;  %v223_v57 = vsel %vm112_vm0, %v92_v46, 0.0  ;;  %v108_v38 = vmul.f32 %v92_v46, %v76_v49  ;;  %v149_v63 = vsel %vm112_vm0, %v76_v49, 0.0 }
  0x37   :  { %292 = vadd.xlane.f32.xlu1 %v291_v59  ;;  %v270_v5 = vsel %vm112_vm0, %v99_v43, 0.0  ;;  %v294_v37 = vsel %vm112_vm0, %v107_v4, 0.0 }
  0x38   :  { %3540 = vmatmul.mubr.msk.f32.gmra.mrb[24].mxu0 %vm112_vm0, %v376_v19  ;;  %268 = vadd.xlane.f32.xlu0 %v267_v58  ;;  %v199_v52 = vsel %vm112_vm0, %v84_v6, 0.0  ;;  %v100_v53 = vmul.f32 %v84_v6, %v68_v42  ;;  %v61_v19 = vsub.f32 %v3868_v47, %v3873_v48  ;;  %v54_v48 = vsub.f32 %v3720_v15, %v3725_v16 }
  0x39   :  { %3568 = vmatmul.mubr.msk.f32.gmra.mrb[24].mxu1 %vm112_vm0, %v392_v20  ;;  %3542 = vmatprep.mubr.msk.f32.mxu0 %vm112_vm0, %v377_v56  ;;  %v297_v20 = vsel %vm112_vm0, %v108_v38, 0.0  ;;  %v62_v16 = vsub.f32 %v3880_v50, %v3885_v51  ;;  %v4129_v58 = vmul.f32 %v4125_v55, %v4125_v55  ;;  %v4135_v51 = vsub.f32 %v3922_v61, %v3927_v62 }
  0x3a   :  { %3570 = vmatprep.mubr.msk.f32.mxu1 %vm112_vm0, %v393_v60  ;;  %v273_v39 = vsel %vm112_vm0, %v100_v53, 0.0  ;;  %v93_v7 = vmul.f32 %v61_v19, %v61_v19  ;;  %v77_v30 = vand.u32 2147483647, %v61_v19  ;;  %v85_v60 = vmul.f32 %v3812_v33, %v3812_v33 }
  0x3b   :  { %197 = vadd.xlane.f32.xlu1 %v196_v41  ;;  %v86_v23 = vmul.f32 %v54_v48, %v54_v48  ;;  %v70_v54 = vand.u32 2147483647, %v54_v48  ;;  %v94_v10 = vmul.f32 %v62_v16, %v62_v16  ;;  %v78_v26 = vand.u32 2147483647, %v62_v16  ;;  %5898 = vst [vmem:[#allocation3_spill] sm:$0xff] %v4129_v58  ;;  %5899 = vst [vmem:[#allocation4_spill] sm:$0xff] %v4135_v51 }
  0x3c   :  { %3543 = vmatmul.mubr.msk.f32.gmra.mrb[26].mxu0 %vm112_vm0, %v378_v24  ;;  %144 = vadd.xlane.f32.xlu0 %v143_v35  ;;  %v226_v42 = vsel %vm112_vm0, %v93_v7, 0.0  ;;  %v109_v8 = vmul.f32 %v93_v7, %v77_v30  ;;  %v202_v47 = vsel %vm112_vm0, %v85_v60, 0.0  ;;  %v101_v22 = vmul.f32 %v85_v60, %v5896_v21 }
  0x3d   :  { %3571 = vmatmul.mubr.msk.f32.gmra.mrb[26].mxu1 %vm112_vm0, %v394_v25  ;;  %3545 = vmatprep.mubr.msk.f32.mxu0 %vm112_vm0, %v379_v27  ;;  %v205_v29 = vsel %vm112_vm0, %v86_v23, 0.0  ;;  %v102_v24 = vmul.f32 %v86_v23, %v70_v54  ;;  %v152_v9 = vsel %vm112_vm0, %v77_v30, 0.0  ;;  %v131_v15 = vsel %vm112_vm0, %v70_v54, 0.0 }
  0x3e   :  { %3573 = vmatprep.mubr.msk.f32.mxu1 %vm112_vm0, %v395_v32  ;;  %v300_v56 = vsel %vm112_vm0, %v109_v8, 0.0  ;;  %v276_v0 = vsel %vm112_vm0, %v101_v22, 0.0  ;;  %v229_v33 = vsel %vm112_vm0, %v94_v10, 0.0  ;;  %v110_v27 = vmul.f32 %v94_v10, %v78_v26 }
  0x3f   :  { %271 = vadd.xlane.f32.xlu1 %v270_v5  ;;  %v279_v25 = vsel %vm112_vm0, %v102_v24, 0.0  ;;  %v155_v31 = vsel %vm112_vm0, %v78_v26, 0.0  ;;  %v208_v50 = vsel %vm112_vm0, %v4129_v58, 0.0  ;;  %v4139_v11 = vmul.f32 %v4135_v51, %v4135_v51 }
  0x40   :  { %3546 = vmatmul.mubr.msk.f32.gmra.mrb[28].mxu0 %vm112_vm0, %v380_v12  ;;  %221 = vadd.xlane.f32.xlu0 %v220_v2  ;;  %v303_v32 = vsel %vm112_vm0, %v110_v27, 0.0 }
  0x41   :  { %3574 = vmatmul.mubr.msk.f32.gmra.mrb[28].mxu1 %vm112_vm0, %v396_v44  ;;  %3548 = vmatprep.mubr.msk.f32.mxu0 %vm112_vm0, %v381_v3  ;;  %5900 = vst [vmem:[#allocation5_spill] sm:$0xff] %v4139_v11  ;;  %v232_v17 = vsel %vm112_vm0, %v4139_v11, 0.0 }
  0x42   :  { %3576 = vmatprep.mubr.msk.f32.mxu1 %vm112_vm0, %v397_v34 }
  0x43   :  { %147 = vadd.xlane.f32.xlu1 %v146_v45 }
  0x44   :  { %3549 = vmatmul.mubr.msk.f32.gmra.mrb[30].mxu0 %vm112_vm0, %v382_v14  ;;  %295 = vadd.xlane.f32.xlu0 %v294_v37 }
  0x45   :  { %3577 = vmatmul.mubr.msk.f32.gmra.mrb[30].mxu1 %vm112_vm0, %v398_v40 }
  0x47   :  { %224 = vadd.xlane.f32.xlu1 %v223_v57 }
  0x48   :  { %200 = vadd.xlane.f32.xlu0 %v199_v52 }
  0x4b   :  { %298 = vadd.xlane.f32.xlu1 %v297_v20 }
  0x4c   :  { %274 = vadd.xlane.f32.xlu0 %v273_v39 }
  0x4f   :  { %203 = vadd.xlane.f32.xlu1 %v202_v47 }
  0x50   :  { %150 = vadd.xlane.f32.xlu0 %v149_v63 }
  0x53   :  { %277 = vadd.xlane.f32.xlu1 %v276_v0 }
  0x54   :  { %227 = vadd.xlane.f32.xlu0 %v226_v42 }
  0x57   :  { %153 = vadd.xlane.f32.xlu1 %v152_v9 }
  0x58   :  { %301 = vadd.xlane.f32.xlu0 %v300_v56 }
  0x5b   :  { %230 = vadd.xlane.f32.xlu1 %v229_v33 }
  0x5c   :  { %206 = vadd.xlane.f32.xlu0 %v205_v29 }
  0x5f   :  { %304 = vadd.xlane.f32.xlu1 %v303_v32 }
  0x60   :  { %280 = vadd.xlane.f32.xlu0 %v279_v25 }
  0x63   :  { %156 = vadd.xlane.f32.xlu1 %v155_v31 }
  0x64   :  { %132 = vadd.xlane.f32.xlu0 %v131_v15 }
  0x67   :  { %233 = vadd.xlane.f32.xlu1 %v232_v17 }
  0x68   :  { %209 = vadd.xlane.f32.xlu0 %v208_v50 }
  0xdb   :  { %v4143_v18 = vpop.f32.mrb[0].mxu0 }
  0xdc   :  { %v4145_v12 = vpop.f32.mrb[0].mxu1  ;;  %v4148_v44 = vmul.f32 0.10936069, %v4143_v18  ;;  %v513_v1 = vpop.f32.mrb[1].mxu0  ;;  %v4159_v36 = vmul.f32 0.21300554, %v4143_v18 }
  0xdd   :  { %v1191_v59 = vpop.f32.mrb[1].mxu1  ;;  %v4151_v61 = vmul.f32 0.10936069, %v4145_v12  ;;  %v1431_v3 = vmul.f32 0.21300554, %v4145_v12 }
  0xde   :  { %v1503_v34 = vmul.f32 0.26601171, %v4145_v12  ;;  %v714_v35 = vrot.slane %v4148_v44, 3  ;;  %v4162_v13 = vmul.f32 0.26601171, %v4143_v18  ;;  %v787_v7 = vrot.slane %v4159_v36, 4 }
  0xdf   :  { %v4153_v62 = vpop.f32.mrb[2].mxu0  ;;  %v1391_v14 = vrot.slane %v4151_v61, 3  ;;  %v1463_v40 = vrot.slane %v1431_v3, 4  ;;  %v1575_v43 = vrot.slane %v1431_v3, 6  ;;  %v1270_v4 = vmul.f32 0.0010283801, %v1191_v59 }
  0xe0   :  { %v1535_v41 = vrot.slane %v1503_v34, 5  ;;  %v4165_v2 = vpop.f32.mrb[2].mxu1  ;;  %v1278_v5 = vmul.f32 0.007598758, %v1191_v59  ;;  %v1318_v28 = vmul.f32 0.036000773, %v1191_v59 }
  0xe1   :  { %v4167_v37 = vmul.f32 0.10936069, %v1191_v59  ;;  %v1430_v6 = vmul.f32 0.21300554, %v1191_v59  ;;  %v1502_v45 = vmul.f32 0.26601171, %v1191_v59 }
  0xe2   :  { %v1294_v46 = vrot.slane %v1278_v5, 1  ;;  %v1334_v49 = vrot.slane %v1318_v28, 2  ;;  %v592_v52 = vmul.f32 0.0010283801, %v513_v1  ;;  %v600_v53 = vmul.f32 0.007598758, %v513_v1 }
  0xe3   :  { %v1390_v57 = vrot.slane %v4167_v37, 3  ;;  %v1462_v38 = vrot.slane %v1430_v6, 4  ;;  %v1534_v39 = vrot.slane %v1502_v45, 5  ;;  %v1574_v19 = vrot.slane %v1430_v6, 6  ;;  %v4170_v20 = vpop.f32.mrb[3].mxu1  ;;  %v4172_v63 = vpop.f32.mrb[3].mxu0 }
  0xe4   :  { %v1310_v30 = vadd.f32 %v1294_v46, %v1270_v4  ;;  %v616_v42 = vrot.slane %v600_v53, 1  ;;  %v640_v8 = vmul.f32 0.036000773, %v513_v1  ;;  %v4175_v56 = vpop.f32.mrb[4].mxu0  ;;  %v4177_v60 = vpop.f32.mrb[4].mxu1  ;;  %v860_v16 = vrot.slane %v4162_v13, 5 }
  0xe5   :  { %v1392_v47 = vsel %vm712_vm1, %v1390_v57, %v1391_v14  ;;  %v1464_v48 = vsel %vm785_vm2, %v1462_v38, %v1463_v40  ;;  %v1536_v23 = vsel %vm858_vm3, %v1534_v39, %v1535_v41  ;;  %v4183_v29 = vsel %vm899_vm4, %v1574_v19, %v1575_v43  ;;  %v4185_v21 = vpop.f32.mrb[5].mxu1  ;;  %v4187_v22 = vpop.f32.mrb[5].mxu0 }
  0xe6   :  { %5901 = vst [vmem:[#allocation6_spill] sm:$0xff] %v4183_v29  ;;  %v1350_v0 = vadd.f32 %v1334_v49, %v1310_v30  ;;  %v632_v54 = vadd.f32 %v616_v42, %v592_v52  ;;  %v656_v24 = vrot.slane %v640_v8, 2  ;;  %v4189_v25 = vmul.f32 0.10936069, %v513_v1 }
  0xe7   :  { %v4191_v9 = vpop.f32.mrb[6].mxu0  ;;  %v901_v10 = vrot.slane %v4159_v36, 6  ;;  %v753_v33 = vmul.f32 0.21300554, %v513_v1  ;;  %v826_v26 = vmul.f32 0.26601171, %v513_v1 }
  0xe8   :  { %v4193_v15 = vpop.f32.mrb[6].mxu1  ;;  %v1422_v27 = vadd.f32 %v1392_v47, %v1350_v0  ;;  %v672_v32 = vadd.f32 %v656_v24, %v632_v54  ;;  %v713_v31 = vrot.slane %v4189_v25, 3  ;;  %v4200_v17 = vpop.f32.mrb[7].mxu0  ;;  %v4207_v13 = vmul.f32 0.007598758, %v4143_v18 }
  0xe9   :  { %v4198_v50 = vpop.f32.mrb[7].mxu1  ;;  %v786_v59 = vrot.slane %v753_v33, 4  ;;  %v859_v3 = vrot.slane %v826_v26, 5  ;;  %v900_v34 = vrot.slane %v753_v33, 6  ;;  %v4210_v1 = vmul.f32 0.0010283801, %v4143_v18 }
  0xea   :  { %5902 = vst [vmem:[#allocation7_spill] sm:$0xff] %v4207_v13  ;;  %v1494_v36 = vadd.f32 %v1464_v48, %v1422_v27  ;;  %v715_v41 = vsel %vm712_vm1, %v713_v31, %v714_v35  ;;  %v4229_v35 = vmul.f32 0.10936069, %v4153_v62  ;;  %v4232_v57 = vmul.f32 0.21300554, %v4153_v62 }
  0xeb   :  { %v4202_v14 = vpop.f32.mrb[8].mxu0  ;;  %5903 = vst [vmem:[#allocation8_spill] sm:$0xff] %v4210_v1  ;;  %v745_v5 = vadd.f32 %v715_v41, %v672_v32  ;;  %v788_v28 = vsel %vm785_vm2, %v786_v59, %v787_v7  ;;  %v861_v6 = vsel %vm858_vm3, %v859_v3, %v860_v16  ;;  %v4220_v45 = vsel %vm899_vm4, %v900_v34, %v901_v10 }
  0xec   :  { %v4204_v40 = vpop.f32.mrb[8].mxu1  ;;  %v4215_v4 = vpop.f32.mrb[9].mxu0  ;;  %v4222_v46 = vadd.f32 %v1536_v23, %v1494_v36  ;;  %5905 = vst [vmem:[#allocation10_spill] sm:$0xff] %v4229_v35  ;;  %v4238_v19 = vmul.f32 0.036000773, %v4143_v18  ;;  %v717_v24 = vrot.slane %v4229_v35, 3 }
  0xed   :  { %v4213_v43 = vpop.f32.mrb[9].mxu1  ;;  %v818_v53 = vadd.f32 %v788_v28, %v745_v5  ;;  %v4241_v7 = vmul.f32 0.10936069, %v4165_v2  ;;  %v1433_v47 = vmul.f32 0.21300554, %v4165_v2  ;;  %v790_v16 = vrot.slane %v4232_v57, 4 }
  0xee   :  { %5904 = vst [vmem:[#allocation9_spill] sm:$0xff] %v4222_v46  ;;  %5906 = vst [vmem:[#allocation11_spill] sm:$0xff] %v4238_v19  ;;  %v4251_v23 = vmul.f32 0.007598758, %v4145_v12  ;;  %v1505_v0 = vmul.f32 0.26601171, %v4165_v2 }
  0xef   :  { %v4224_v49 = vpop.f32.mrb[10].mxu0  ;;  %5907 = vst [vmem:[#allocation12_spill] sm:$0xff] %v4241_v7  ;;  %v4245_v8 = vadd.f32 %v861_v6, %v818_v53  ;;  %v829_v10 = vmul.f32 0.26601171, %v4153_v62  ;;  %v1394_v33 = vrot.slane %v4241_v7, 3  ;;  %v1466_v31 = vrot.slane %v1433_v47, 4 }
  0xf0   :  { %v4226_v52 = vpop.f32.mrb[10].mxu1  ;;  %v4248_v48 = vpop.f32.mrb[11].mxu0  ;;  %5908 = vst [vmem:[#allocation13_spill] sm:$0xff] %v4251_v23  ;;  %v1271_v26 = vmul.f32 0.0010283801, %v4170_v20  ;;  %v1578_v59 = vrot.slane %v1433_v47, 6 }
  0xf1   :  { %v4234_v38 = vpop.f32.mrb[11].mxu1  ;;  %v1279_v27 = vmul.f32 0.007598758, %v4170_v20  ;;  %v1319_v32 = vmul.f32 0.036000773, %v4170_v20  ;;  %v1538_v36 = vrot.slane %v1505_v0, 5 }
  0xf2   :  { %v4266_v3 = vmul.f32 0.10936069, %v4170_v20  ;;  %v1432_v34 = vmul.f32 0.21300554, %v4170_v20  ;;  %v1504_v28 = vmul.f32 0.26601171, %v4170_v20 }
  0xf3   :  { %v4254_v18 = vpop.f32.mrb[12].mxu0  ;;  %v1295_v41 = vrot.slane %v1279_v27, 1  ;;  %v1335_v5 = vrot.slane %v1319_v32, 2  ;;  %v863_v6 = vrot.slane %v829_v10, 5  ;;  %v601_v11 = vmul.f32 0.007598758, %v4172_v63 }
  0xf4   :  { %v4256_v54 = vpop.f32.mrb[12].mxu1  ;;  %5909 = vst [vmem:[#allocation14_spill] sm:$0xff] %v4266_v3  ;;  %v1393_v53 = vrot.slane %v4266_v3, 3  ;;  %v1465_v42 = vrot.slane %v1432_v34, 4  ;;  %v1577_v30 = vrot.slane %v1432_v34, 6  ;;  %v4273_v58 = vpop.f32.mrb[13].mxu0 }
  0xf5   :  { %v4271_v39 = vpop.f32.mrb[13].mxu1  ;;  %v1311_v47 = vadd.f32 %v1295_v41, %v1271_v26  ;;  %v1537_v55 = vrot.slane %v1504_v28, 5  ;;  %v641_v51 = vmul.f32 0.036000773, %v4172_v63  ;;  %v4285_v32 = vmul.f32 0.10936069, %v4172_v63 }
  0xf6   :  { %v1395_v27 = vsel %vm712_vm1, %v1393_v53, %v1394_v33  ;;  %v1467_v20 = vsel %vm785_vm2, %v1465_v42, %v1466_v31  ;;  %v4282_v10 = vsel %vm899_vm4, %v1577_v30, %v1578_v59  ;;  %v593_v1 = vmul.f32 0.0010283801, %v4172_v63 }
  0xf7   :  { %v4277_v0 = vpop.f32.mrb[14].mxu0  ;;  %5910 = vst [vmem:[#allocation15_spill] sm:$0xff] %v4282_v10  ;;  %5911 = vst [vmem:[#allocation16_spill] sm:$0xff] %v4285_v32  ;;  %v1351_v41 = vadd.f32 %v1335_v5, %v1311_v47  ;;  %v1539_v28 = vsel %vm858_vm3, %v1537_v55, %v1538_v36  ;;  %v617_v13 = vrot.slane %v601_v11, 1  ;;  %v904_v30 = vrot.slane %v4232_v57, 6 }
  0xf8   :  { %v4287_v34 = vpop.f32.mrb[14].mxu1  ;;  %v4289_v26 = vpop.f32.mrb[15].mxu0  ;;  %v716_v42 = vrot.slane %v4285_v32, 3  ;;  %v755_v31 = vmul.f32 0.21300554, %v4172_v63  ;;  %v657_v36 = vrot.slane %v641_v51, 2 }
  0xf9   :  { %5912 = vst [vmem:[#allocation17_spill] sm:$0xff] %v4289_v26  ;;  %v4293_v29 = vpop.f32.mrb[15].mxu1  ;;  %v828_v59 = vmul.f32 0.26601171, %v4172_v63  ;;  %v4302_v53 = vmul.f32 0.0010283801, %v4145_v12  ;;  %v1423_v5 = vadd.f32 %v1395_v27, %v1351_v41  ;;  %v633_v55 = vadd.f32 %v617_v13, %v593_v1 }
  0xfa   :  { %5913 = vst [vmem:[#allocation18_spill] sm:$0xff] %v4293_v29  ;;  %v718_v10 = vsel %vm712_vm1, %v716_v42, %v717_v24  ;;  %v903_v29 = vrot.slane %v755_v31, 6  ;;  %v4313_v63 = vmul.f32 0.036000773, %v4145_v12  ;;  %v4324_v42 = vmul.f32 0.007598758, %v4153_v62 }
  0xfb   :  { %v4295_v33 = vpop.f32.mrb[16].mxu0  ;;  %5915 = vst [vmem:[#allocation20_spill] sm:$0xff] %v4302_v53  ;;  %v862_v57 = vrot.slane %v828_v59, 5  ;;  %v1495_v26 = vadd.f32 %v1467_v20, %v1423_v5  ;;  %v673_v27 = vadd.f32 %v657_v36, %v633_v55  ;;  %v4343_v55 = vmul.f32 0.21300554, %v4175_v56 }
  0xfc   :  { %5914 = vst [vmem:[#allocation19_spill] sm:$0xff] %v4295_v33  ;;  %v4304_v47 = vpop.f32.mrb[16].mxu1  ;;  %v4306_v11 = vpop.f32.mrb[17].mxu0  ;;  %v789_v33 = vrot.slane %v755_v31, 4  ;;  %5917 = vst [vmem:[#allocation22_spill] sm:$0xff] %v4313_v63  ;;  %v4321_v41 = vsel %vm899_vm4, %v903_v29, %v904_v30 }
  0xfd   :  { %v4309_v46 = vpop.f32.mrb[17].mxu1  ;;  %v864_v24 = vsel %vm858_vm3, %v862_v57, %v863_v6  ;;  %5919 = vst [vmem:[#allocation24_spill] sm:$0xff] %v4321_v41  ;;  %5920 = vst [vmem:[#allocation25_spill] sm:$0xff] %v4324_v42  ;;  %v4327_v31 = vmul.f32 0.0010283801, %v4153_v62  ;;  %v4329_v12 = vadd.f32 %v1539_v28, %v1495_v26  ;;  %v746_v20 = vadd.f32 %v718_v10, %v673_v27 }
  0xfe   :  { %5916 = vst [vmem:[#allocation21_spill] sm:$0xff] %v4309_v46  ;;  %v791_v1 = vsel %vm785_vm2, %v789_v33, %v790_v16  ;;  %v4335_v6 = vmul.f32 0.10936069, %v4175_v56  ;;  %v4340_v33 = vmul.f32 0.036000773, %v4153_v62  ;;  %v793_v19 = vrot.slane %v4343_v55, 4 }
  0xff   :  { %v4315_v13 = vpop.f32.mrb[18].mxu0  ;;  %5921 = vst [vmem:[#allocation26_spill] sm:$0xff] %v4327_v31  ;;  %5922 = vst [vmem:[#allocation27_spill] sm:$0xff] %v4329_v12  ;;  %v819_v30 = vadd.f32 %v791_v1, %v746_v20  ;;  %v4346_v10 = vmul.f32 0.10936069, %v4177_v60  ;;  %v907_v12 = vrot.slane %v4343_v55, 6 }
 0x100   :  { %5918 = vst [vmem:[#allocation23_spill] sm:$0xff] %v4315_v13  ;;  %5923 = vst [vmem:[#allocation28_spill] sm:$0xff] %v4335_v6  ;;  %v4337_v29 = vpop.f32.mrb[18].mxu1  ;;  %v1435_v28 = vmul.f32 0.21300554, %v4177_v60  ;;  %v4351_v57 = vpop.f32.mrb[19].mxu0 }
 0x101   :  { %5924 = vst [vmem:[#allocation29_spill] sm:$0xff] %v4337_v29  ;;  %5925 = vst [vmem:[#allocation30_spill] sm:$0xff] %v4340_v33  ;;  %v1507_v36 = vmul.f32 0.26601171, %v4177_v60  ;;  %v4356_v1 = vmul.f32 0.036000773, %v4165_v2  ;;  %v4358_v20 = vadd.f32 %v864_v24, %v819_v30 }
 0x102   :  { %5926 = vst [vmem:[#allocation31_spill] sm:$0xff] %v4346_v10  ;;  %5927 = vst [vmem:[#allocation32_spill] sm:$0xff] %v4351_v57  ;;  %v4362_v51 = vmul.f32 0.007598758, %v4165_v2  ;;  %v4365_v26 = vmul.f32 0.0010283801, %v4165_v2 }
 0x103   :  { %5928 = vst [vmem:[#allocation33_spill] sm:$0xff] %v4356_v1  ;;  %5929 = vst [vmem:[#allocation34_spill] sm:$0xff] %v4358_v20  ;;  %v720_v5 = vrot.slane %v4335_v6, 3  ;;  %v1397_v27 = vrot.slane %v4346_v10, 3  ;;  %v1272_v62 = vmul.f32 0.0010283801, %v4185_v21 }
 0x104   :  { %5930 = vst [vmem:[#allocation35_spill] sm:$0xff] %v4362_v51  ;;  %5931 = vst [vmem:[#allocation36_spill] sm:$0xff] %v4365_v26  ;;  %v1280_v16 = vmul.f32 0.007598758, %v4185_v21  ;;  %v1469_v24 = vrot.slane %v1435_v28, 4  ;;  %v1541_v30 = vrot.slane %v1507_v36, 5 }
 0x105   :  { %v1320_v59 = vmul.f32 0.036000773, %v4185_v21  ;;  %v4374_v31 = vmul.f32 0.10936069, %v4185_v21  ;;  %v1581_v42 = vrot.slane %v1435_v28, 6  ;;  %v4381_v20 = vpop.f32.mrb[19].mxu1 }
 0x106   :  { %v1296_v2 = vrot.slane %v1280_v16, 1  ;;  %v1434_v1 = vmul.f32 0.21300554, %v4185_v21  ;;  %v1506_v33 = vmul.f32 0.26601171, %v4185_v21  ;;  %5933 = vst [vmem:[#allocation38_spill] sm:$0xff] %v4381_v20 }
 0x107   :  { %5932 = vst [vmem:[#allocation37_spill] sm:$0xff] %v4374_v31  ;;  %v831_v7 = vmul.f32 0.26601171, %v4175_v56  ;;  %v1336_v35 = vrot.slane %v1320_v59, 2  ;;  %v1396_v41 = vrot.slane %v4374_v31, 3 }
 0x108   :  { %v1312_v36 = vadd.f32 %v1296_v2, %v1272_v62  ;;  %v1468_v53 = vrot.slane %v1434_v1, 4  ;;  %v1540_v23 = vrot.slane %v1506_v33, 5  ;;  %v1580_v57 = vrot.slane %v1434_v1, 6 }
 0x109   :  { %v1398_v28 = vsel %vm712_vm1, %v1396_v41, %v1397_v27  ;;  %v602_v16 = vmul.f32 0.007598758, %v4187_v22  ;;  %v642_v29 = vmul.f32 0.036000773, %v4187_v22  ;;  %v4387_v21 = vmul.f32 0.10936069, %v4187_v22 }
 0x10a   :  { %v1352_v13 = vadd.f32 %v1336_v35, %v1312_v36  ;;  %v1470_v59 = vsel %vm785_vm2, %v1468_v53, %v1469_v24  ;;  %v1542_v55 = vsel %vm858_vm3, %v1540_v23, %v1541_v30  ;;  %v4392_v20 = vsel %vm899_vm4, %v1580_v57, %v1581_v42  ;;  %v4398_v35 = vpop.f32.mrb[20].mxu0 }
 0x10b   :  { %5934 = vst [vmem:[#allocation39_spill] sm:$0xff] %v4387_v21  ;;  %5935 = vst [vmem:[#allocation40_spill] sm:$0xff] %v4392_v20  ;;  %v594_v33 = vmul.f32 0.0010283801, %v4187_v22  ;;  %v618_v62 = vrot.slane %v602_v16, 1  ;;  %v719_v41 = vrot.slane %v4387_v21, 3 }
 0x10c   :  { %v757_v27 = vmul.f32 0.21300554, %v4187_v22  ;;  %v866_v1 = vrot.slane %v831_v7, 5  ;;  %v1424_v2 = vadd.f32 %v1398_v28, %v1352_v13  ;;  %v658_v46 = vrot.slane %v642_v29, 2 }
 0x10d   :  { %v830_v63 = vmul.f32 0.26601171, %v4187_v22  ;;  %v634_v53 = vadd.f32 %v618_v62, %v594_v33  ;;  %v721_v23 = vsel %vm712_vm1, %v719_v41, %v720_v5  ;;  %v4403_v30 = vmul.f32 0.007598758, %v4175_v56 }
 0x10e   :  { %v792_v24 = vrot.slane %v757_v27, 4  ;;  %v906_v42 = vrot.slane %v757_v27, 6  ;;  %v1496_v36 = vadd.f32 %v1470_v59, %v1424_v2  ;;  %v4406_v7 = vmul.f32 0.0010283801, %v4175_v56 }
 0x10f   :  { %5936 = vst [vmem:[#allocation41_spill] sm:$0xff] %v4403_v30  ;;  %v865_v16 = vrot.slane %v830_v63, 5  ;;  %v674_v13 = vadd.f32 %v658_v46, %v634_v53  ;;  %v4419_v63 = vmul.f32 0.036000773, %v4175_v56  ;;  %v4422_v46 = vmul.f32 0.10936069, %v4191_v9 }
 0x110   :  { %5937 = vst [vmem:[#allocation42_spill] sm:$0xff] %v4406_v7  ;;  %v794_v22 = vsel %vm785_vm2, %v792_v24, %v793_v19  ;;  %v4410_v29 = vsel %vm899_vm4, %v906_v42, %v907_v12  ;;  %v4414_v33 = vadd.f32 %v1542_v55, %v1496_v36  ;;  %v4427_v27 = vmul.f32 0.036000773, %v4177_v60  ;;  %v4439_v42 = vpop.f32.mrb[20].mxu1  ;;  %v4441_v36 = vpop.f32.mrb[21].mxu0 }
 0x111   :  { %5938 = vst [vmem:[#allocation43_spill] sm:$0xff] %v4410_v29  ;;  %v867_v62 = vsel %vm858_vm3, %v865_v16, %v866_v1  ;;  %5940 = vst [vmem:[#allocation45_spill] sm:$0xff] %v4419_v63  ;;  %v747_v41 = vadd.f32 %v721_v23, %v674_v13  ;;  %v4430_v55 = vmul.f32 0.10936069, %v4193_v15  ;;  %v1437_v53 = vmul.f32 0.21300554, %v4193_v15 }
 0x112   :  { %5939 = vst [vmem:[#allocation44_spill] sm:$0xff] %v4414_v33  ;;  %5941 = vst [vmem:[#allocation46_spill] sm:$0xff] %v4422_v46  ;;  %v4436_v23 = vmul.f32 0.007598758, %v4177_v60  ;;  %v1509_v24 = vmul.f32 0.26601171, %v4193_v15 }
 0x113   :  { %5942 = vst [vmem:[#allocation47_spill] sm:$0xff] %v4427_v27  ;;  %5943 = vst [vmem:[#allocation48_spill] sm:$0xff] %v4430_v55  ;;  %v820_v56 = vadd.f32 %v794_v22, %v747_v41  ;;  %v4444_v16 = vmul.f32 0.0010283801, %v4177_v60  ;;  %v723_v1 = vrot.slane %v4422_v46, 3  ;;  %v1400_v12 = vrot.slane %v4430_v55, 3 }
 0x114   :  { %5944 = vst [vmem:[#allocation49_spill] sm:$0xff] %v4436_v23  ;;  %v760_v22 = vmul.f32 0.21300554, %v4191_v9  ;;  %v833_v41 = vmul.f32 0.26601171, %v4191_v9  ;;  %v1472_v5 = vrot.slane %v1437_v53, 4 }
 0x115   :  { %5945 = vst [vmem:[#allocation50_spill] sm:$0xff] %v4444_v16  ;;  %v4446_v13 = vadd.f32 %v867_v62, %v820_v56  ;;  %v1273_v2 = vmul.f32 0.0010283801, %v4198_v50  ;;  %v1281_v19 = vmul.f32 0.007598758, %v4198_v50  ;;  %v1544_v62 = vrot.slane %v1509_v24, 5 }
 0x116   :  { %v1321_v57 = vmul.f32 0.036000773, %v4198_v50  ;;  %v4456_v60 = vmul.f32 0.10936069, %v4198_v50  ;;  %v1584_v56 = vrot.slane %v1437_v53, 6  ;;  %v796_v7 = vrot.slane %v760_v22, 4 }
 0x117   :  { %5946 = vst [vmem:[#allocation51_spill] sm:$0xff] %v4446_v13  ;;  %v1436_v28 = vmul.f32 0.21300554, %v4198_v50  ;;  %v1508_v59 = vmul.f32 0.26601171, %v4198_v50  ;;  %v1297_v30 = vrot.slane %v1281_v19, 1 }
 0x118   :  { %5947 = vst [vmem:[#allocation52_spill] sm:$0xff] %v4456_v60  ;;  %v1337_v27 = vrot.slane %v1321_v57, 2  ;;  %v1399_v63 = vrot.slane %v4456_v60, 3  ;;  %v4461_v26 = vpop.f32.mrb[21].mxu1  ;;  %v910_v10 = vrot.slane %v760_v22, 6 }
 0x119   :  { %v1471_v20 = vrot.slane %v1436_v28, 4  ;;  %v1543_v33 = vrot.slane %v1508_v59, 5  ;;  %v1583_v6 = vrot.slane %v1436_v28, 6  ;;  %v1313_v51 = vadd.f32 %v1297_v30, %v1273_v2 }
 0x11a   :  { %v1401_v29 = vsel %vm712_vm1, %v1399_v63, %v1400_v12  ;;  %v603_v53 = vmul.f32 0.007598758, %v4200_v17  ;;  %v643_v24 = vmul.f32 0.036000773, %v4200_v17  ;;  %v4472_v13 = vmul.f32 0.10936069, %v4200_v17 }
 0x11b   :  { %v1473_v50 = vsel %vm785_vm2, %v1471_v20, %v1472_v5  ;;  %v1545_v19 = vsel %vm858_vm3, %v1543_v33, %v1544_v62  ;;  %v4469_v57 = vsel %vm899_vm4, %v1583_v6, %v1584_v56  ;;  %v1353_v22 = vadd.f32 %v1337_v27, %v1313_v51  ;;  %v4478_v56 = vpop.f32.mrb[22].mxu0 }
 0x11c   :  { %5948 = vst [vmem:[#allocation53_spill] sm:$0xff] %v4469_v57  ;;  %5949 = vst [vmem:[#allocation54_spill] sm:$0xff] %v4472_v13  ;;  %v595_v28 = vmul.f32 0.0010283801, %v4200_v17  ;;  %v619_v30 = vrot.slane %v603_v53, 1  ;;  %v869_v63 = vrot.slane %v833_v41, 5 }
 0x11d   :  { %v759_v59 = vmul.f32 0.21300554, %v4200_v17  ;;  %v659_v12 = vrot.slane %v643_v24, 2  ;;  %v722_v2 = vrot.slane %v4472_v13, 3  ;;  %v832_v20 = vmul.f32 0.26601171, %v4200_v17 }
 0x11e   :  { %v1425_v5 = vadd.f32 %v1401_v29, %v1353_v22  ;;  %v635_v33 = vadd.f32 %v619_v30, %v595_v28  ;;  %v4489_v29 = vmul.f32 0.007598758, %v4191_v9  ;;  %v4492_v22 = vmul.f32 0.0010283801, %v4191_v9 }
 0x11f   :  { %v795_v62 = vrot.slane %v759_v59, 4  ;;  %v909_v6 = vrot.slane %v759_v59, 6  ;;  %v724_v27 = vsel %vm712_vm1, %v722_v2, %v723_v1  ;;  %v868_v53 = vrot.slane %v832_v20, 5 }
 0x120   :  { %v1497_v3 = vadd.f32 %v1473_v50, %v1425_v5  ;;  %v675_v41 = vadd.f32 %v659_v12, %v635_v33  ;;  %5951 = vst [vmem:[#allocation56_spill] sm:$0xff] %v4489_v29  ;;  %5952 = vst [vmem:[#allocation57_spill] sm:$0xff] %v4492_v22  ;;  %v4496_v1 = vmul.f32 0.007598758, %v4193_v15  ;;  %v4499_v50 = vmul.f32 0.0010283801, %v4193_v15 }
 0x121   :  { %v797_v24 = vsel %vm785_vm2, %v795_v62, %v796_v7  ;;  %v4485_v32 = vsel %vm899_vm4, %v909_v6, %v910_v10  ;;  %v870_v28 = vsel %vm858_vm3, %v868_v53, %v869_v63  ;;  %v4506_v12 = vmul.f32 0.10936069, %v4202_v14 }
 0x122   :  { %5950 = vst [vmem:[#allocation55_spill] sm:$0xff] %v4485_v32  ;;  %5953 = vst [vmem:[#allocation58_spill] sm:$0xff] %v4496_v1  ;;  %v4501_v7 = vadd.f32 %v1545_v19, %v1497_v3  ;;  %v748_v10 = vadd.f32 %v724_v27, %v675_v41  ;;  %v4509_v2 = vmul.f32 0.21300554, %v4202_v14  ;;  %v4512_v63 = vmul.f32 0.036000773, %v4191_v9 }
 0x123   :  { %5954 = vst [vmem:[#allocation59_spill] sm:$0xff] %v4499_v50  ;;  %5956 = vst [vmem:[#allocation61_spill] sm:$0xff] %v4506_v12  ;;  %v4515_v20 = vmul.f32 0.036000773, %v4193_v15  ;;  %v4518_v3 = vmul.f32 0.10936069, %v4204_v40 }
 0x124   :  { %5955 = vst [vmem:[#allocation60_spill] sm:$0xff] %v4501_v7  ;;  %5957 = vst [vmem:[#allocation62_spill] sm:$0xff] %v4512_v63  ;;  %v821_v5 = vadd.f32 %v797_v24, %v748_v10  ;;  %v1439_v6 = vmul.f32 0.21300554, %v4204_v40  ;;  %v1511_v15 = vmul.f32 0.26601171, %v4204_v40 }
 0x125   :  { %5958 = vst [vmem:[#allocation63_spill] sm:$0xff] %v4515_v20  ;;  %5959 = vst [vmem:[#allocation64_spill] sm:$0xff] %v4518_v3  ;;  %v4529_v41 = vpop.f32.mrb[22].mxu1  ;;  %v4531_v24 = vpop.f32.mrb[23].mxu0  ;;  %v726_v10 = vrot.slane %v4506_v12, 3  ;;  %v799_v33 = vrot.slane %v4509_v2, 4 }
 0x126   :  { %v4526_v53 = vadd.f32 %v870_v28, %v821_v5  ;;  %v835_v19 = vmul.f32 0.26601171, %v4202_v14  ;;  %v1403_v62 = vrot.slane %v4518_v3, 3  ;;  %v1274_v27 = vmul.f32 0.0010283801, %v4213_v43  ;;  %v4547_v55 = vpop.f32.mrb[23].mxu1 }
 0x127   :  { %v1282_v9 = vmul.f32 0.007598758, %v4213_v43  ;;  %v1322_v28 = vmul.f32 0.036000773, %v4213_v43  ;;  %v1475_v5 = vrot.slane %v1439_v6, 4  ;;  %v1587_v59 = vrot.slane %v1439_v6, 6 }
 0x128   :  { %5960 = vst [vmem:[#allocation65_spill] sm:$0xff] %v4526_v53  ;;  %v4541_v51 = vmul.f32 0.10936069, %v4213_v43  ;;  %v1438_v57 = vmul.f32 0.21300554, %v4213_v43  ;;  %v1547_v17 = vrot.slane %v1511_v15, 5 }
 0x129   :  { %v1298_v30 = vrot.slane %v1282_v9, 1  ;;  %v1338_v50 = vrot.slane %v1322_v28, 2  ;;  %v1510_v1 = vmul.f32 0.26601171, %v4213_v43  ;;  %v913_v22 = vrot.slane %v4509_v2, 6 }
 0x12a   :  { %5961 = vst [vmem:[#allocation66_spill] sm:$0xff] %v4541_v51  ;;  %v1402_v20 = vrot.slane %v4541_v51, 3  ;;  %v1474_v29 = vrot.slane %v1438_v57, 4  ;;  %v1586_v63 = vrot.slane %v1438_v57, 6  ;;  %v604_v46 = vmul.f32 0.007598758, %v4215_v4 }
 0x12b   :  { %v1314_v7 = vadd.f32 %v1298_v30, %v1274_v27  ;;  %v1546_v6 = vrot.slane %v1510_v1, 5  ;;  %v644_v16 = vmul.f32 0.036000773, %v4215_v4  ;;  %v4557_v2 = vmul.f32 0.10936069, %v4215_v4 }
 0x12c   :  { %v1404_v15 = vsel %vm712_vm1, %v1402_v20, %v1403_v62  ;;  %v1476_v9 = vsel %vm785_vm2, %v1474_v29, %v1475_v5  ;;  %v4554_v43 = vsel %vm899_vm4, %v1586_v63, %v1587_v59  ;;  %v596_v30 = vmul.f32 0.0010283801, %v4215_v4 }
 0x12d   :  { %5962 = vst [vmem:[#allocation67_spill] sm:$0xff] %v4554_v43  ;;  %5963 = vst [vmem:[#allocation68_spill] sm:$0xff] %v4557_v2  ;;  %v1354_v28 = vadd.f32 %v1338_v50, %v1314_v7  ;;  %v1548_v57 = vsel %vm858_vm3, %v1546_v6, %v1547_v17  ;;  %v620_v1 = vrot.slane %v604_v46, 1  ;;  %v872_v27 = vrot.slane %v835_v19, 5  ;;  %v4566_v6 = vpop.f32.mrb[24].mxu0 }
 0x12e   :  { %v725_v32 = vrot.slane %v4557_v2, 3  ;;  %v761_v53 = vmul.f32 0.21300554, %v4215_v4  ;;  %v834_v20 = vmul.f32 0.26601171, %v4215_v4  ;;  %v660_v62 = vrot.slane %v644_v16, 2 }
 0x12f   :  { %v1426_v59 = vadd.f32 %v1404_v15, %v1354_v28  ;;  %v636_v63 = vadd.f32 %v620_v1, %v596_v30  ;;  %v4570_v19 = vmul.f32 0.007598758, %v4202_v14  ;;  %v4573_v4 = vmul.f32 0.0010283801, %v4202_v14 }
 0x130   :  { %v727_v5 = vsel %vm712_vm1, %v725_v32, %v726_v10  ;;  %v798_v50 = vrot.slane %v761_v53, 4  ;;  %v871_v7 = vrot.slane %v834_v20, 5  ;;  %v912_v17 = vrot.slane %v761_v53, 6 }
 0x131   :  { %5964 = vst [vmem:[#allocation69_spill] sm:$0xff] %v4570_v19  ;;  %v1498_v43 = vadd.f32 %v1476_v9, %v1426_v59  ;;  %v676_v23 = vadd.f32 %v660_v62, %v636_v63  ;;  %5965 = vst [vmem:[#allocation70_spill] sm:$0xff] %v4573_v4  ;;  %v4582_v10 = vmul.f32 0.007598758, %v4204_v40  ;;  %v4587_v9 = vmul.f32 0.036000773, %v4202_v14 }
 0x132   :  { %v800_v15 = vsel %vm785_vm2, %v798_v50, %v799_v33  ;;  %v873_v16 = vsel %vm858_vm3, %v871_v7, %v872_v27  ;;  %v4578_v32 = vsel %vm899_vm4, %v912_v17, %v913_v22  ;;  %v4590_v1 = vmul.f32 0.0010283801, %v4204_v40  ;;  %v4614_v7 = vpop.f32.mrb[25].mxu0 }
 0x133   :  { %5966 = vst [vmem:[#allocation71_spill] sm:$0xff] %v4578_v32  ;;  %5967 = vst [vmem:[#allocation72_spill] sm:$0xff] %v4582_v10  ;;  %v4584_v28 = vadd.f32 %v1548_v57, %v1498_v43  ;;  %v749_v30 = vadd.f32 %v727_v5, %v676_v23  ;;  %v4593_v33 = vmul.f32 0.10936069, %v4224_v49  ;;  %v4597_v20 = vmul.f32 0.21300554, %v4224_v49 }
 0x134   :  { %5969 = vst [vmem:[#allocation74_spill] sm:$0xff] %v4587_v9  ;;  %5970 = vst [vmem:[#allocation75_spill] sm:$0xff] %v4590_v1  ;;  %v4600_v59 = vmul.f32 0.10936069, %v4226_v52  ;;  %v1441_v14 = vmul.f32 0.21300554, %v4226_v52 }
 0x135   :  { %5968 = vst [vmem:[#allocation73_spill] sm:$0xff] %v4584_v28  ;;  %5971 = vst [vmem:[#allocation76_spill] sm:$0xff] %v4593_v33  ;;  %v822_v27 = vadd.f32 %v800_v15, %v749_v30  ;;  %v1513_v43 = vmul.f32 0.26601171, %v4226_v52  ;;  %v4605_v57 = vpop.f32.mrb[24].mxu1  ;;  %v729_v30 = vrot.slane %v4593_v33, 3 }
 0x136   :  { %5972 = vst [vmem:[#allocation77_spill] sm:$0xff] %v4600_v59  ;;  %v4609_v62 = vmul.f32 0.036000773, %v4204_v40  ;;  %v837_v23 = vmul.f32 0.26601171, %v4224_v49  ;;  %v802_v22 = vrot.slane %v4597_v20, 4 }
 0x137   :  { %v4612_v50 = vadd.f32 %v873_v16, %v822_v27  ;;  %v1406_v63 = vrot.slane %v4600_v59, 3  ;;  %v1275_v40 = vmul.f32 0.0010283801, %v4234_v38  ;;  %v1283_v5 = vmul.f32 0.007598758, %v4234_v38  ;;  %v4632_v28 = vpop.f32.mrb[25].mxu1 }
 0x138   :  { %5973 = vst [vmem:[#allocation78_spill] sm:$0xff] %v4609_v62  ;;  %v1478_v16 = vrot.slane %v1441_v14, 4  ;;  %v1550_v27 = vrot.slane %v1513_v43, 5  ;;  %v1323_v53 = vmul.f32 0.036000773, %v4234_v38  ;;  %v1590_v15 = vrot.slane %v1441_v14, 6 }
 0x139   :  { %5974 = vst [vmem:[#allocation79_spill] sm:$0xff] %v4612_v50  ;;  %v4626_v17 = vmul.f32 0.10936069, %v4234_v38  ;;  %v1299_v29 = vrot.slane %v1283_v5, 1  ;;  %v1440_v46 = vmul.f32 0.21300554, %v4234_v38 }
 0x13a   :  { %v1512_v1 = vmul.f32 0.26601171, %v4234_v38  ;;  %v875_v10 = vrot.slane %v837_v23, 5  ;;  %v916_v4 = vrot.slane %v4597_v20, 6  ;;  %v1339_v62 = vrot.slane %v1323_v53, 2 }
 0x13b   :  { %5975 = vst [vmem:[#allocation80_spill] sm:$0xff] %v4626_v17  ;;  %v1405_v19 = vrot.slane %v4626_v17, 3  ;;  %v1315_v9 = vadd.f32 %v1299_v29, %v1275_v40  ;;  %v1477_v43 = vrot.slane %v1440_v46, 4  ;;  %v1589_v3 = vrot.slane %v1440_v46, 6 }
 0x13c   :  { %v1549_v51 = vrot.slane %v1512_v1, 5  ;;  %v605_v5 = vmul.f32 0.007598758, %v4248_v48  ;;  %v645_v12 = vmul.f32 0.036000773, %v4248_v48 }
 0x13d   :  { %v1407_v14 = vsel %vm712_vm1, %v1405_v19, %v1406_v63  ;;  %v4638_v38 = vmul.f32 0.10936069, %v4248_v48  ;;  %v1355_v20 = vadd.f32 %v1339_v62, %v1315_v9  ;;  %v1479_v53 = vsel %vm785_vm2, %v1477_v43, %v1478_v16 }
 0x13e   :  { %v1551_v23 = vsel %vm858_vm3, %v1549_v51, %v1550_v27  ;;  %v4643_v29 = vsel %vm899_vm4, %v1589_v3, %v1590_v15  ;;  %v597_v46 = vmul.f32 0.0010283801, %v4248_v48  ;;  %v621_v1 = vrot.slane %v605_v5, 1 }
 0x13f   :  { %5976 = vst [vmem:[#allocation81_spill] sm:$0xff] %v4638_v38  ;;  %5977 = vst [vmem:[#allocation82_spill] sm:$0xff] %v4643_v29  ;;  %v728_v19 = vrot.slane %v4638_v38, 3  ;;  %v763_v63 = vmul.f32 0.21300554, %v4248_v48  ;;  %v1427_v32 = vadd.f32 %v1407_v14, %v1355_v20  ;;  %v661_v50 = vrot.slane %v645_v12, 2 }
 0x140   :  { %v4649_v40 = vmul.f32 0.007598758, %v4224_v49  ;;  %v836_v9 = vmul.f32 0.26601171, %v4248_v48  ;;  %v637_v62 = vadd.f32 %v621_v1, %v597_v46  ;;  %v4655_v27 = vmul.f32 0.0010283801, %v4224_v49 }
 0x141   :  { %v730_v51 = vsel %vm712_vm1, %v728_v19, %v729_v30  ;;  %v801_v16 = vrot.slane %v763_v63, 4  ;;  %v915_v3 = vrot.slane %v763_v63, 6  ;;  %v1499_v43 = vadd.f32 %v1479_v53, %v1427_v32  ;;  %v4657_v29 = vpop.f32.mrb[26].mxu0 }
 0x142   :  { %5978 = vst [vmem:[#allocation83_spill] sm:$0xff] %v4649_v40  ;;  %5979 = vst [vmem:[#allocation84_spill] sm:$0xff] %v4655_v27  ;;  %v874_v5 = vrot.slane %v836_v9, 5  ;;  %v4660_v60 = vmul.f32 0.007598758, %v4226_v52  ;;  %v677_v12 = vadd.f32 %v661_v50, %v637_v62  ;;  %v5992_v1 = vrot.slane %v4167_v37, 7 }
 0x143   :  { %v803_v48 = vsel %vm785_vm2, %v801_v16, %v802_v22  ;;  %v4664_v14 = vsel %vm899_vm4, %v915_v3, %v916_v4  ;;  %v4668_v20 = vmul.f32 0.0010283801, %v4226_v52  ;;  %v4670_v46 = vadd.f32 %v1551_v23, %v1499_v43 }
 0x144   :  { %5980 = vst [vmem:[#allocation85_spill] sm:$0xff] %v4660_v60  ;;  %5981 = vst [vmem:[#allocation86_spill] sm:$0xff] %v4664_v14  ;;  %v876_v32 = vsel %vm858_vm3, %v874_v5, %v875_v10  ;;  %v4674_v53 = vmul.f32 0.036000773, %v4224_v49  ;;  %v750_v50 = vadd.f32 %v730_v51, %v677_v12  ;;  %v4678_v22 = vmul.f32 0.10936069, %v4254_v18 }
 0x145   :  { %5982 = vst [vmem:[#allocation87_spill] sm:$0xff] %v4668_v20  ;;  %5983 = vst [vmem:[#allocation88_spill] sm:$0xff] %v4670_v46  ;;  %v4682_v19 = vmul.f32 0.036000773, %v4226_v52  ;;  %v4685_v63 = vmul.f32 0.10936069, %v4256_v54  ;;  %v932_v43 = vadd.f32 %v4220_v45, %v4245_v8 }
 0x146   :  { %5984 = vst [vmem:[#allocation89_spill] sm:$0xff] %v4674_v53  ;;  %5985 = vst [vmem:[#allocation90_spill] sm:$0xff] %v4678_v22  ;;  %v5988_v23 = vrot.slane %v4148_v44, 7  ;;  %v5989_v10 = vrot.slane %v4189_v25, 7  ;;  %v823_v51 = vadd.f32 %v803_v48, %v750_v50  ;;  %v1443_v16 = vmul.f32 0.21300554, %v4256_v54 }
 0x147   :  { %5986 = vst [vmem:[#allocation91_spill] sm:$0xff] %v4682_v19  ;;  %5987 = vst [vmem:[#allocation92_spill] sm:$0xff] %v4685_v63  ;;  %v1515_v44 = vmul.f32 0.26601171, %v4256_v54  ;;  %v4701_v5 = vpop.f32.mrb[26].mxu1  ;;  %v732_v12 = vrot.slane %v4678_v22, 3 }
 0x148   :  { %v4692_v49 = vsel %vm940_vm5, %v5989_v10, %v5988_v23  ;;  %v4703_v25 = vadd.f32 %v876_v32, %v823_v51  ;;  %v766_v23 = vmul.f32 0.21300554, %v4254_v18  ;;  %v839_v48 = vmul.f32 0.26601171, %v4254_v18  ;;  %v4708_v50 = vpop.f32.mrb[27].mxu0 }
 0x149   :  { %v1409_v10 = vrot.slane %v4685_v63, 3  ;;  %v1481_v52 = vrot.slane %v1443_v16, 4  ;;  %v1276_v62 = vmul.f32 0.0010283801, %v4271_v39  ;;  %v5991_v4 = vrot.slane %v4151_v61, 7 }
 0x14a   :  { %5990 = vst [vmem:[#allocation93_spill] sm:$0xff] %v4703_v25  ;;  %v1284_v51 = vmul.f32 0.007598758, %v4271_v39  ;;  %v1324_v3 = vmul.f32 0.036000773, %v4271_v39  ;;  %v1553_v30 = vrot.slane %v1515_v44, 5 }
 0x14b   :  { %v4717_v32 = vsel %vm940_vm5, %v5992_v1, %v5991_v4  ;;  %v4722_v9 = vmul.f32 0.10936069, %v4271_v39  ;;  %v1593_v15 = vrot.slane %v1443_v16, 6  ;;  %v1442_v20 = vmul.f32 0.21300554, %v4271_v39  ;;  %v4732_v16 = vpop.f32.mrb[27].mxu1 }
 0x14c   :  { %v1514_v61 = vmul.f32 0.26601171, %v4271_v39  ;;  %v805_v37 = vrot.slane %v766_v23, 4  ;;  %v1300_v60 = vrot.slane %v1284_v51, 1  ;;  %v1340_v1 = vrot.slane %v1324_v3, 2 }
 0x14d   :  { %5993 = vst [vmem:[#allocation94_spill] sm:$0xff] %v4722_v9  ;;  %v1408_v4 = vrot.slane %v4722_v9, 3  ;;  %v919_v27 = vrot.slane %v766_v23, 6  ;;  %v1480_v19 = vrot.slane %v1442_v20, 4  ;;  %v1592_v53 = vrot.slane %v1442_v20, 6 }
 0x14e   :  { %v1552_v40 = vrot.slane %v1514_v61, 5  ;;  %v1316_v17 = vadd.f32 %v1300_v60, %v1276_v62  ;;  %v606_v45 = vmul.f32 0.007598758, %v4273_v58  ;;  %v646_v8 = vmul.f32 0.036000773, %v4273_v58 }
 0x14f   :  { %v1410_v59 = vsel %vm712_vm1, %v1408_v4, %v1409_v10  ;;  %v1482_v39 = vsel %vm785_vm2, %v1480_v19, %v1481_v52  ;;  %v4737_v3 = vsel %vm899_vm4, %v1592_v53, %v1593_v15  ;;  %v4740_v23 = vmul.f32 0.10936069, %v4273_v58 }
 0x150   :  { %v1554_v44 = vsel %vm858_vm3, %v1552_v40, %v1553_v30  ;;  %5994 = vst [vmem:[#allocation95_spill] sm:$0xff] %v4737_v3  ;;  %v1356_v20 = vadd.f32 %v1340_v1, %v1316_v17  ;;  %v598_v60 = vmul.f32 0.0010283801, %v4273_v58  ;;  %v622_v62 = vrot.slane %v606_v45, 1 }
 0x151   :  { %5995 = vst [vmem:[#allocation96_spill] sm:$0xff] %v4740_v23  ;;  %v765_v10 = vmul.f32 0.21300554, %v4273_v58  ;;  %v878_v51 = vrot.slane %v839_v48, 5  ;;  %v662_v61 = vrot.slane %v646_v8, 2  ;;  %v731_v4 = vrot.slane %v4740_v23, 3 }
 0x152   :  { %v838_v19 = vmul.f32 0.26601171, %v4273_v58  ;;  %v1428_v52 = vadd.f32 %v1410_v59, %v1356_v20  ;;  %v638_v40 = vadd.f32 %v622_v62, %v598_v60  ;;  %v4748_v3 = vmul.f32 0.007598758, %v4254_v18  ;;  %v4755_v58 = vpop.f32.mrb[28].mxu0 }
 0x153   :  { %v804_v30 = vrot.slane %v765_v10, 4  ;;  %v918_v15 = vrot.slane %v765_v10, 6  ;;  %v733_v17 = vsel %vm712_vm1, %v731_v4, %v732_v12  ;;  %v4758_v59 = vmul.f32 0.036000773, %v4254_v18 }
 0x154   :  { %5996 = vst [vmem:[#allocation97_spill] sm:$0xff] %v4748_v3  ;;  %v877_v1 = vrot.slane %v838_v19, 5  ;;  %v1500_v45 = vadd.f32 %v1482_v39, %v1428_v52  ;;  %v678_v46 = vadd.f32 %v662_v61, %v638_v40  ;;  %v4761_v20 = vmul.f32 0.0010283801, %v4254_v18 }
 0x155   :  { %v806_v48 = vsel %vm785_vm2, %v804_v30, %v805_v37  ;;  %v4753_v8 = vsel %vm899_vm4, %v918_v15, %v919_v27  ;;  %5998 = vst [vmem:[#allocation99_spill] sm:$0xff] %v4758_v59  ;;  %v4764_v60 = vmul.f32 0.007598758, %v4256_v54  ;;  %v4768_v39 = vmul.f32 0.0010283801, %v4256_v54 }
 0x156   :  { %5997 = vst [vmem:[#allocation98_spill] sm:$0xff] %v4753_v8  ;;  %5999 = vst [vmem:[#allocation100_spill] sm:$0xff] %v4761_v20  ;;  %v879_v12 = vsel %vm858_vm3, %v877_v1, %v878_v51  ;;  %v4770_v37 = vadd.f32 %v1554_v44, %v1500_v45  ;;  %v751_v27 = vadd.f32 %v733_v17, %v678_v46  ;;  %v4773_v62 = vmul.f32 0.10936069, %v4277_v0  ;;  %v4797_v1 = vpop.f32.mrb[28].mxu1  ;;  %v4800_v51 = vpop.f32.mrb[29].mxu0 }
 0x157   :  { %6000 = vst [vmem:[#allocation101_spill] sm:$0xff] %v4764_v60  ;;  %6001 = vst [vmem:[#allocation102_spill] sm:$0xff] %v4768_v39  ;;  %v4776_v10 = vmul.f32 0.036000773, %v4256_v54  ;;  %v768_v18 = vmul.f32 0.21300554, %v4277_v0  ;;  %v973_v4 = vadd.f32 %v4692_v49, %v932_v43 }
 0x158   :  { %6002 = vst [vmem:[#allocation103_spill] sm:$0xff] %v4770_v37  ;;  %6003 = vst [vmem:[#allocation104_spill] sm:$0xff] %v4773_v62  ;;  %v841_v61 = vmul.f32 0.26601171, %v4277_v0  ;;  %v824_v19 = vadd.f32 %v806_v48, %v751_v27  ;;  %v4783_v52 = vmul.f32 0.10936069, %v4287_v34 }
 0x159   :  { %6004 = vst [vmem:[#allocation105_spill] sm:$0xff] %v4776_v10  ;;  %v4786_v46 = vmul.f32 0.21300554, %v4287_v34  ;;  %v1517_v30 = vmul.f32 0.26601171, %v4287_v34  ;;  %v735_v17 = vrot.slane %v4773_v62, 3 }
 0x15a   :  { %6005 = vst [vmem:[#allocation106_spill] sm:$0xff] %v4783_v52  ;;  %v4794_v43 = vadd.f32 %v879_v12, %v824_v19  ;;  %v808_v45 = vrot.slane %v768_v18, 4  ;;  %v881_v48 = vrot.slane %v841_v61, 5  ;;  %v922_v27 = vrot.slane %v768_v18, 6  ;;  %v6007_v54 = vld [vmem:[#allocation17_spill] sm:$0xff]  ;;  %v6008_v49 = vld [vmem:[#allocation11_spill] sm:$0xff] }
 0x15b   :  { %v1412_v44 = vrot.slane %v4783_v52, 3  ;;  %v1484_v40 = vrot.slane %v4786_v46, 4  ;;  %v607_v53 = vmul.f32 0.007598758, %v6007_v54  ;;  %v647_v15 = vmul.f32 0.036000773, %v6007_v54 }
 0x15c   :  { %6006 = vst [vmem:[#allocation107_spill] sm:$0xff] %v4794_v43  ;;  %v989_v12 = vadd.f32 %v6008_v49, %v973_v4  ;;  %v1556_v19 = vrot.slane %v1517_v30, 5  ;;  %v4807_v39 = vmul.f32 0.10936069, %v6007_v54  ;;  %v767_v60 = vmul.f32 0.21300554, %v6007_v54 }
 0x15d   :  { %v6010_v61 = vld [vmem:[#allocation9_spill] sm:$0xff]  ;;  %v6011_v18 = vld [vmem:[#allocation6_spill] sm:$0xff]  ;;  %v599_v3 = vmul.f32 0.0010283801, %v6007_v54  ;;  %v623_v10 = vrot.slane %v607_v53, 1  ;;  %v663_v59 = vrot.slane %v647_v15, 2 }
 0x15e   :  { %6009 = vst [vmem:[#allocation17_spill] sm:$0xff] %v4807_v39  ;;  %v4812_v20 = vadd.f32 %v6011_v18, %v6010_v61  ;;  %v840_v9 = vmul.f32 0.26601171, %v6007_v54  ;;  %v734_v63 = vrot.slane %v4807_v39, 3  ;;  %v807_v37 = vrot.slane %v767_v60, 4  ;;  %v6012_v30 = vld [vmem:[#allocation18_spill] sm:$0xff] }
 0x15f   :  { %v921_v4 = vrot.slane %v767_v60, 6  ;;  %v1277_v49 = vmul.f32 0.0010283801, %v6012_v30  ;;  %v639_v22 = vadd.f32 %v623_v10, %v599_v3  ;;  %v1285_v43 = vmul.f32 0.007598758, %v6012_v30  ;;  %v4828_v15 = vpop.f32.mrb[29].mxu1 }
 0x160   :  { %v880_v8 = vrot.slane %v840_v9, 5  ;;  %v1325_v38 = vmul.f32 0.036000773, %v6012_v30  ;;  %v736_v61 = vsel %vm712_vm1, %v734_v63, %v735_v17  ;;  %v809_v18 = vsel %vm785_vm2, %v807_v37, %v808_v45  ;;  %6015 = vst [vmem:[#allocation6_spill] sm:$0xff] %v4828_v15 }
 0x161   :  { %v4823_v53 = vsel %vm899_vm4, %v921_v4, %v922_v27  ;;  %v4826_v54 = vmul.f32 0.10936069, %v6012_v30  ;;  %v679_v60 = vadd.f32 %v663_v59, %v639_v22  ;;  %v1301_v9 = vrot.slane %v1285_v43, 1 }
 0x162   :  { %6013 = vst [vmem:[#allocation11_spill] sm:$0xff] %v4823_v53  ;;  %v882_v3 = vsel %vm858_vm3, %v880_v8, %v881_v48  ;;  %v1341_v10 = vrot.slane %v1325_v38, 2  ;;  %v1596_v33 = vrot.slane %v4786_v46, 6  ;;  %v1444_v63 = vmul.f32 0.21300554, %v6012_v30  ;;  %v4887_v48 = vpop.f32.mrb[30].mxu1 }
 0x163   :  { %6014 = vst [vmem:[#allocation9_spill] sm:$0xff] %v4826_v54  ;;  %v1411_v14 = vrot.slane %v4826_v54, 3  ;;  %v1516_v37 = vmul.f32 0.26601171, %v6012_v30  ;;  %v4836_v17 = vmul.f32 0.007598758, %v4277_v0  ;;  %v752_v27 = vadd.f32 %v736_v61, %v679_v60 }
 0x164   :  { %v4839_v45 = vmul.f32 0.0010283801, %v4277_v0  ;;  %v1317_v22 = vadd.f32 %v1301_v9, %v1277_v49  ;;  %v1483_v59 = vrot.slane %v1444_v63, 4  ;;  %v1595_v43 = vrot.slane %v1444_v63, 6  ;;  %v6022_v60 = vld [vmem:[#allocation19_spill] sm:$0xff]  ;;  %6031 = vst [vmem:[#allocation114_spill] sm:$0xff] %v4887_v48 }
 0x165   :  { %6016 = vst [vmem:[#allocation18_spill] sm:$0xff] %v4836_v17  ;;  %v1413_v8 = vsel %vm712_vm1, %v1411_v14, %v1412_v44  ;;  %v1555_v38 = vrot.slane %v1516_v37, 5  ;;  %v825_v4 = vadd.f32 %v809_v18, %v752_v27  ;;  %v4845_v30 = vmul.f32 0.036000773, %v4277_v0  ;;  %v4852_v14 = vpop.f32.mrb[30].mxu0  ;;  %v6023_v63 = vld [vmem:[#allocation7_spill] sm:$0xff] }
 0x166   :  { %6017 = vst [vmem:[#allocation108_spill] sm:$0xff] %v4839_v45  ;;  %v1357_v53 = vadd.f32 %v1341_v10, %v1317_v22  ;;  %v1485_v25 = vsel %vm785_vm2, %v1483_v59, %v1484_v40  ;;  %v4850_v49 = vsel %vm899_vm4, %v1595_v43, %v1596_v33  ;;  %6020 = vst [vmem:[#allocation111_spill] sm:$0xff] %v4852_v14  ;;  %v2032_v9 = vmul.f32 0.10936069, %v6022_v60 }
 0x167   :  { %6018 = vst [vmem:[#allocation109_spill] sm:$0xff] %v4845_v30  ;;  %v1557_v2 = vsel %vm858_vm3, %v1555_v38, %v1556_v19  ;;  %6019 = vst [vmem:[#allocation110_spill] sm:$0xff] %v4850_v49  ;;  %v4854_v44 = vadd.f32 %v882_v3, %v825_v4  ;;  %v2104_v18 = vmul.f32 0.21300554, %v6022_v60  ;;  %v2176_v40 = vmul.f32 0.26601171, %v6022_v60 }
 0x168   :  { %v1429_v61 = vadd.f32 %v1413_v8, %v1357_v53  ;;  %v6024_v19 = vrot.slane %v6023_v63, 1  ;;  %v4864_v33 = vmul.f32 0.036000773, %v4287_v34  ;;  %v4867_v3 = vmul.f32 0.10936069, %v4304_v47  ;;  %v6028_v38 = vld [vmem:[#allocation8_spill] sm:$0xff] }
 0x169   :  { %6021 = vst [vmem:[#allocation112_spill] sm:$0xff] %v4854_v44  ;;  %v4870_v53 = vmul.f32 0.21300554, %v4304_v47  ;;  %v4874_v8 = vmul.f32 0.007598758, %v4287_v34  ;;  %v2248_v63 = vrot.slane %v2104_v18, 6 }
 0x16a   :  { %v1029_v37 = vadd.f32 %v6024_v19, %v989_v12  ;;  %6025 = vst [vmem:[#allocation19_spill] sm:$0xff] %v4864_v33  ;;  %v1501_v27 = vadd.f32 %v1485_v25, %v1429_v61  ;;  %v4877_v59 = vmul.f32 0.0010283801, %v4287_v34  ;;  %v6029_v12 = vrot.slane %v6028_v38, 2  ;;  %v6033_v33 = vld [vmem:[#allocation22_spill] sm:$0xff] }
 0x16b   :  { %6026 = vst [vmem:[#allocation7_spill] sm:$0xff] %v4874_v8  ;;  %v2064_v25 = vrot.slane %v2032_v9, 3  ;;  %v2136_v61 = vrot.slane %v2104_v18, 4  ;;  %v2208_v19 = vrot.slane %v2176_v40, 5  ;;  %v2288_v0 = vrot.slane %v2032_v9, 7  ;;  %v4897_v40 = vpop.f32.mrb[31].mxu0 }
 0x16c   :  { %6027 = vst [vmem:[#allocation113_spill] sm:$0xff] %v4877_v59  ;;  %v4881_v43 = vadd.f32 %v6029_v12, %v1029_v37  ;;  %v4883_v4 = vadd.f32 %v1557_v2, %v1501_v27  ;;  %v2737_v10 = vrot.slane %v4867_v3, 3  ;;  %v2849_v22 = vmul.f32 0.26601171, %v4304_v47  ;;  %6032 = vst [vmem:[#allocation115_spill] sm:$0xff] %v4897_v40 }
 0x16d   :  { %v2809_v34 = vrot.slane %v4870_v53, 4  ;;  %v1943_v46 = vmul.f32 0.0010283801, %v4306_v11  ;;  %v1951_v37 = vmul.f32 0.007598758, %v4306_v11  ;;  %v1646_v2 = vadd.f32 %v4717_v32, %v4812_v20  ;;  %v6034_v32 = vld [vmem:[#allocation21_spill] sm:$0xff] }
 0x16e   :  { %6030 = vst [vmem:[#allocation8_spill] sm:$0xff] %v4883_v4  ;;  %v2921_v27 = vrot.slane %v4870_v53, 6  ;;  %v1991_v18 = vmul.f32 0.036000773, %v4306_v11  ;;  %v2031_v9 = vmul.f32 0.10936069, %v4306_v11 }
 0x16f   :  { %v1967_v38 = vrot.slane %v1951_v37, 1  ;;  %v2103_v12 = vmul.f32 0.21300554, %v4306_v11  ;;  %v2175_v59 = vmul.f32 0.26601171, %v4306_v11  ;;  %v4902_v45 = vadd.f32 %v6033_v33, %v1646_v2 }
 0x170   :  { %v2007_v8 = vrot.slane %v1991_v18, 2  ;;  %v2063_v17 = vrot.slane %v2031_v9, 3  ;;  %v2287_v52 = vrot.slane %v2031_v9, 7  ;;  %v2616_v20 = vmul.f32 0.0010283801, %v6034_v32  ;;  %v4912_v9 = vpop.f32.mrb[31].mxu1 }
 0x171   :  { %v1983_v53 = vadd.f32 %v1967_v38, %v1943_v46  ;;  %v2135_v30 = vrot.slane %v2103_v12, 4  ;;  %v2207_v49 = vrot.slane %v2175_v59, 5  ;;  %v2247_v4 = vrot.slane %v2103_v12, 6  ;;  %6035 = vst [vmem:[#allocation22_spill] sm:$0xff] %v4912_v9 }
 0x172   :  { %v2065_v62 = vsel %vm712_vm1, %v2063_v17, %v2064_v25  ;;  %v2289_v37 = vsel %vm940_vm5, %v2287_v52, %v2288_v0  ;;  %v2624_v44 = vmul.f32 0.007598758, %v6034_v32  ;;  %v2664_v11 = vmul.f32 0.036000773, %v6034_v32 }
 0x173   :  { %v2023_v23 = vadd.f32 %v2007_v8, %v1983_v53  ;;  %v2137_v33 = vsel %vm785_vm2, %v2135_v30, %v2136_v61  ;;  %v2209_v2 = vsel %vm858_vm3, %v2207_v49, %v2208_v19  ;;  %v2249_v18 = vsel %vm899_vm4, %v2247_v4, %v2248_v63 }
 0x174   :  { %v2640_v46 = vrot.slane %v2624_v44, 1  ;;  %v2680_v59 = vrot.slane %v2664_v11, 2  ;;  %v4915_v38 = vmul.f32 0.10936069, %v6034_v32  ;;  %v2776_v52 = vmul.f32 0.21300554, %v6034_v32 }
 0x175   :  { %v2343_v17 = vmul.f32 0.007598758, %v6022_v60  ;;  %v2881_v0 = vrot.slane %v2849_v22, 5  ;;  %v2095_v25 = vadd.f32 %v2065_v62, %v2023_v23  ;;  %v2848_v8 = vmul.f32 0.26601171, %v6034_v32 }
 0x176   :  { %v2656_v30 = vadd.f32 %v2640_v46, %v2616_v20  ;;  %v2736_v49 = vrot.slane %v4915_v38, 3  ;;  %v2808_v61 = vrot.slane %v2776_v52, 4  ;;  %v2920_v4 = vrot.slane %v2776_v52, 6  ;;  %v6036_v46 = vld [vmem:[#allocation23_spill] sm:$0xff] }
 0x177   :  { %v4923_v44 = vmul.f32 0.0010283801, %v6022_v60  ;;  %v2167_v19 = vadd.f32 %v2137_v33, %v2095_v25  ;;  %v2880_v12 = vrot.slane %v2848_v8, 5  ;;  %v2034_v52 = vmul.f32 0.10936069, %v6036_v46 }
 0x178   :  { %v2696_v53 = vadd.f32 %v2680_v59, %v2656_v30  ;;  %v2738_v11 = vsel %vm712_vm1, %v2736_v49, %v2737_v10  ;;  %v2810_v22 = vsel %vm785_vm2, %v2808_v61, %v2809_v34  ;;  %v4928_v23 = vsel %vm899_vm4, %v2920_v4, %v2921_v27  ;;  %v6039_v10 = vld [vmem:[#allocation32_spill] sm:$0xff] }
 0x179   :  { %v2239_v32 = vadd.f32 %v2209_v2, %v2167_v19  ;;  %v2882_v20 = vsel %vm858_vm3, %v2880_v12, %v2881_v0  ;;  %v2327_v63 = vmul.f32 0.036000773, %v6022_v60  ;;  %v2359_v39 = vrot.slane %v2343_v17, 1  ;;  %v6037_v0 = vld [vmem:[#allocation29_spill] sm:$0xff] }
 0x17a   :  { %v2768_v33 = vadd.f32 %v2738_v11, %v2696_v53  ;;  %v2106_v59 = vmul.f32 0.21300554, %v6036_v46  ;;  %v4937_v34 = vmul.f32 0.036000773, %v4304_v47  ;;  %v2178_v25 = vmul.f32 0.26601171, %v6036_v46 }
 0x17b   :  { %v2279_v27 = vadd.f32 %v2249_v18, %v2239_v32  ;;  %v4942_v30 = vmul.f32 0.10936069, %v6037_v0  ;;  %v2779_v60 = vmul.f32 0.21300554, %v6037_v0  ;;  %v4946_v17 = vmul.f32 0.007598758, %v4304_v47 }
 0x17c   :  { %v2840_v8 = vadd.f32 %v2810_v22, %v2768_v33  ;;  %v4949_v49 = vmul.f32 0.0010283801, %v4304_v47  ;;  %v2067_v4 = vrot.slane %v2034_v52, 3  ;;  %v2139_v18 = vrot.slane %v2106_v59, 4  ;;  %v6040_v47 = vld [vmem:[#allocation13_spill] sm:$0xff] }
 0x17d   :  { %6038 = vst [vmem:[#allocation21_spill] sm:$0xff] %v4942_v30  ;;  %v2319_v61 = vadd.f32 %v2289_v37, %v2279_v27  ;;  %v2251_v12 = vrot.slane %v2106_v59, 6  ;;  %v2291_v53 = vrot.slane %v2034_v52, 7  ;;  %v2211_v22 = vrot.slane %v2178_v25, 5 }
 0x17e   :  { %v4951_v19 = vadd.f32 %v2882_v20, %v2840_v8  ;;  %v2740_v32 = vrot.slane %v4942_v30, 3  ;;  %v2851_v33 = vmul.f32 0.26601171, %v6037_v0  ;;  %v2812_v62 = vrot.slane %v2779_v60, 4 }
 0x17f   :  { %v2335_v11 = vadd.f32 %v2327_v63, %v2319_v61  ;;  %v2924_v2 = vrot.slane %v2779_v60, 6  ;;  %v1952_v54 = vmul.f32 0.007598758, %v6039_v10  ;;  %v6041_v13 = vrot.slane %v6040_v47, 1  ;;  %v6042_v60 = vld [vmem:[#allocation20_spill] sm:$0xff] }
 0x180   :  { %v1944_v20 = vmul.f32 0.0010283801, %v6039_v10  ;;  %v1992_v27 = vmul.f32 0.036000773, %v6039_v10  ;;  %v2033_v52 = vmul.f32 0.10936069, %v6039_v10 }
 0x181   :  { %v1702_v37 = vadd.f32 %v6041_v13, %v4902_v45  ;;  %v4962_v63 = vadd.f32 %v2359_v39, %v2335_v11  ;;  %v1968_v59 = vrot.slane %v1952_v54, 1  ;;  %v2105_v25 = vmul.f32 0.21300554, %v6039_v10  ;;  %v6044_v45 = vld [vmem:[#allocation38_spill] sm:$0xff] }
 0x182   :  { %v2177_v8 = vmul.f32 0.26601171, %v6039_v10  ;;  %v6043_v61 = vrot.slane %v6042_v60, 2  ;;  %v2008_v21 = vrot.slane %v1992_v27, 2  ;;  %v2066_v47 = vrot.slane %v2033_v52, 3 }
 0x183   :  { %v2290_v13 = vrot.slane %v2033_v52, 7  ;;  %v2617_v9 = vmul.f32 0.0010283801, %v6044_v45  ;;  %v1984_v40 = vadd.f32 %v1968_v59, %v1944_v20  ;;  %v2138_v48 = vrot.slane %v2105_v25, 4 }
 0x184   :  { %v4968_v31 = vadd.f32 %v6043_v61, %v1702_v37  ;;  %v2210_v14 = vrot.slane %v2177_v8, 5  ;;  %v2250_v15 = vrot.slane %v2105_v25, 6  ;;  %v2068_v39 = vsel %vm712_vm1, %v2066_v47, %v2067_v4 }
 0x185   :  { %v2292_v54 = vsel %vm940_vm5, %v2290_v13, %v2291_v53  ;;  %v2625_v11 = vmul.f32 0.007598758, %v6044_v45  ;;  %v2665_v10 = vmul.f32 0.036000773, %v6044_v45  ;;  %v2024_v60 = vadd.f32 %v2008_v21, %v1984_v40 }
 0x186   :  { %v2140_v37 = vsel %vm785_vm2, %v2138_v48, %v2139_v18  ;;  %v2212_v27 = vsel %vm858_vm3, %v2210_v14, %v2211_v22  ;;  %v2252_v52 = vsel %vm899_vm4, %v2250_v15, %v2251_v12  ;;  %v4979_v59 = vmul.f32 0.10936069, %v6044_v45 }
 0x187   :  { %v2641_v61 = vrot.slane %v2625_v11, 1  ;;  %v2681_v20 = vrot.slane %v2665_v10, 2  ;;  %v2778_v4 = vmul.f32 0.21300554, %v6044_v45  ;;  %v4983_v53 = vmul.f32 0.007598758, %v6036_v46 }
 0x188   :  { %v2884_v25 = vrot.slane %v2851_v33, 5  ;;  %v2096_v8 = vadd.f32 %v2068_v39, %v2024_v60  ;;  %v2850_v21 = vmul.f32 0.26601171, %v6044_v45  ;;  %v2739_v48 = vrot.slane %v4979_v59, 3 }
 0x189   :  { %v2657_v40 = vadd.f32 %v2641_v61, %v2617_v9  ;;  %v2811_v14 = vrot.slane %v2778_v4, 4  ;;  %v2923_v18 = vrot.slane %v2778_v4, 6  ;;  %v4989_v12 = vmul.f32 0.0010283801, %v6036_v46  ;;  %v115_v61 = vpop.xlane.xlu0 %114 }
 0x18a   :  { %v2168_v22 = vadd.f32 %v2140_v37, %v2096_v8  ;;  %v2883_v47 = vrot.slane %v2850_v21, 5  ;;  %v2741_v11 = vsel %vm712_vm1, %v2739_v48, %v2740_v32  ;;  %v2036_v60 = vmul.f32 0.10936069, %v4398_v35 }
 0x18b   :  { %6045 = vst [vmem:[#allocation23_spill] sm:$0xff] %v4989_v12  ;;  %v2697_v13 = vadd.f32 %v2681_v20, %v2657_v40  ;;  %v2813_v33 = vsel %vm785_vm2, %v2811_v14, %v2812_v62  ;;  %v4994_v39 = vsel %vm899_vm4, %v2923_v18, %v2924_v2  ;;  %v2328_v4 = vmul.f32 0.036000773, %v6036_v46 }
 0x18c   :  { %v2240_v45 = vadd.f32 %v2212_v27, %v2168_v22  ;;  %v2885_v10 = vsel %vm858_vm3, %v2883_v47, %v2884_v25  ;;  %v2108_v32 = vmul.f32 0.21300554, %v4398_v35  ;;  %v5004_v2 = vmul.f32 0.036000773, %v6037_v0 }
 0x18d   :  { %v2769_v20 = vadd.f32 %v2741_v11, %v2697_v13  ;;  %v2180_v27 = vmul.f32 0.26601171, %v4398_v35  ;;  %v5009_v40 = vmul.f32 0.10936069, %v4439_v42  ;;  %v5012_v46 = vmul.f32 0.21300554, %v4439_v42  ;;  %v118_v62 = vpop.xlane.xlu0 %117 }
 0x18e   :  { %6046 = vst [vmem:[#allocation29_spill] sm:$0xff] %v5004_v2  ;;  %v2280_v8 = vadd.f32 %v2252_v52, %v2240_v45  ;;  %v5015_v48 = vmul.f32 0.007598758, %v6037_v0  ;;  %v5018_v14 = vmul.f32 0.0010283801, %v6037_v0  ;;  %v2070_v22 = vrot.slane %v2036_v60, 3 }
 0x18f   :  { %v2841_v21 = vadd.f32 %v2813_v33, %v2769_v20  ;;  %v2142_v47 = vrot.slane %v2108_v32, 4  ;;  %v2254_v13 = vrot.slane %v2108_v32, 6  ;;  %v2294_v11 = vrot.slane %v2036_v60, 7 }
 0x190   :  { %6047 = vst [vmem:[#allocation32_spill] sm:$0xff] %v5018_v14  ;;  %v2320_v18 = vadd.f32 %v2292_v54, %v2280_v8  ;;  %v2214_v45 = vrot.slane %v2180_v27, 5  ;;  %v2743_v20 = vrot.slane %v5009_v40, 3  ;;  %v2853_v25 = vmul.f32 0.26601171, %v4439_v42 }
 0x191   :  { %v5020_v52 = vadd.f32 %v2885_v10, %v2841_v21  ;;  %v2815_v37 = vrot.slane %v5012_v46, 4  ;;  %v2927_v0 = vrot.slane %v5012_v46, 6  ;;  %v1953_v54 = vmul.f32 0.007598758, %v4441_v36 }
 0x192   :  { %v5022_v33 = vadd.f32 %v2328_v4, %v2320_v18  ;;  %v5029_v8 = vadd.f32 %v118_v62, %v115_v61  ;;  %v1945_v10 = vmul.f32 0.0010283801, %v4441_v36  ;;  %v1993_v60 = vmul.f32 0.036000773, %v4441_v36 }
 0x193   :  { %v2035_v4 = vmul.f32 0.10936069, %v4441_v36  ;;  %v6049_v32 = vrot.slane %v4923_v44, 2  ;;  %v1969_v21 = vrot.slane %v1953_v54, 1  ;;  %v2107_v18 = vmul.f32 0.21300554, %v4441_v36 }
 0x194   :  { %6048 = vst [vmem:[#allocation13_spill] sm:$0xff] %v5029_v8  ;;  %v2179_v46 = vmul.f32 0.26601171, %v4441_v36  ;;  %v5043_v61 = vadd.f32 %v4928_v23, %v4951_v19  ;;  %v2009_v62 = vrot.slane %v1993_v60, 2  ;;  %v2618_v8 = vmul.f32 0.0010283801, %v4461_v26 }
 0x195   :  { %v5037_v27 = vadd.f32 %v6049_v32, %v4962_v63  ;;  %v2069_v15 = vrot.slane %v2035_v4, 3  ;;  %v2293_v9 = vrot.slane %v2035_v4, 7  ;;  %v1985_v2 = vadd.f32 %v1969_v21, %v1945_v10 }
 0x196   :  { %v2141_v14 = vrot.slane %v2107_v18, 4  ;;  %v2213_v30 = vrot.slane %v2179_v46, 5  ;;  %v2253_v44 = vrot.slane %v2107_v18, 6  ;;  %v2626_v32 = vmul.f32 0.007598758, %v4461_v26 }
 0x197   :  { %v2071_v63 = vsel %vm712_vm1, %v2069_v15, %v2070_v22  ;;  %v2295_v54 = vsel %vm940_vm5, %v2293_v9, %v2294_v11  ;;  %v2666_v36 = vmul.f32 0.036000773, %v4461_v26  ;;  %v2025_v12 = vadd.f32 %v2009_v62, %v1985_v2 }
 0x198   :  { %v2143_v23 = vsel %vm785_vm2, %v2141_v14, %v2142_v47  ;;  %v2215_v19 = vsel %vm858_vm3, %v2213_v30, %v2214_v45  ;;  %v2255_v60 = vsel %vm899_vm4, %v2253_v44, %v2254_v13  ;;  %v2642_v4 = vrot.slane %v2626_v32, 1 }
 0x199   :  { %v2682_v10 = vrot.slane %v2666_v36, 2  ;;  %v5054_v21 = vmul.f32 0.10936069, %v4461_v26  ;;  %v2780_v15 = vmul.f32 0.21300554, %v4461_v26  ;;  %v2887_v22 = vrot.slane %v2853_v25, 5 }
 0x19a   :  { %v2097_v11 = vadd.f32 %v2071_v63, %v2025_v12  ;;  %v2852_v18 = vmul.f32 0.26601171, %v4461_v26  ;;  %v2658_v2 = vadd.f32 %v2642_v4, %v2618_v8  ;;  %v5061_v13 = vmul.f32 0.007598758, %v4398_v35 }
 0x19b   :  { %v2742_v14 = vrot.slane %v5054_v21, 3  ;;  %v2814_v47 = vrot.slane %v2780_v15, 4  ;;  %v2926_v30 = vrot.slane %v2780_v15, 6  ;;  %v5064_v45 = vmul.f32 0.0010283801, %v4398_v35 }
 0x19c   :  { %v2169_v46 = vadd.f32 %v2143_v23, %v2097_v11  ;;  %v2886_v62 = vrot.slane %v2852_v18, 5  ;;  %v2698_v44 = vadd.f32 %v2682_v10, %v2658_v2  ;;  %v5073_v8 = vmul.f32 0.007598758, %v4439_v42 }
 0x19d   :  { %6050 = vst [vmem:[#allocation20_spill] sm:$0xff] %v5064_v45  ;;  %v2744_v32 = vsel %vm712_vm1, %v2742_v14, %v2743_v20  ;;  %v2816_v12 = vsel %vm785_vm2, %v2814_v47, %v2815_v37  ;;  %v5069_v26 = vsel %vm899_vm4, %v2926_v30, %v2927_v0  ;;  %v2329_v4 = vmul.f32 0.036000773, %v4398_v35 }
 0x19e   :  { %6051 = vst [vmem:[#allocation38_spill] sm:$0xff] %v5073_v8  ;;  %v2241_v63 = vadd.f32 %v2215_v19, %v2169_v46  ;;  %v2888_v36 = vsel %vm858_vm3, %v2886_v62, %v2887_v22  ;;  %v2770_v23 = vadd.f32 %v2744_v32, %v2698_v44  ;;  %v2038_v10 = vmul.f32 0.10936069, %v4478_v56 }
 0x19f   :  { %v2110_v20 = vmul.f32 0.21300554, %v4478_v56  ;;  %v2182_v11 = vmul.f32 0.26601171, %v4478_v56  ;;  %v5083_v18 = vmul.f32 0.036000773, %v4439_v42 }
 0x1a0   :  { %v2281_v15 = vadd.f32 %v2255_v60, %v2241_v63  ;;  %v2842_v19 = vadd.f32 %v2816_v12, %v2770_v23  ;;  %v5086_v22 = vmul.f32 0.10936069, %v4529_v41  ;;  %v2783_v35 = vmul.f32 0.21300554, %v4529_v41 }
 0x1a1   :  { %6052 = vst [vmem:[#allocation116_spill] sm:$0xff] %v5083_v18  ;;  %v5092_v47 = vmul.f32 0.0010283801, %v4439_v42  ;;  %v2073_v46 = vrot.slane %v2038_v10, 3  ;;  %v2145_v62 = vrot.slane %v2110_v20, 4  ;;  %v2257_v44 = vrot.slane %v2110_v20, 6 }
 0x1a2   :  { %6053 = vst [vmem:[#allocation117_spill] sm:$0xff] %v5086_v22  ;;  %v2321_v30 = vadd.f32 %v2295_v54, %v2281_v15  ;;  %v5094_v60 = vadd.f32 %v2888_v36, %v2842_v19  ;;  %v2217_v12 = vrot.slane %v2182_v11, 5  ;;  %v2297_v63 = vrot.slane %v2038_v10, 7 }
 0x1a3   :  { %6054 = vst [vmem:[#allocation118_spill] sm:$0xff] %v5092_v47  ;;  %v2855_v23 = vmul.f32 0.26601171, %v4529_v41  ;;  %v2746_v0 = vrot.slane %v5086_v22, 3  ;;  %v2818_v2 = vrot.slane %v2783_v35, 4  ;;  %v6055_v42 = vrot.slane %v4867_v3, 7 }
 0x1a4   :  { %v5096_v32 = vadd.f32 %v2329_v4, %v2321_v30  ;;  %v1954_v14 = vmul.f32 0.007598758, %v4531_v24  ;;  %v6056_v54 = vrot.slane %v4915_v38, 7  ;;  %v1946_v15 = vmul.f32 0.0010283801, %v4531_v24 }
 0x1a5   :  { %v1994_v4 = vmul.f32 0.036000773, %v4531_v24  ;;  %v2037_v20 = vmul.f32 0.10936069, %v4531_v24  ;;  %v2930_v11 = vrot.slane %v2783_v35, 6 }
 0x1a6   :  { %v2962_v36 = vsel %vm940_vm5, %v6056_v54, %v6055_v42  ;;  %v1970_v19 = vrot.slane %v1954_v14, 1  ;;  %v2109_v30 = vmul.f32 0.21300554, %v4531_v24  ;;  %v2181_v37 = vmul.f32 0.26601171, %v4531_v24 }
 0x1a7   :  { %v5110_v10 = vadd.f32 %v2962_v36, %v5043_v61  ;;  %v2010_v3 = vrot.slane %v1994_v4, 2  ;;  %v2072_v9 = vrot.slane %v2037_v20, 3  ;;  %v2296_v38 = vrot.slane %v2037_v20, 7 }
 0x1a8   :  { %v2619_v42 = vmul.f32 0.0010283801, %v4547_v55  ;;  %v1986_v54 = vadd.f32 %v1970_v19, %v1946_v15  ;;  %v2144_v25 = vrot.slane %v2109_v30, 4  ;;  %v2216_v8 = vrot.slane %v2181_v37, 5 }
 0x1a9   :  { %v2256_v47 = vrot.slane %v2109_v30, 6  ;;  %v2074_v18 = vsel %vm712_vm1, %v2072_v9, %v2073_v46  ;;  %v2298_v61 = vsel %vm940_vm5, %v2296_v38, %v2297_v63  ;;  %v2627_v35 = vmul.f32 0.007598758, %v4547_v55 }
 0x1aa   :  { %v2667_v14 = vmul.f32 0.036000773, %v4547_v55  ;;  %v2026_v36 = vadd.f32 %v2010_v3, %v1986_v54  ;;  %v2146_v24 = vsel %vm785_vm2, %v2144_v25, %v2145_v62  ;;  %v2218_v4 = vsel %vm858_vm3, %v2216_v8, %v2217_v12 }
 0x1ab   :  { %v2258_v20 = vsel %vm899_vm4, %v2256_v47, %v2257_v44  ;;  %v2643_v45 = vrot.slane %v2627_v35, 1  ;;  %v5123_v37 = vmul.f32 0.10936069, %v4547_v55  ;;  %v2782_v9 = vmul.f32 0.21300554, %v4547_v55 }
 0x1ac   :  { %v2683_v15 = vrot.slane %v2667_v14, 2  ;;  %v5127_v46 = vmul.f32 0.007598758, %v4478_v56  ;;  %v2890_v63 = vrot.slane %v2855_v23, 5  ;;  %v2098_v19 = vadd.f32 %v2074_v18, %v2026_v36 }
 0x1ad   :  { %v2854_v30 = vmul.f32 0.26601171, %v4547_v55  ;;  %v2659_v3 = vadd.f32 %v2643_v45, %v2619_v42  ;;  %v2745_v25 = vrot.slane %v5123_v37, 3  ;;  %v2817_v8 = vrot.slane %v2782_v9, 4 }
 0x1ae   :  { %v2929_v62 = vrot.slane %v2782_v9, 6  ;;  %v5133_v44 = vmul.f32 0.0010283801, %v4478_v56  ;;  %v2170_v12 = vadd.f32 %v2146_v24, %v2098_v19  ;;  %v5141_v55 = vmul.f32 0.007598758, %v4529_v41 }
 0x1af   :  { %v2889_v38 = vrot.slane %v2854_v30, 5  ;;  %v2699_v54 = vadd.f32 %v2683_v15, %v2659_v3  ;;  %v2747_v35 = vsel %vm712_vm1, %v2745_v25, %v2746_v0  ;;  %v2819_v23 = vsel %vm785_vm2, %v2817_v8, %v2818_v2 }
 0x1b0   :  { %6057 = vst [vmem:[#allocation119_spill] sm:$0xff] %v5133_v44  ;;  %v5138_v18 = vsel %vm899_vm4, %v2929_v62, %v2930_v11  ;;  %6058 = vst [vmem:[#allocation120_spill] sm:$0xff] %v5141_v55  ;;  %v2242_v45 = vadd.f32 %v2218_v4, %v2170_v12  ;;  %v2040_v14 = vmul.f32 0.10936069, %v4566_v6  ;;  %v2330_v36 = vmul.f32 0.036000773, %v4478_v56 }
 0x1b1   :  { %v2891_v42 = vsel %vm858_vm3, %v2889_v38, %v2890_v63  ;;  %v2771_v15 = vadd.f32 %v2747_v35, %v2699_v54  ;;  %v2112_v0 = vmul.f32 0.21300554, %v4566_v6  ;;  %v5150_v11 = vmul.f32 0.036000773, %v4529_v41 }
 0x1b2   :  { %v2282_v9 = vadd.f32 %v2258_v20, %v2242_v45  ;;  %v2184_v19 = vmul.f32 0.26601171, %v4566_v6  ;;  %v5155_v30 = vmul.f32 0.10936069, %v4605_v57  ;;  %v2785_v56 = vmul.f32 0.21300554, %v4605_v57 }
 0x1b3   :  { %6059 = vst [vmem:[#allocation121_spill] sm:$0xff] %v5150_v11  ;;  %v2843_v63 = vadd.f32 %v2819_v23, %v2771_v15  ;;  %v5160_v25 = vmul.f32 0.0010283801, %v4529_v41  ;;  %v2076_v62 = vrot.slane %v2040_v14, 3  ;;  %v2148_v20 = vrot.slane %v2112_v0, 4 }
 0x1b4   :  { %6060 = vst [vmem:[#allocation122_spill] sm:$0xff] %v5155_v30  ;;  %v2322_v8 = vadd.f32 %v2298_v61, %v2282_v9  ;;  %v2260_v38 = vrot.slane %v2112_v0, 6  ;;  %v2300_v54 = vrot.slane %v2040_v14, 7  ;;  %v2220_v23 = vrot.slane %v2184_v19, 5 }
 0x1b5   :  { %6061 = vst [vmem:[#allocation123_spill] sm:$0xff] %v5160_v25  ;;  %v5162_v12 = vadd.f32 %v2891_v42, %v2843_v63  ;;  %v2749_v45 = vrot.slane %v5155_v30, 3  ;;  %v2857_v15 = vmul.f32 0.26601171, %v4605_v57  ;;  %v2821_v4 = vrot.slane %v2785_v56, 4 }
 0x1b6   :  { %v5164_v35 = vadd.f32 %v2330_v36, %v2322_v8  ;;  %v2933_v2 = vrot.slane %v2785_v56, 6  ;;  %v1955_v3 = vmul.f32 0.007598758, %v4614_v7  ;;  %v3008_v41 = vadd.f32 %v4937_v34, %v5110_v10 }
 0x1b7   :  { %v1947_v61 = vmul.f32 0.0010283801, %v4614_v7  ;;  %v1995_v42 = vmul.f32 0.036000773, %v4614_v7  ;;  %v2039_v14 = vmul.f32 0.10936069, %v4614_v7  ;;  %v5176_v36 = vmul.f32 %v4968_v31, %v4881_v43 }
 0x1b8   :  { %v1971_v0 = vrot.slane %v1955_v3, 1  ;;  %v2111_v9 = vmul.f32 0.21300554, %v4614_v7  ;;  %v2183_v19 = vmul.f32 0.26601171, %v4614_v7  ;;  %v6062_v63 = vrot.slane %v4946_v17, 1 }
 0x1b9   :  { %v2011_v34 = vrot.slane %v1995_v42, 2  ;;  %v2075_v10 = vrot.slane %v2039_v14, 3  ;;  %v2299_v8 = vrot.slane %v2039_v14, 7  ;;  %v2620_v24 = vmul.f32 0.0010283801, %v4632_v28 }
 0x1ba   :  { %v5182_v56 = vadd.f32 %v6062_v63, %v3008_v41  ;;  %v1987_v47 = vadd.f32 %v1971_v0, %v1947_v61  ;;  %v2147_v55 = vrot.slane %v2111_v9, 4  ;;  %v2219_v11 = vrot.slane %v2183_v19, 5 }
 0x1bb   :  { %v2259_v25 = vrot.slane %v2111_v9, 6  ;;  %v2077_v22 = vsel %vm712_vm1, %v2075_v10, %v2076_v62  ;;  %v2301_v3 = vsel %vm940_vm5, %v2299_v8, %v2300_v54  ;;  %v2628_v44 = vmul.f32 0.007598758, %v4632_v28 }
 0x1bc   :  { %v2668_v7 = vmul.f32 0.036000773, %v4632_v28  ;;  %v2027_v17 = vadd.f32 %v2011_v34, %v1987_v47  ;;  %v2149_v41 = vsel %vm785_vm2, %v2147_v55, %v2148_v20  ;;  %v2221_v42 = vsel %vm858_vm3, %v2219_v11, %v2220_v23 }
 0x1bd   :  { %v2261_v14 = vsel %vm899_vm4, %v2259_v25, %v2260_v38  ;;  %v2644_v63 = vrot.slane %v2628_v44, 1  ;;  %v5193_v0 = vmul.f32 0.10936069, %v4632_v28  ;;  %v2784_v62 = vmul.f32 0.21300554, %v4632_v28 }
 0x1be   :  { %v2684_v61 = vrot.slane %v2668_v7, 2  ;;  %v5197_v54 = vmul.f32 0.007598758, %v4566_v6  ;;  %v2893_v9 = vrot.slane %v2857_v15, 5  ;;  %v2099_v19 = vadd.f32 %v2077_v22, %v2027_v17 }
 0x1bf   :  { %v2856_v47 = vmul.f32 0.26601171, %v4632_v28  ;;  %v2660_v34 = vadd.f32 %v2644_v63, %v2620_v24  ;;  %v2748_v55 = vrot.slane %v5193_v0, 3  ;;  %v2820_v11 = vrot.slane %v2784_v62, 4 }
 0x1c0   :  { %v2932_v20 = vrot.slane %v2784_v62, 6  ;;  %v5202_v44 = vmul.f32 0.0010283801, %v4566_v6  ;;  %v2171_v25 = vadd.f32 %v2149_v41, %v2099_v19  ;;  %v3072_v23 = vrot.slane %v4949_v49, 2 }
 0x1c1   :  { %v2892_v38 = vrot.slane %v2856_v47, 5  ;;  %v2700_v10 = vadd.f32 %v2684_v61, %v2660_v34  ;;  %v2750_v8 = vsel %vm712_vm1, %v2748_v55, %v2749_v45  ;;  %v2822_v15 = vsel %vm785_vm2, %v2820_v11, %v2821_v4 }
 0x1c2   :  { %v5208_v22 = vsel %vm899_vm4, %v2932_v20, %v2933_v2  ;;  %v2243_v24 = vadd.f32 %v2221_v42, %v2171_v25  ;;  %v2042_v17 = vmul.f32 0.10936069, %v4657_v29  ;;  %v2331_v41 = vmul.f32 0.036000773, %v4566_v6 }
 0x1c3   :  { %6063 = vst [vmem:[#allocation124_spill] sm:$0xff] %v5208_v22  ;;  %v2894_v7 = vsel %vm858_vm3, %v2892_v38, %v2893_v9  ;;  %v2772_v49 = vadd.f32 %v2750_v8, %v2700_v10  ;;  %v2114_v61 = vmul.f32 0.21300554, %v4657_v29  ;;  %v5218_v4 = vmul.f32 0.036000773, %v4605_v57 }
 0x1c4   :  { %v2283_v2 = vadd.f32 %v2261_v14, %v2243_v24  ;;  %v2186_v62 = vmul.f32 0.26601171, %v4657_v29  ;;  %v5223_v19 = vmul.f32 0.10936069, %v4701_v5  ;;  %v2787_v6 = vmul.f32 0.21300554, %v4701_v5 }
 0x1c5   :  { %6064 = vst [vmem:[#allocation125_spill] sm:$0xff] %v5218_v4  ;;  %v2844_v9 = vadd.f32 %v2822_v15, %v2772_v49  ;;  %v5227_v47 = vmul.f32 0.007598758, %v4605_v57  ;;  %v5230_v34 = vmul.f32 0.0010283801, %v4605_v57  ;;  %v2079_v11 = vrot.slane %v2042_v17, 3 }
 0x1c6   :  { %6065 = vst [vmem:[#allocation126_spill] sm:$0xff] %v5223_v19  ;;  %v2323_v55 = vadd.f32 %v2301_v3, %v2283_v2  ;;  %v2151_v14 = vrot.slane %v2114_v61, 4  ;;  %v2263_v25 = vrot.slane %v2114_v61, 6  ;;  %v2303_v38 = vrot.slane %v2042_v17, 7 }
 0x1c7   :  { %6066 = vst [vmem:[#allocation127_spill] sm:$0xff] %v5230_v34  ;;  %v5232_v20 = vadd.f32 %v2894_v7, %v2844_v9  ;;  %v2223_v8 = vrot.slane %v2186_v62, 5  ;;  %v2752_v15 = vrot.slane %v5223_v19, 3  ;;  %v2859_v24 = vmul.f32 0.26601171, %v4701_v5 }
 0x1c8   :  { %v5234_v10 = vadd.f32 %v2331_v41, %v2323_v55  ;;  %v2824_v49 = vrot.slane %v2787_v6, 4  ;;  %v2936_v42 = vrot.slane %v2787_v6, 6  ;;  %v1956_v45 = vmul.f32 0.007598758, %v4708_v50 }
 0x1c9   :  { %6067 = vst [vmem:[#allocation128_spill] sm:$0xff] %v5232_v20  ;;  %v5240_v57 = vadd.f32 %v3072_v23, %v5182_v56  ;;  %v1948_v3 = vmul.f32 0.0010283801, %v4708_v50  ;;  %v1996_v7 = vmul.f32 0.036000773, %v4708_v50  ;;  %v5247_v41 = vmul.f32 %v4881_v43, %v4881_v43 }
 0x1ca   :  { %v2041_v17 = vmul.f32 0.10936069, %v4708_v50  ;;  %v1972_v61 = vrot.slane %v1956_v45, 1  ;;  %v2113_v2 = vmul.f32 0.21300554, %v4708_v50 }
 0x1cb   :  { %v2185_v62 = vmul.f32 0.26601171, %v4708_v50  ;;  %v2012_v56 = vrot.slane %v1996_v7, 2  ;;  %v2621_v55 = vmul.f32 0.0010283801, %v4732_v16 }
 0x1cc   :  { %v2078_v23 = vrot.slane %v2041_v17, 3  ;;  %v2302_v6 = vrot.slane %v2041_v17, 7  ;;  %v1988_v63 = vadd.f32 %v1972_v61, %v1948_v3  ;;  %v2150_v28 = vrot.slane %v2113_v2, 4 }
 0x1cd   :  { %v2222_v4 = vrot.slane %v2185_v62, 5  ;;  %v2262_v34 = vrot.slane %v2113_v2, 6  ;;  %v2629_v30 = vmul.f32 0.007598758, %v4732_v16  ;;  %v2669_v50 = vmul.f32 0.036000773, %v4732_v16 }
 0x1ce   :  { %v2080_v43 = vsel %vm712_vm1, %v2078_v23, %v2079_v11  ;;  %v2304_v45 = vsel %vm940_vm5, %v2302_v6, %v2303_v38  ;;  %v2028_v22 = vadd.f32 %v2012_v56, %v1988_v63  ;;  %v2152_v9 = vsel %vm785_vm2, %v2150_v28, %v2151_v14 }
 0x1cf   :  { %v2224_v7 = vsel %vm858_vm3, %v2222_v4, %v2223_v8  ;;  %v2264_v17 = vsel %vm899_vm4, %v2262_v34, %v2263_v25  ;;  %v2645_v20 = vrot.slane %v2629_v30, 1  ;;  %v2685_v3 = vrot.slane %v2669_v50, 2  ;;  %v6076_v30 = vld [vmem:[#allocation6_spill] sm:$0xff] }
 0x1d0   :  { %v5262_v61 = vmul.f32 0.10936069, %v4732_v16  ;;  %v2786_v11 = vmul.f32 0.21300554, %v4732_v16  ;;  %v5266_v38 = vmul.f32 0.007598758, %v4657_v29  ;;  %v2100_v62 = vadd.f32 %v2080_v43, %v2028_v22 }
 0x1d1   :  { %v2896_v2 = vrot.slane %v2859_v24, 5  ;;  %v2858_v63 = vmul.f32 0.26601171, %v4732_v16  ;;  %v2661_v56 = vadd.f32 %v2645_v20, %v2621_v55  ;;  %v5272_v34 = vmul.f32 0.0010283801, %v4657_v29 }
 0x1d2   :  { %6068 = vst [vmem:[#allocation129_spill] sm:$0xff] %v5262_v61  ;;  %6069 = vst [vmem:[#allocation130_spill] sm:$0xff] %v5266_v38  ;;  %v2751_v28 = vrot.slane %v5262_v61, 3  ;;  %v2823_v4 = vrot.slane %v2786_v11, 4  ;;  %v2935_v14 = vrot.slane %v2786_v11, 6  ;;  %v2172_v25 = vadd.f32 %v2152_v9, %v2100_v62 }
 0x1d3   :  { %6070 = vst [vmem:[#allocation131_spill] sm:$0xff] %v5272_v34  ;;  %v2895_v8 = vrot.slane %v2858_v63, 5  ;;  %v2701_v23 = vadd.f32 %v2685_v3, %v2661_v56  ;;  %v2044_v43 = vmul.f32 0.10936069, %v4755_v58  ;;  %v2332_v50 = vmul.f32 0.036000773, %v4657_v29 }
 0x1d4   :  { %v2753_v6 = vsel %vm712_vm1, %v2751_v28, %v2752_v15  ;;  %v2825_v24 = vsel %vm785_vm2, %v2823_v4, %v2824_v49  ;;  %v5277_v22 = vsel %vm899_vm4, %v2935_v14, %v2936_v42  ;;  %v2244_v20 = vadd.f32 %v2224_v7, %v2172_v25 }
 0x1d5   :  { %6071 = vst [vmem:[#allocation132_spill] sm:$0xff] %v5277_v22  ;;  %v2897_v55 = vsel %vm858_vm3, %v2895_v8, %v2896_v2  ;;  %v2773_v11 = vadd.f32 %v2753_v6, %v2701_v23  ;;  %v2116_v3 = vmul.f32 0.21300554, %v4755_v58  ;;  %v5287_v49 = vmul.f32 0.036000773, %v4701_v5 }
 0x1d6   :  { %v2284_v42 = vadd.f32 %v2264_v17, %v2244_v20  ;;  %v2188_v62 = vmul.f32 0.26601171, %v4755_v58  ;;  %v5291_v2 = vmul.f32 0.10936069, %v4797_v1  ;;  %v2789_v63 = vmul.f32 0.21300554, %v4797_v1 }
 0x1d7   :  { %6072 = vst [vmem:[#allocation133_spill] sm:$0xff] %v5287_v49  ;;  %v2845_v7 = vadd.f32 %v2825_v24, %v2773_v11  ;;  %v3112_v29 = vmul.f32 %v4968_v31, %v4968_v31  ;;  %v5298_v28 = vmul.f32 0.007598758, %v4701_v5  ;;  %v2082_v14 = vrot.slane %v2044_v43, 3 }
 0x1d8   :  { %v2324_v4 = vadd.f32 %v2304_v45, %v2284_v42  ;;  %v2154_v17 = vrot.slane %v2116_v3, 4  ;;  %v2266_v8 = vrot.slane %v2116_v3, 6  ;;  %v2306_v23 = vrot.slane %v2044_v43, 7 }
 0x1d9   :  { %6073 = vst [vmem:[#allocation134_spill] sm:$0xff] %v5298_v28  ;;  %v5300_v25 = vadd.f32 %v2897_v55, %v2845_v7  ;;  %v2226_v24 = vrot.slane %v2188_v62, 5  ;;  %v2755_v20 = vrot.slane %v5291_v2, 3  ;;  %v2861_v11 = vmul.f32 0.26601171, %v4797_v1 }
 0x1da   :  { %v5302_v6 = vadd.f32 %v2332_v50, %v2324_v4  ;;  %v2827_v31 = vrot.slane %v2789_v63, 4  ;;  %v2939_v15 = vrot.slane %v2789_v63, 6  ;;  %v1957_v56 = vmul.f32 0.007598758, %v4800_v51 }
 0x1db   :  { %6074 = vst [vmem:[#allocation135_spill] sm:$0xff] %v5300_v25  ;;  %v5308_v9 = vadd.f32 %v3112_v29, %v5247_v41  ;;  %v1949_v45 = vmul.f32 0.0010283801, %v4800_v51  ;;  %v1997_v55 = vmul.f32 0.036000773, %v4800_v51 }
 0x1dc   :  { %6075 = vst [vmem:[#allocation136_spill] sm:$0xff] %v5302_v6  ;;  %v2043_v43 = vmul.f32 0.10936069, %v4800_v51  ;;  %v1973_v50 = vrot.slane %v1957_v56, 1  ;;  %v2115_v3 = vmul.f32 0.21300554, %v4800_v51 }
 0x1dd   :  { %v2187_v42 = vmul.f32 0.26601171, %v4800_v51  ;;  %v2013_v7 = vrot.slane %v1997_v55, 2  ;;  %v2622_v41 = vmul.f32 0.0010283801, %v6076_v30 }
 0x1de   :  { %v2081_v63 = vrot.slane %v2043_v43, 3  ;;  %v2305_v4 = vrot.slane %v2043_v43, 7  ;;  %v1989_v29 = vadd.f32 %v1973_v50, %v1949_v45  ;;  %v2153_v16 = vrot.slane %v2115_v3, 4 }
 0x1df   :  { %v2225_v49 = vrot.slane %v2187_v42, 5  ;;  %v2265_v19 = vrot.slane %v2115_v3, 6  ;;  %v2630_v25 = vmul.f32 0.007598758, %v6076_v30  ;;  %v2670_v51 = vmul.f32 0.036000773, %v6076_v30 }
 0x1e0   :  { %v2083_v22 = vsel %vm712_vm1, %v2081_v63, %v2082_v14  ;;  %v2307_v56 = vsel %vm940_vm5, %v2305_v4, %v2306_v23  ;;  %v2029_v34 = vadd.f32 %v2013_v7, %v1989_v29  ;;  %v2155_v62 = vsel %vm785_vm2, %v2153_v16, %v2154_v17 }
 0x1e1   :  { %v2227_v55 = vsel %vm858_vm3, %v2225_v49, %v2226_v24  ;;  %v2267_v43 = vsel %vm899_vm4, %v2265_v19, %v2266_v8  ;;  %v2646_v38 = vrot.slane %v2630_v25, 1  ;;  %v2686_v45 = vrot.slane %v2670_v51, 2 }
 0x1e2   :  { %v5326_v50 = vmul.f32 0.10936069, %v6076_v30  ;;  %v2788_v14 = vmul.f32 0.21300554, %v6076_v30  ;;  %v5330_v23 = vmul.f32 0.0010283801, %v4701_v5  ;;  %v2101_v42 = vadd.f32 %v2083_v22, %v2029_v34 }
 0x1e3   :  { %v2899_v3 = vrot.slane %v2861_v11, 5  ;;  %v2860_v7 = vmul.f32 0.26601171, %v6076_v30  ;;  %v2662_v63 = vadd.f32 %v2646_v38, %v2622_v41  ;;  %v5336_v25 = vmul.f32 0.007598758, %v4755_v58  ;;  %v6081_v22 = vld [vmem:[#allocation111_spill] sm:$0xff] }
 0x1e4   :  { %6077 = vst [vmem:[#allocation6_spill] sm:$0xff] %v5326_v50  ;;  %6078 = vst [vmem:[#allocation137_spill] sm:$0xff] %v5330_v23  ;;  %v2754_v16 = vrot.slane %v5326_v50, 3  ;;  %v2826_v49 = vrot.slane %v2788_v14, 4  ;;  %v2938_v17 = vrot.slane %v2788_v14, 6  ;;  %v2173_v8 = vadd.f32 %v2155_v62, %v2101_v42  ;;  %v6082_v42 = vld [vmem:[#allocation114_spill] sm:$0xff] }
 0x1e5   :  { %6079 = vst [vmem:[#allocation138_spill] sm:$0xff] %v5336_v25  ;;  %v2898_v24 = vrot.slane %v2860_v7, 5  ;;  %v2702_v4 = vadd.f32 %v2686_v45, %v2662_v63  ;;  %v2046_v41 = vmul.f32 0.10936069, %v6081_v22  ;;  %v2118_v29 = vmul.f32 0.21300554, %v6081_v22 }
 0x1e6   :  { %v2756_v5 = vsel %vm712_vm1, %v2754_v16, %v2755_v20  ;;  %v2828_v11 = vsel %vm785_vm2, %v2826_v49, %v2827_v31  ;;  %v5341_v34 = vsel %vm899_vm4, %v2938_v17, %v2939_v15  ;;  %v2245_v38 = vadd.f32 %v2227_v55, %v2173_v8 }
 0x1e7   :  { %6080 = vst [vmem:[#allocation139_spill] sm:$0xff] %v5341_v34  ;;  %v2900_v30 = vsel %vm858_vm3, %v2898_v24, %v2899_v3  ;;  %v2333_v62 = vmul.f32 0.036000773, %v4755_v58  ;;  %v2774_v14 = vadd.f32 %v2756_v5, %v2702_v4  ;;  %v2190_v45 = vmul.f32 0.26601171, %v6081_v22 }
 0x1e8   :  { %v5351_v31 = vmul.f32 0.0010283801, %v4755_v58  ;;  %v2285_v15 = vadd.f32 %v2267_v43, %v2245_v38  ;;  %v3144_v55 = vmul.f32 2.0, %v5176_v36  ;;  %v5355_v7 = vmul.f32 0.10936069, %v6082_v42 }
 0x1e9   :  { %v2846_v3 = vadd.f32 %v2828_v11, %v2774_v14  ;;  %v2791_v63 = vmul.f32 0.21300554, %v6082_v42  ;;  %v5359_v16 = vmul.f32 0.26601171, %v6082_v42  ;;  %v2085_v17 = vrot.slane %v2046_v41, 3 }
 0x1ea   :  { %v2325_v49 = vadd.f32 %v2307_v56, %v2285_v15  ;;  %v2157_v8 = vrot.slane %v2118_v29, 4  ;;  %v2269_v24 = vrot.slane %v2118_v29, 6  ;;  %v2229_v58 = vrot.slane %v2190_v45, 5 }
 0x1eb   :  { %v5361_v4 = vadd.f32 %v2900_v30, %v2846_v3  ;;  %v2309_v5 = vrot.slane %v2046_v41, 7  ;;  %v5364_v43 = vmul.f32 0.036000773, %v6081_v22  ;;  %v5369_v38 = vmul.f32 0.007598758, %v6081_v22  ;;  %v6085_v30 = vld [vmem:[#allocation115_spill] sm:$0xff] }
 0x1ec   :  { %v5366_v11 = vadd.f32 %v2333_v62, %v2325_v49  ;;  %v2758_v14 = vrot.slane %v5355_v7, 3  ;;  %v2830_v19 = vrot.slane %v2791_v63, 4  ;;  %v2902_v56 = vrot.slane %v5359_v16, 5 }
 0x1ed   :  { %6083 = vst [vmem:[#allocation140_spill] sm:$0xff] %v5361_v4  ;;  %v2942_v15 = vrot.slane %v2791_v63, 6  ;;  %v2982_v29 = vrot.slane %v5355_v7, 7  ;;  %v1958_v3 = vmul.f32 0.007598758, %v6085_v30  ;;  %v6086_v42 = vsub.f32 %v5240_v57, %v5176_v36  ;;  %v6087_v4 = vld [vmem:[#allocation22_spill] sm:$0xff] }
 0x1ee   :  { %6084 = vst [vmem:[#allocation141_spill] sm:$0xff] %v5366_v11  ;;  %v1950_v41 = vmul.f32 0.0010283801, %v6085_v30  ;;  %v1998_v45 = vmul.f32 0.036000773, %v6085_v30 }
 0x1ef   :  { %v2045_v62 = vmul.f32 0.10936069, %v6085_v30  ;;  %v1974_v49 = vrot.slane %v1958_v3, 1  ;;  %v2117_v20 = vmul.f32 0.21300554, %v6085_v30  ;;  %v3160_v16 = vmul.f32 2.0, %v6086_v42 }
 0x1f0   :  { %v2189_v51 = vmul.f32 0.26601171, %v6085_v30  ;;  %v2014_v63 = vrot.slane %v1998_v45, 2  ;;  %v2623_v28 = vmul.f32 0.0010283801, %v6087_v4 }
 0x1f1   :  { %v2084_v34 = vrot.slane %v2045_v62, 3  ;;  %v2308_v7 = vrot.slane %v2045_v62, 7  ;;  %v1990_v25 = vadd.f32 %v1974_v49, %v1950_v41  ;;  %v2156_v11 = vrot.slane %v2117_v20, 4 }
 0x1f2   :  { %v2228_v23 = vrot.slane %v2189_v51, 5  ;;  %v2268_v61 = vrot.slane %v2117_v20, 6  ;;  %v2631_v6 = vmul.f32 0.007598758, %v6087_v4  ;;  %v2671_v30 = vmul.f32 0.036000773, %v6087_v4 }
 0x1f3   :  { %v2086_v22 = vsel %vm712_vm1, %v2084_v34, %v2085_v17  ;;  %v2310_v3 = vsel %vm940_vm5, %v2308_v7, %v2309_v5  ;;  %v2030_v50 = vadd.f32 %v2014_v63, %v1990_v25  ;;  %v2158_v36 = vsel %vm785_vm2, %v2156_v11, %v2157_v8 }
 0x1f4   :  { %v2230_v57 = vsel %vm858_vm3, %v2228_v23, %v2229_v58  ;;  %v2270_v42 = vsel %vm899_vm4, %v2268_v61, %v2269_v24  ;;  %v2647_v45 = vrot.slane %v2631_v6, 1  ;;  %v2687_v41 = vrot.slane %v2671_v30, 2 }
 0x1f5   :  { %v2718_v51 = vmul.f32 0.10936069, %v6087_v4  ;;  %v2790_v20 = vmul.f32 0.21300554, %v6087_v4  ;;  %v2102_v34 = vadd.f32 %v2086_v22, %v2030_v50  ;;  %v2862_v17 = vmul.f32 0.26601171, %v6087_v4 }
 0x1f6   :  { %v3152_v5 = vadd.f32 0.0001, %v3144_v55  ;;  %v3168_v62 = vadd.f32 0.0009, %v3160_v16  ;;  %v2663_v49 = vadd.f32 %v2647_v45, %v2623_v28  ;;  %v3184_v4 = vadd.f32 0.0001, %v5308_v9 }
 0x1f7   :  { %v2757_v7 = vrot.slane %v2718_v51, 3  ;;  %v2829_v25 = vrot.slane %v2790_v20, 4  ;;  %v2941_v63 = vrot.slane %v2790_v20, 6  ;;  %v2174_v8 = vadd.f32 %v2158_v36, %v2102_v34  ;;  %v6089_v45 = vld [vmem:[#allocation34_spill] sm:$0xff]  ;;  %v6093_v20 = vld [vmem:[#allocation16_spill] sm:$0xff]  ;;  %v6095_v34 = vld [vmem:[#allocation27_spill] sm:$0xff] }
 0x1f8   :  { %v2901_v11 = vrot.slane %v2862_v17, 5  ;;  %v2981_v23 = vrot.slane %v2718_v51, 7  ;;  %v5394_v58 = vmul.f32 %v3168_v62, %v3152_v5  ;;  %v2703_v61 = vadd.f32 %v2687_v41, %v2663_v49  ;;  %v6090_v41 = vld [vmem:[#allocation24_spill] sm:$0xff]  ;;  %v6091_v51 = vld [vmem:[#allocation10_spill] sm:$0xff] }
 0x1f9   :  { %v2759_v6 = vsel %vm712_vm1, %v2757_v7, %v2758_v14  ;;  %v2831_v24 = vsel %vm785_vm2, %v2829_v25, %v2830_v19  ;;  %v2943_v50 = vsel %vm899_vm4, %v2941_v63, %v2942_v15  ;;  %v2246_v22 = vadd.f32 %v2230_v57, %v2174_v8  ;;  %v6097_v5 = vld [vmem:[#allocation12_spill] sm:$0xff]  ;;  %v6099_v49 = vld [vmem:[#allocation14_spill] sm:$0xff] }
 0x1fa   :  { %v2903_v55 = vsel %vm858_vm3, %v2901_v11, %v2902_v56  ;;  %v5401_v28 = vsel %vm940_vm5, %v2981_v23, %v2982_v29  ;;  %v2775_v16 = vadd.f32 %v2759_v6, %v2703_v61  ;;  %v6088_v30 = vsub.f32 %v5037_v27, %v5308_v9  ;;  %v6096_v29 = vld [vmem:[#allocation15_spill] sm:$0xff] }
 0x1fb   :  { %v933_v14 = vadd.f32 %v6090_v41, %v6089_v45  ;;  %v6092_v19 = vrot.slane %v6091_v51, 7  ;;  %v6094_v15 = vrot.slane %v6093_v20, 7  ;;  %v2286_v56 = vadd.f32 %v2270_v42, %v2246_v22  ;;  %v6102_v6 = vld [vmem:[#allocation23_spill] sm:$0xff]  ;;  %v6104_v45 = vld [vmem:[#allocation21_spill] sm:$0xff] }
 0x1fc   :  { %v3192_v36 = vadd.f32 0.0009, %v6088_v30  ;;  %v1607_v17 = vadd.f32 %v6096_v29, %v6095_v34  ;;  %v6098_v62 = vrot.slane %v6097_v5, 7  ;;  %v6100_v7 = vrot.slane %v6099_v49, 7  ;;  %v6114_v29 = vld [vmem:[#allocation43_spill] sm:$0xff] }
 0x1fd   :  { %v946_v57 = vsel %vm940_vm5, %v6094_v15, %v6092_v19  ;;  %v6101_v9 = vrot.slane %v4983_v53, 1  ;;  %v2847_v63 = vadd.f32 %v2831_v24, %v2775_v16  ;;  %v2953_v23 = vadd.f32 %v4994_v39, %v5020_v52  ;;  %v6107_v53 = vld [vmem:[#allocation30_spill] sm:$0xff]  ;;  %v6108_v52 = vld [vmem:[#allocation33_spill] sm:$0xff]  ;;  %v6109_v16 = vld [vmem:[#allocation32_spill] sm:$0xff] }
 0x1fe   :  { %v1619_v27 = vsel %vm940_vm5, %v6100_v7, %v6098_v62  ;;  %v3200_v8 = vmul.f32 %v3192_v36, %v3184_v4  ;;  %v974_v11 = vadd.f32 %v946_v57, %v933_v14  ;;  %v2326_v42 = vadd.f32 %v2310_v3, %v2286_v56  ;;  %v6110_v15 = vld [vmem:[#allocation25_spill] sm:$0xff]  ;;  %v6115_v62 = vld [vmem:[#allocation35_spill] sm:$0xff] }
 0x1ff   :  { %v2376_v25 = vadd.f32 %v6101_v9, %v5022_v33  ;;  %v1647_v61 = vadd.f32 %v1619_v27, %v1607_v17  ;;  %v6103_v22 = vrot.slane %v6102_v6, 2  ;;  %v6105_v41 = vrot.slane %v6104_v45, 7  ;;  %v6112_v56 = vld [vmem:[#allocation29_spill] sm:$0xff]  ;;  %v6119_v27 = vld [vmem:[#allocation39_spill] sm:$0xff] }
 0x200   :  { %v6106_v51 = vrot.slane %v4979_v59, 7  ;;  %v2919_v20 = vadd.f32 %v2903_v55, %v2847_v63  ;;  %3595 = vrcp.f32 %v3200_v8  ;;  %v990_v33 = vadd.f32 %v6107_v53, %v974_v11  ;;  %v6113_v55 = vld [vmem:[#allocation51_spill] sm:$0xff]  ;;  %v6122_v63 = vld [vmem:[#allocation40_spill] sm:$0xff]  ;;  %v6123_v11 = vld [vmem:[#allocation26_spill] sm:$0xff] }
 0x201   :  { %v2416_v30 = vadd.f32 %v6103_v22, %v2376_v25  ;;  %v2366_v4 = vrot.slane %v5369_v38, 1  ;;  %v2342_v39 = vadd.f32 %v5364_v43, %v2326_v42  ;;  %v1663_v3 = vadd.f32 %v6108_v52, %v1647_v61  ;;  %v6117_v43 = vld [vmem:[#allocation28_spill] sm:$0xff]  ;;  %v6126_v45 = vld [vmem:[#allocation31_spill] sm:$0xff] }
 0x202   :  { %v2965_v19 = vsel %vm940_vm5, %v6106_v51, %v6105_v41  ;;  %v3073_v36 = vrot.slane %v6109_v16, 2  ;;  %v5438_v14 = vadd.f32 %v2943_v50, %v2919_v20  ;;  %v6111_v57 = vrot.slane %v6110_v15, 1  ;;  %v6121_v25 = vld [vmem:[#allocation44_spill] sm:$0xff]  ;;  %v6128_v51 = vld [vmem:[#allocation37_spill] sm:$0xff] }
 0x203   :  { %v2993_v24 = vadd.f32 %v2965_v19, %v2953_v23  ;;  %v934_v17 = vadd.f32 %v6114_v29, %v6113_v55  ;;  %v5445_v5 = vadd.f32 %v2366_v4, %v2342_v39  ;;  %v6116_v38 = vrot.slane %v6115_v62, 1  ;;  %v6130_v53 = vld [vmem:[#allocation36_spill] sm:$0xff]  ;;  %v6133_v15 = vld [vmem:[#allocation45_spill] sm:$0xff] }
 0x204   :  { %v1030_v59 = vadd.f32 %v6111_v57, %v990_v33  ;;  %v6118_v7 = vrot.slane %v6117_v43, 7  ;;  %v6120_v9 = vrot.slane %v6119_v27, 7  ;;  %v1608_v8 = vadd.f32 %v6122_v63, %v6121_v25  ;;  %v6143_v63 = vld [vmem:[#allocation42_spill] sm:$0xff] }
 0x205   :  { %v3009_v34 = vadd.f32 %v6112_v56, %v2993_v24  ;;  %v1703_v49 = vadd.f32 %v6116_v38, %v1663_v3  ;;  %v6124_v23 = vrot.slane %v6123_v11, 2  ;;  %v6125_v61 = vrot.slane %v5015_v48, 1  ;;  %v6137_v38 = vld [vmem:[#allocation20_spill] sm:$0xff] }
 0x206   :  { %v949_v50 = vsel %vm940_vm5, %v6120_v9, %v6118_v7  ;;  %v6127_v41 = vrot.slane %v6126_v45, 7  ;;  %v6129_v19 = vrot.slane %v6128_v51, 7  ;;  %v6131_v33 = vrot.slane %v6130_v53, 2  ;;  %v6148_v45 = vld [vmem:[#allocation55_spill] sm:$0xff] }
 0x207   :  { %v1070_v42 = vadd.f32 %v6124_v23, %v1030_v59  ;;  %v3049_v6 = vadd.f32 %v6125_v61, %v3009_v34  ;;  %v975_v22 = vadd.f32 %v949_v50, %v934_v17  ;;  %v6132_v39 = vrot.slane %v5061_v13, 1  ;;  %v6136_v17 = vld [vmem:[#allocation47_spill] sm:$0xff]  ;;  %v6145_v23 = vld [vmem:[#allocation116_spill] sm:$0xff]  ;;  %v6146_v61 = vld [vmem:[#allocation118_spill] sm:$0xff] }
 0x208   :  { %v1622_v20 = vsel %vm940_vm5, %v6129_v19, %v6127_v41  ;;  %v1743_v24 = vadd.f32 %v6131_v33, %v1703_v49  ;;  %v2954_v3 = vadd.f32 %v5069_v26, %v5094_v60  ;;  %v6134_v59 = vrot.slane %v5009_v40, 7  ;;  %v6139_v26 = vld [vmem:[#allocation41_spill] sm:$0xff] }
 0x209   :  { %v1648_v4 = vadd.f32 %v1622_v20, %v1608_v8  ;;  %v2377_v52 = vadd.f32 %v6132_v39, %v5096_v32  ;;  %v3089_v48 = vadd.f32 %v3073_v36, %v3049_v6  ;;  %v3105_v16 = vmul.f32 %v1070_v42, %v1070_v42 }
 0x20a   :  { %v991_v57 = vadd.f32 %v6133_v15, %v975_v22  ;;  %v6135_v56 = vrot.slane %v5054_v21, 7  ;;  %v3097_v55 = vmul.f32 %v1743_v24, %v1070_v42  ;;  %v3113_v29 = vmul.f32 %v1743_v24, %v1743_v24  ;;  %v6141_v21 = vld [vmem:[#allocation49_spill] sm:$0xff]  ;;  %v3596_v25 = vpop.eup %3595  ;;  %v6149_v24 = vld [vmem:[#allocation50_spill] sm:$0xff] }
 0x20b   :  { %v1664_v62 = vadd.f32 %v6136_v17, %v1648_v4  ;;  %v6138_v13 = vrot.slane %v6137_v38, 2  ;;  %v2405_v49 = vrot.slane %v5351_v31, 2  ;;  %v6140_v60 = vrot.slane %v6139_v26, 1  ;;  %v6147_v22 = vld [vmem:[#allocation65_spill] sm:$0xff] }
 0x20c   :  { %v2968_v34 = vsel %vm940_vm5, %v6135_v56, %v6134_v59  ;;  %v3121_v7 = vadd.f32 %v3113_v29, %v3105_v16  ;;  %v3137_v40 = vsub.f32 %v3089_v48, %v3097_v55  ;;  %v3145_v27 = vmul.f32 2.0, %v3097_v55  ;;  %v6153_v56 = vld [vmem:[#allocation46_spill] sm:$0xff] }
 0x20d   :  { %v2417_v32 = vadd.f32 %v6138_v13, %v2377_v52  ;;  %v1031_v36 = vadd.f32 %v6140_v60, %v991_v57  ;;  %v2994_v43 = vadd.f32 %v2968_v34, %v2954_v3  ;;  %v6142_v9 = vrot.slane %v6141_v21, 1  ;;  %v6151_v52 = vld [vmem:[#allocation38_spill] sm:$0xff]  ;;  %v6157_v60 = vld [vmem:[#allocation60_spill] sm:$0xff] }
 0x20e   :  { %v6144_v8 = vrot.slane %v6143_v63, 2  ;;  %v3074_v6 = vrot.slane %v6146_v61, 2  ;;  %v935_v41 = vadd.f32 %v6148_v45, %v6147_v22  ;;  %v3216_v51 = vmul.f32 %v3596_v25, %v5394_v58  ;;  %v6155_v55 = vld [vmem:[#allocation54_spill] sm:$0xff] }
 0x20f   :  { %v1704_v50 = vadd.f32 %v6142_v9, %v1664_v62  ;;  %v3010_v42 = vadd.f32 %v6145_v23, %v2994_v43  ;;  %v3129_v19 = vsub.f32 %v2416_v30, %v3121_v7  ;;  %v3153_v20 = vadd.f32 0.0001, %v3145_v27  ;;  %v6161_v27 = vld [vmem:[#allocation52_spill] sm:$0xff] }
 0x210   :  { %v1071_v11 = vadd.f32 %v6144_v8, %v1031_v36  ;;  %v3161_v53 = vmul.f32 2.0, %v3137_v40  ;;  %v3185_v33 = vadd.f32 0.0001, %v3121_v7  ;;  %v6150_v4 = vrot.slane %v6149_v24, 2  ;;  %v6158_v36 = vld [vmem:[#allocation53_spill] sm:$0xff]  ;;  %v6159_v7 = vld [vmem:[#allocation48_spill] sm:$0xff] }
 0x211   :  { %v6152_v3 = vrot.slane %v6151_v52, 1  ;;  %v3225_v15 = vsel %vm3224_vm6, %v3216_v51, 0.0  ;;  %v3193_v59 = vadd.f32 0.0009, %v3129_v19  ;;  %v6154_v34 = vrot.slane %v6153_v56, 7  ;;  %v6163_v8 = vld [vmem:[#allocation62_spill] sm:$0xff] }
 0x212   :  { %v1744_v39 = vadd.f32 %v6150_v4, %v1704_v50  ;;  %v3106_v16 = vmul.f32 %v1071_v11, %v1071_v11  ;;  %v3169_v57 = vadd.f32 0.0009, %v3161_v53  ;;  %v6156_v29 = vrot.slane %v6155_v55, 7  ;;  %3226 = vadd.xlane.f32.xlu1 %v3225_v15  ;;  %v6165_v19 = vld [vmem:[#allocation56_spill] sm:$0xff]  ;;  %v6168_v4 = vld [vmem:[#allocation119_spill] sm:$0xff]  ;;  %v6173_v15 = vld [vmem:[#allocation57_spill] sm:$0xff] }
 0x213   :  { %v3050_v48 = vadd.f32 %v6152_v3, %v3010_v42  ;;  %v3201_v26 = vmul.f32 %v3193_v59, %v3185_v33  ;;  %v1609_v43 = vadd.f32 %v6158_v36, %v6157_v60  ;;  %v6160_v40 = vrot.slane %v6159_v7, 7  ;;  %v6167_v33 = vld [vmem:[#allocation63_spill] sm:$0xff]  ;;  %v6170_v3 = vld [vmem:[#allocation117_spill] sm:$0xff]  ;;  %v6175_v56 = vld [vmem:[#allocation58_spill] sm:$0xff] }
 0x214   :  { %v952_v58 = vsel %vm940_vm5, %v6156_v29, %v6154_v34  ;;  %v3098_v17 = vmul.f32 %v1744_v39, %v1071_v11  ;;  %v3114_v62 = vmul.f32 %v1744_v39, %v1744_v39  ;;  %v3177_v13 = vmul.f32 %v3169_v57, %v3153_v20  ;;  %v6177_v29 = vld [vmem:[#allocation123_spill] sm:$0xff]  ;;  %v6181_v36 = vld [vmem:[#allocation61_spill] sm:$0xff]  ;;  %v6183_v7 = vld [vmem:[#allocation68_spill] sm:$0xff] }
 0x215   :  { %v3090_v30 = vadd.f32 %v3074_v6, %v3050_v48  ;;  %v976_v38 = vadd.f32 %v952_v58, %v935_v41  ;;  %v6162_v21 = vrot.slane %v6161_v27, 7  ;;  %3597 = vrcp.f32 %v3201_v26 }
 0x216   :  { %v3122_v50 = vadd.f32 %v3114_v62, %v3106_v16  ;;  %v3146_v63 = vmul.f32 2.0, %v3098_v17  ;;  %v6164_v42 = vrot.slane %v5127_v46, 1  ;;  %v2955_v6 = vadd.f32 %v5138_v18, %v5162_v12 }
 0x217   :  { %v1625_v9 = vsel %vm940_vm5, %v6162_v21, %v6160_v40  ;;  %v3138_v25 = vsub.f32 %v3090_v30, %v3098_v17  ;;  %v992_v23 = vadd.f32 %v6163_v8, %v976_v38  ;;  %v5517_v22 = vmul.f32 0.036000773, %v4797_v1  ;;  %v6178_v30 = vld [vmem:[#allocation79_spill] sm:$0xff]  ;;  %v6187_v8 = vld [vmem:[#allocation73_spill] sm:$0xff] }
 0x218   :  { %v1649_v11 = vadd.f32 %v1625_v9, %v1609_v43  ;;  %v2378_v61 = vadd.f32 %v6164_v42, %v5164_v35  ;;  %v3130_v45 = vsub.f32 %v2417_v32, %v3122_v50  ;;  %v3154_v41 = vadd.f32 0.0001, %v3146_v63  ;;  %v6179_v17 = vld [vmem:[#allocation71_spill] sm:$0xff]  ;;  %v6189_v42 = vld [vmem:[#allocation120_spill] sm:$0xff] }
 0x219   :  { %v3162_v51 = vmul.f32 2.0, %v3138_v25  ;;  %v6166_v20 = vrot.slane %v6165_v19, 1  ;;  %v6169_v39 = vrot.slane %v6168_v4, 2  ;;  %v6171_v46 = vrot.slane %v6170_v3, 7  ;;  %v6185_v21 = vld [vmem:[#allocation59_spill] sm:$0xff] }
 0x21a   :  { %v1665_v24 = vadd.f32 %v6167_v33, %v1649_v11  ;;  %v6172_v35 = vrot.slane %v5123_v37, 7  ;;  %v3186_v48 = vadd.f32 0.0001, %v3122_v50  ;;  %v3194_v16 = vadd.f32 0.0009, %v3130_v45  ;;  %v6180_v37 = vld [vmem:[#allocation121_spill] sm:$0xff] }
 0x21b   :  { %v1032_v53 = vadd.f32 %v6166_v20, %v992_v23  ;;  %v2418_v52 = vadd.f32 %v6169_v39, %v2378_v61  ;;  %v3170_v12 = vadd.f32 0.0009, %v3162_v51  ;;  %v6174_v57 = vrot.slane %v6173_v15, 2  ;;  %v6188_v23 = vld [vmem:[#allocation67_spill] sm:$0xff]  ;;  %v6191_v45 = vld [vmem:[#allocation64_spill] sm:$0xff]  ;;  %v6193_v51 = vld [vmem:[#allocation66_spill] sm:$0xff] }
 0x21c   :  { %v2971_v18 = vsel %vm940_vm5, %v6172_v35, %v6171_v46  ;;  %v6176_v34 = vrot.slane %v6175_v56, 1  ;;  %v3075_v58 = vrot.slane %v6177_v29, 2  ;;  %v936_v62 = vadd.f32 %v6179_v17, %v6178_v30  ;;  %v6196_v39 = vld [vmem:[#allocation74_spill] sm:$0xff] }
 0x21d   :  { %v2995_v32 = vadd.f32 %v2971_v18, %v2955_v6  ;;  %v1072_v59 = vadd.f32 %v6174_v57, %v1032_v53  ;;  %v3178_v38 = vmul.f32 %v3170_v12, %v3154_v41  ;;  %v3202_v26 = vmul.f32 %v3194_v16, %v3186_v48  ;;  %v6198_v48 = vld [vmem:[#allocation128_spill] sm:$0xff]  ;;  %v6200_v15 = vld [vmem:[#allocation122_spill] sm:$0xff] }
 0x21e   :  { %v1705_v55 = vadd.f32 %v6176_v34, %v1665_v24  ;;  %v6182_v43 = vrot.slane %v6181_v36, 7  ;;  %v6184_v40 = vrot.slane %v6183_v7, 7  ;;  %v6186_v9 = vrot.slane %v6185_v21, 2  ;;  %v6199_v16 = vld [vmem:[#allocation124_spill] sm:$0xff]  ;;  %v6205_v17 = vld [vmem:[#allocation78_spill] sm:$0xff] }
 0x21f   :  { %v3011_v60 = vadd.f32 %v6180_v37, %v2995_v32  ;;  %v3107_v25 = vmul.f32 %v1072_v59, %v1072_v59  ;;  %v1610_v11 = vadd.f32 %v6188_v23, %v6187_v8  ;;  %3599 = vrcp.f32 %v3202_v26  ;;  %v6211_v8 = vld [vmem:[#allocation125_spill] sm:$0xff] }
 0x220   :  { %v955_v27 = vsel %vm940_vm5, %v6184_v40, %v6182_v43  ;;  %v1745_v50 = vadd.f32 %v6186_v9, %v1705_v55  ;;  %v6190_v61 = vrot.slane %v6189_v42, 1  ;;  %v6192_v41 = vrot.slane %v6191_v45, 7  ;;  %v6203_v55 = vld [vmem:[#allocation69_spill] sm:$0xff]  ;;  %v6208_v40 = vld [vmem:[#allocation127_spill] sm:$0xff] }
 0x221   :  { %v977_v63 = vadd.f32 %v955_v27, %v936_v62  ;;  %v6194_v19 = vrot.slane %v6193_v51, 7  ;;  %v6195_v53 = vrot.slane %v5197_v54, 1  ;;  %v6197_v18 = vrot.slane %v5202_v44, 2  ;;  %v3598_v54 = vpop.eup %3597 }
 0x222   :  { %v3051_v6 = vadd.f32 %v6190_v61, %v3011_v60  ;;  %v3099_v24 = vmul.f32 %v1745_v50, %v1072_v59  ;;  %v3115_v4 = vmul.f32 %v1745_v50, %v1745_v50  ;;  %v2956_v32 = vadd.f32 %v6199_v16, %v6198_v48  ;;  %v6209_v50 = vld [vmem:[#allocation72_spill] sm:$0xff]  ;;  %v6222_v16 = vld [vmem:[#allocation82_spill] sm:$0xff] }
 0x223   :  { %v1628_v20 = vsel %vm940_vm5, %v6194_v19, %v6192_v41  ;;  %v2379_v33 = vadd.f32 %v6195_v53, %v5234_v10  ;;  %v993_v3 = vadd.f32 %v6196_v39, %v977_v63  ;;  %v6201_v57 = vrot.slane %v6200_v15, 7  ;;  %v6216_v53 = vld [vmem:[#allocation86_spill] sm:$0xff]  ;;  %v6217_v39 = vld [vmem:[#allocation76_spill] sm:$0xff] }
 0x224   :  { %v1650_v46 = vadd.f32 %v1628_v20, %v1610_v11  ;;  %v3091_v35 = vadd.f32 %v3075_v58, %v3051_v6  ;;  %v6202_v56 = vrot.slane %v5193_v0, 7  ;;  %v3123_v10 = vadd.f32 %v3115_v4, %v3107_v25  ;;  %v6206_v0 = vld [vmem:[#allocation70_spill] sm:$0xff]  ;;  %v6215_v20 = vld [vmem:[#allocation93_spill] sm:$0xff]  ;;  %v6221_v48 = vld [vmem:[#allocation88_spill] sm:$0xff] }
 0x225   :  { %v2419_v12 = vadd.f32 %v6197_v18, %v2379_v33  ;;  %v3147_v59 = vmul.f32 2.0, %v3099_v24  ;;  %v6204_v29 = vrot.slane %v6203_v55, 1  ;;  %v2979_v44 = vrot.slane %v5291_v2, 7  ;;  %v6281_v2 = vld [vmem:[#allocation5_spill] sm:$0xff] }
 0x226   :  { %v2974_v34 = vsel %vm940_vm5, %v6202_v56, %v6201_v57  ;;  %v1666_v58 = vadd.f32 %v6205_v17, %v1650_v46  ;;  %v3217_v62 = vmul.f32 %v3598_v54, %v3177_v13  ;;  %v3139_v26 = vsub.f32 %v3091_v35, %v3099_v24  ;;  %v6219_v46 = vld [vmem:[#allocation81_spill] sm:$0xff]  ;;  %v6223_v54 = vld [vmem:[#allocation6_spill] sm:$0xff] }
 0x227   :  { %v1033_v30 = vadd.f32 %v6204_v29, %v993_v3  ;;  %v2996_v37 = vadd.f32 %v2974_v34, %v2956_v32  ;;  %v5571_v60 = vmul.f32 0.007598758, %v4797_v1  ;;  %v3131_v36 = vsub.f32 %v2418_v52, %v3123_v10  ;;  %v6212_v52 = vld [vmem:[#allocation75_spill] sm:$0xff]  ;;  %v6224_v17 = vld [vmem:[#allocation77_spill] sm:$0xff] }
 0x228   :  { %v6207_v43 = vrot.slane %v6206_v0, 2  ;;  %v3076_v27 = vrot.slane %v6208_v40, 2  ;;  %v3228_v21 = vsel %vm3224_vm6, %v3217_v62, 0.0  ;;  %v3163_v9 = vmul.f32 2.0, %v3139_v26  ;;  %v6226_v62 = vld [vmem:[#allocation80_spill] sm:$0xff]  ;;  %v6228_v0 = vld [vmem:[#allocation89_spill] sm:$0xff] }
 0x229   :  { %v6210_v25 = vrot.slane %v6209_v50, 1  ;;  %v3012_v23 = vadd.f32 %v6211_v8, %v2996_v37  ;;  %3229 = vadd.xlane.f32.xlu0 %v3228_v21  ;;  %v3155_v13 = vadd.f32 0.0001, %v3147_v59  ;;  %v3187_v11 = vadd.f32 0.0001, %v3123_v10  ;;  %v3600_v15 = vpop.eup %3599  ;;  %v6229_v40 = vld [vmem:[#allocation136_spill] sm:$0xff] }
 0x22a   :  { %v1073_v7 = vadd.f32 %v6207_v43, %v1033_v30  ;;  %v3195_v42 = vadd.f32 0.0009, %v3131_v36  ;;  %v3171_v6 = vadd.f32 0.0009, %v3163_v9  ;;  %v6213_v45 = vrot.slane %v6212_v52, 2  ;;  %v6232_v9 = vld [vmem:[#allocation111_spill] sm:$0xff] }
 0x22b   :  { %v1706_v63 = vadd.f32 %v6210_v25, %v1666_v58  ;;  %v6214_v51 = vrot.slane %v5227_v47, 1  ;;  %v937_v33 = vadd.f32 %v6216_v53, %v6215_v20  ;;  %v5587_v24 = vmul.f32 0.0010283801, %v4797_v1 }
 0x22c   :  { %v3108_v61 = vmul.f32 %v1073_v7, %v1073_v7  ;;  %v3203_v4 = vmul.f32 %v3195_v42, %v3187_v11  ;;  %v6218_v3 = vrot.slane %v6217_v39, 7  ;;  %v6220_v35 = vrot.slane %v6219_v46, 7  ;;  %v6235_v42 = vld [vmem:[#allocation91_spill] sm:$0xff] }
 0x22d   :  { %v1746_v41 = vadd.f32 %v6213_v45, %v1706_v63  ;;  %v3052_v19 = vadd.f32 %v6214_v51, %v3012_v23  ;;  %v1611_v32 = vadd.f32 %v6222_v16, %v6221_v48  ;;  %v3179_v57 = vmul.f32 %v3171_v6, %v3155_v13  ;;  %v6233_v23 = vld [vmem:[#allocation83_spill] sm:$0xff]  ;;  %v6239_v51 = vld [vmem:[#allocation132_spill] sm:$0xff]  ;;  %v6246_v16 = vld [vmem:[#allocation85_spill] sm:$0xff] }
 0x22e   :  { %v958_v18 = vsel %vm940_vm5, %v6220_v35, %v6218_v3  ;;  %v2978_v10 = vrot.slane %v6223_v54, 7  ;;  %v3218_v59 = vmul.f32 %v3600_v15, %v3178_v38  ;;  %3601 = vrcp.f32 %v3203_v4  ;;  %v6236_v6 = vld [vmem:[#allocation131_spill] sm:$0xff]  ;;  %v6240_v4 = vld [vmem:[#allocation126_spill] sm:$0xff]  ;;  %v6242_v3 = vld [vmem:[#allocation129_spill] sm:$0xff] }
 0x22f   :  { %v3092_v47 = vadd.f32 %v3076_v27, %v3052_v19  ;;  %v3100_v56 = vmul.f32 %v1746_v41, %v1073_v7  ;;  %v3116_v34 = vmul.f32 %v1746_v41, %v1746_v41  ;;  %v978_v1 = vadd.f32 %v958_v18, %v937_v33  ;;  %v6230_v27 = vld [vmem:[#allocation130_spill] sm:$0xff]  ;;  %v6238_v41 = vld [vmem:[#allocation135_spill] sm:$0xff]  ;;  %v6244_v35 = vld [vmem:[#allocation84_spill] sm:$0xff] }
 0x230   :  { %v6225_v58 = vrot.slane %v6224_v17, 7  ;;  %v6227_v26 = vrot.slane %v6226_v62, 7  ;;  %v3231_v36 = vsel %vm3224_vm6, %v3218_v59, 0.0  ;;  %v6231_v21 = vrot.slane %v6230_v27, 1  ;;  %v6258_v27 = vld [vmem:[#allocation103_spill] sm:$0xff] }
 0x231   :  { %v3124_v55 = vadd.f32 %v3116_v34, %v3108_v61  ;;  %v3140_v29 = vsub.f32 %v3092_v47, %v3100_v56  ;;  %v3148_v30 = vmul.f32 2.0, %v3100_v56  ;;  %v994_v43 = vadd.f32 %v6228_v0, %v978_v1  ;;  %3232 = vadd.xlane.f32.xlu0 %v3231_v36  ;;  %v6248_v56 = vld [vmem:[#allocation137_spill] sm:$0xff]  ;;  %v6249_v1 = vld [vmem:[#allocation107_spill] sm:$0xff] }
 0x232   :  { %v1631_v37 = vsel %vm940_vm5, %v6227_v26, %v6225_v58  ;;  %v2380_v38 = vadd.f32 %v6231_v21, %v6229_v40  ;;  %v5608_v50 = vmul.f32 0.0010283801, %v6232_v9  ;;  %v6234_v13 = vrot.slane %v6233_v23, 1  ;;  %v6253_v58 = vld [vmem:[#allocation96_spill] sm:$0xff]  ;;  %v6259_v21 = vld [vmem:[#allocation95_spill] sm:$0xff] }
 0x233   :  { %v1651_v7 = vadd.f32 %v1631_v37, %v1611_v32  ;;  %v3132_v25 = vsub.f32 %v2419_v12, %v3124_v55  ;;  %v3156_v63 = vadd.f32 0.0001, %v3148_v30  ;;  %v3164_v8 = vmul.f32 2.0, %v3140_v29  ;;  %v6251_v30 = vld [vmem:[#allocation90_spill] sm:$0xff]  ;;  %v6255_v37 = vld [vmem:[#allocation87_spill] sm:$0xff] }
 0x234   :  { %v1034_v11 = vadd.f32 %v6234_v13, %v994_v43  ;;  %v6237_v52 = vrot.slane %v6236_v6, 2  ;;  %v2957_v19 = vadd.f32 %v6239_v51, %v6238_v41  ;;  %v3188_v53 = vadd.f32 0.0001, %v3124_v55  ;;  %v6250_v55 = vld [vmem:[#allocation98_spill] sm:$0xff]  ;;  %v6257_v43 = vld [vmem:[#allocation133_spill] sm:$0xff] }
 0x235   :  { %v1667_v61 = vadd.f32 %v6235_v42, %v1651_v7  ;;  %v3172_v20 = vadd.f32 0.0009, %v3164_v8  ;;  %v3196_v33 = vadd.f32 0.0009, %v3132_v25  ;;  %v6241_v39 = vrot.slane %v6240_v4, 7  ;;  %v6260_v25 = vld [vmem:[#allocation92_spill] sm:$0xff] }
 0x236   :  { %v2420_v45 = vadd.f32 %v6237_v52, %v2380_v38  ;;  %v6243_v12 = vrot.slane %v6242_v3, 7  ;;  %v6245_v18 = vrot.slane %v6244_v35, 2  ;;  %v6247_v32 = vrot.slane %v6246_v16, 1  ;;  %v6262_v8 = vld [vmem:[#allocation94_spill] sm:$0xff]  ;;  %v6271_v35 = vld [vmem:[#allocation139_spill] sm:$0xff]  ;;  %v6272_v16 = vld [vmem:[#allocation4_spill] sm:$0xff] }
 0x237   :  { %v3077_v34 = vrot.slane %v6248_v56, 2  ;;  %v3180_v54 = vmul.f32 %v3172_v20, %v3156_v63  ;;  %v3204_v59 = vmul.f32 %v3196_v33, %v3188_v53  ;;  %v938_v29 = vadd.f32 %v6250_v55, %v6249_v1  ;;  %v6265_v42 = vld [vmem:[#allocation138_spill] sm:$0xff]  ;;  %v6273_v56 = vld [vmem:[#allocation105_spill] sm:$0xff] }
 0x238   :  { %v2977_v46 = vsel %vm940_vm5, %v6243_v12, %v6241_v39  ;;  %v1074_v48 = vadd.f32 %v6245_v18, %v1034_v11  ;;  %v1707_v15 = vadd.f32 %v6247_v32, %v1667_v61  ;;  %v6252_v17 = vrot.slane %v6251_v30, 7  ;;  %v6264_v11 = vld [vmem:[#allocation141_spill] sm:$0xff]  ;;  %v3602_v52 = vpop.eup %3601  ;;  %v6267_v41 = vld [vmem:[#allocation134_spill] sm:$0xff]  ;;  %v6269_v39 = vld [vmem:[#allocation99_spill] sm:$0xff] }
 0x239   :  { %v2997_v47 = vadd.f32 %v2977_v46, %v2957_v19  ;;  %v6254_v62 = vrot.slane %v6253_v58, 7  ;;  %v6256_v36 = vrot.slane %v6255_v37, 2  ;;  %v1612_v38 = vadd.f32 %v6259_v21, %v6258_v27  ;;  %v6270_v46 = vld [vmem:[#allocation140_spill] sm:$0xff]  ;;  %v6274_v55 = vld [vmem:[#allocation97_spill] sm:$0xff]  ;;  %v6276_v58 = vld [vmem:[#allocation114_spill] sm:$0xff] }
 0x23a   :  { %v3109_v40 = vmul.f32 %v1074_v48, %v1074_v48  ;;  %3603 = vrcp.f32 %v3204_v59  ;;  %v6261_v63 = vrot.slane %v6260_v25, 7  ;;  %v6263_v23 = vrot.slane %v6262_v8, 7  ;;  %v6282_v21 = vld [vmem:[#allocation102_spill] sm:$0xff] }
 0x23b   :  { %v961_v26 = vsel %vm940_vm5, %v6254_v62, %v6252_v17  ;;  %v1747_v0 = vadd.f32 %v6256_v36, %v1707_v15  ;;  %v3013_v7 = vadd.f32 %v6257_v43, %v2997_v47  ;;  %v6266_v61 = vrot.slane %v6265_v42, 1  ;;  %v6286_v42 = vld [vmem:[#allocation104_spill] sm:$0xff] }
 0x23c   :  { %v979_v9 = vadd.f32 %v961_v26, %v938_v29  ;;  %v1634_v13 = vsel %vm940_vm5, %v6263_v23, %v6261_v63  ;;  %v6268_v51 = vrot.slane %v6267_v41, 1  ;;  %v3219_v4 = vmul.f32 %v3602_v52, %v3179_v57  ;;  %v6277_v26 = vld [vmem:[#allocation100_spill] sm:$0xff] }
 0x23d   :  { %v2381_v6 = vadd.f32 %v6266_v61, %v6264_v11  ;;  %v3101_v20 = vmul.f32 %v1747_v0, %v1074_v48  ;;  %v3117_v53 = vmul.f32 %v1747_v0, %v1747_v0  ;;  %v1652_v33 = vadd.f32 %v1634_v13, %v1612_v38  ;;  %v6279_v0 = vld [vmem:[#allocation101_spill] sm:$0xff]  ;;  %v6284_v23 = vld [vmem:[#allocation112_spill] sm:$0xff]  ;;  %v6285_v13 = vld [vmem:[#allocation11_spill] sm:$0xff] }
 0x23e   :  { %v3053_v19 = vadd.f32 %v6268_v51, %v3013_v7  ;;  %v995_v3 = vadd.f32 %v6269_v39, %v979_v9  ;;  %v2958_v18 = vadd.f32 %v6271_v35, %v6270_v46  ;;  %v79_v32 = vand.u32 2147483647, %v6272_v16 }
 0x23f   :  { %v2421_v12 = vadd.f32 %v2405_v49, %v2381_v6  ;;  %v3125_v47 = vadd.f32 %v3117_v53, %v3109_v40  ;;  %v1668_v59 = vadd.f32 %v6273_v56, %v1652_v33  ;;  %v3234_v1 = vsel %vm3224_vm6, %v3219_v4, 0.0  ;;  %v6288_v6 = vld [vmem:[#allocation17_spill] sm:$0xff] }
 0x240   :  { %v3093_v15 = vadd.f32 %v3077_v34, %v3053_v19  ;;  %v3149_v48 = vmul.f32 2.0, %v3101_v20  ;;  %v6275_v29 = vrot.slane %v6274_v55, 1  ;;  %v2980_v31 = vsel %vm940_vm5, %v2978_v10, %v2979_v44  ;;  %3235 = vadd.xlane.f32.xlu0 %v3234_v1 }
 0x241   :  { %v3038_v49 = vrot.slane %v5571_v60, 1  ;;  %v2406_v30 = vrot.slane %v5608_v50, 2  ;;  %v3133_v17 = vsub.f32 %v2420_v45, %v3125_v47  ;;  %v3007_v62 = vmul.f32 0.036000773, %v6276_v58 }
 0x242   :  { %v1035_v57 = vadd.f32 %v6275_v29, %v995_v3  ;;  %v3141_v34 = vsub.f32 %v3093_v15, %v3101_v20  ;;  %v6278_v37 = vrot.slane %v6277_v26, 2  ;;  %v6280_v43 = vrot.slane %v6279_v0, 1  ;;  %v6291_v15 = vld [vmem:[#allocation110_spill] sm:$0xff] }
 0x243   :  { %v2998_v40 = vadd.f32 %v2980_v31, %v2958_v18  ;;  %v111_v44 = vmul.f32 %v6281_v2, %v79_v32  ;;  %v3189_v60 = vadd.f32 0.0001, %v3125_v47  ;;  %v3197_v27 = vadd.f32 0.0009, %v3133_v17  ;;  %v6290_v18 = vld [vmem:[#allocation8_spill] sm:$0xff] }
 0x244   :  { %v1075_v36 = vadd.f32 %v6278_v37, %v1035_v57  ;;  %v1708_v7 = vadd.f32 %v6280_v43, %v1668_v59  ;;  %v3165_v10 = vmul.f32 2.0, %v3141_v34  ;;  %v3157_v50 = vadd.f32 0.0001, %v3149_v48  ;;  %v3604_v51 = vpop.eup %3603  ;;  %v6292_v59 = vld [vmem:[#allocation109_spill] sm:$0xff]  ;;  %v6293_v48 = vld [vmem:[#allocation106_spill] sm:$0xff] }
 0x245   :  { %v6283_v45 = vrot.slane %v6282_v21, 2  ;;  %v3014_v9 = vadd.f32 %v5517_v22, %v2998_v40  ;;  %v3205_v8 = vmul.f32 %v3197_v27, %v3189_v60  ;;  %v939_v11 = vadd.f32 %v6285_v13, %v6284_v23  ;;  %v6297_v37 = vld [vmem:[#allocation18_spill] sm:$0xff]  ;;  %v6299_v40 = vld [vmem:[#allocation7_spill] sm:$0xff] }
 0x246   :  { %v3110_v25 = vmul.f32 %v1075_v36, %v1075_v36  ;;  %v3173_v63 = vadd.f32 0.0009, %v3165_v10  ;;  %v6287_v61 = vrot.slane %v6286_v42, 7  ;;  %v6289_v52 = vrot.slane %v6288_v6, 7 }
 0x247   :  { %v1748_v38 = vadd.f32 %v6283_v45, %v1708_v7  ;;  %v3054_v19 = vadd.f32 %v3038_v49, %v3014_v9  ;;  %v3078_v20 = vrot.slane %v5587_v24, 2  ;;  %v3220_v4 = vmul.f32 %v3604_v51, %v3180_v54  ;;  %v6295_v24 = vld [vmem:[#allocation9_spill] sm:$0xff]  ;;  %v6305_v51 = vld [vmem:[#allocation3_spill] sm:$0xff] }
 0x248   :  { %v964_v41 = vsel %vm940_vm5, %v6289_v52, %v6287_v61  ;;  %v3181_v22 = vmul.f32 %v3173_v63, %v3157_v50  ;;  %3605 = vrcp.f32 %v3205_v8  ;;  %v3023_v3 = vmul.f32 0.007598758, %v6276_v58  ;;  %v6302_v50 = vld [vmem:[#allocation19_spill] sm:$0xff]  ;;  %v6304_v8 = vld [vmem:[#allocation113_spill] sm:$0xff] }
 0x249   :  { %v3102_v53 = vmul.f32 %v1748_v38, %v1075_v36  ;;  %v3118_v33 = vmul.f32 %v1748_v38, %v1748_v38  ;;  %v980_v39 = vadd.f32 %v964_v41, %v939_v11  ;;  %v3094_v46 = vadd.f32 %v3078_v20, %v3054_v19  ;;  %v5706_v41 = vpop.xlane.xlu1 %120 }
 0x24a   :  { %v1613_v47 = vadd.f32 %v6291_v15, %v6290_v18  ;;  %v3237_v56 = vsel %vm3224_vm6, %v3220_v4, 0.0  ;;  %v6294_v55 = vrot.slane %v6293_v48, 7  ;;  %v6296_v29 = vrot.slane %v6295_v24, 7 }
 0x24b   :  { %v3126_v35 = vadd.f32 %v3118_v33, %v3110_v25  ;;  %v996_v1 = vadd.f32 %v6292_v59, %v980_v39  ;;  %v2422_v57 = vadd.f32 %v2406_v30, %v5445_v5  ;;  %v3063_v31 = vmul.f32 0.0010283801, %v6276_v58  ;;  %3238 = vadd.xlane.f32.xlu1 %v3237_v56  ;;  %v6300_v58 = vld [vmem:[#allocation108_spill] sm:$0xff]  ;;  %v6303_v25 = vld [vmem:[#allocation2_spill] sm:$0xff] }
 0x24c   :  { %v1637_v54 = vsel %vm940_vm5, %v6296_v29, %v6294_v55  ;;  %v3142_v17 = vsub.f32 %v3094_v46, %v3102_v53  ;;  %v3150_v34 = vmul.f32 2.0, %v3102_v53  ;;  %v306_v26 = vsel %vm112_vm0, %v111_v44, 0.0  ;;  %v5710_v46 = vpop.xlane.xlu0 %126 }
 0x24d   :  { %v3134_v49 = vsub.f32 %v2421_v12, %v3126_v35  ;;  %v6298_v36 = vrot.slane %v6297_v37, 1  ;;  %v1653_v43 = vadd.f32 %v1637_v54, %v1613_v47  ;;  %v2999_v7 = vadd.f32 %v5401_v28, %v5438_v14  ;;  %v5713_v47 = vpop.xlane.xlu1 %123 }
 0x24e   :  { %v1693_v2 = vrot.slane %v6299_v40, 1  ;;  %v3166_v10 = vmul.f32 2.0, %v3142_v17  ;;  %v3190_v60 = vadd.f32 0.0001, %v3126_v35  ;;  %v3039_v30 = vrot.slane %v3023_v3, 1 }
 0x24f   :  { %v1036_v0 = vadd.f32 %v6298_v36, %v996_v1  ;;  %v3198_v5 = vadd.f32 0.0009, %v3134_v49  ;;  %v6301_v27 = vrot.slane %v6300_v58, 2  ;;  %v1669_v21 = vadd.f32 %v6302_v50, %v1653_v43  ;;  %307 = vadd.xlane.f32.xlu1 %v306_v26 }
 0x250   :  { %v3015_v45 = vadd.f32 %v3007_v62, %v2999_v7  ;;  %v3158_v44 = vadd.f32 0.0001, %v3150_v34  ;;  %v3174_v38 = vadd.f32 0.0009, %v3166_v10  ;;  %v71_v63 = vand.u32 2147483647, %v6303_v25 }
 0x251   :  { %v1076_v12 = vadd.f32 %v6301_v27, %v1036_v0  ;;  %v3206_v9 = vmul.f32 %v3198_v5, %v3190_v60  ;;  %v1733_v28 = vrot.slane %v6304_v8, 2  ;;  %v1709_v14 = vadd.f32 %v1693_v2, %v1669_v21 }
 0x252   :  { %v3055_v23 = vadd.f32 %v3039_v30, %v3015_v45  ;;  %v3079_v13 = vrot.slane %v3063_v31, 2  ;;  %v3182_v11 = vmul.f32 %v3174_v38, %v3158_v44  ;;  %v3606_v42 = vpop.eup %3605  ;;  %v103_v19 = vmul.f32 %v6305_v51, %v71_v63  ;;  %v189_v31 = vpop.xlane.xlu0 %188 }
 0x253   :  { %3607 = vrcp.f32 %v3206_v9  ;;  %v1749_v61 = vadd.f32 %v1733_v28, %v1709_v14  ;;  %v3111_v52 = vmul.f32 %v1076_v12, %v1076_v12  ;;  %v3221_v62 = vmul.f32 %v3606_v42, %v3181_v22 }
 0x254   :  { %v3095_v6 = vadd.f32 %v3079_v13, %v3055_v23  ;;  %v282_v35 = vsel %vm112_vm0, %v103_v19, 0.0  ;;  %v134_v55 = vsel %vm112_vm0, %v71_v63, 0.0  ;;  %v158_v7 = vsel %vm112_vm0, %v79_v32, 0.0 }
 0x255   :  { %v3103_v20 = vmul.f32 %v1749_v61, %v1076_v12  ;;  %v3119_v53 = vmul.f32 %v1749_v61, %v1749_v61  ;;  %v3240_v33 = vsel %vm3224_vm6, %v3221_v62, 0.0 }
 0x256   :  { %3241 = vadd.xlane.f32.xlu0 %v3240_v33  ;;  %v213_v17 = vpop.xlane.xlu0 %212 }
 0x257   :  { %v3127_v4 = vadd.f32 %v3119_v53, %v3111_v52  ;;  %v3143_v39 = vsub.f32 %v3095_v6, %v3103_v20  ;;  %v3151_v3 = vmul.f32 2.0, %v3103_v20 }
 0x259   :  { %v3135_v18 = vsub.f32 %v2422_v57, %v3127_v4  ;;  %v3167_v15 = vmul.f32 2.0, %v3143_v39  ;;  %v3159_v56 = vadd.f32 0.0001, %v3151_v3  ;;  %v3191_v59 = vadd.f32 0.0001, %v3127_v4  ;;  %v5717_v57 = vpop.xlane.xlu1 %129 }
 0x25a   :  { %283 = vadd.xlane.f32.xlu0 %v282_v35  ;;  %v263_v37 = vpop.xlane.xlu0 %262 }
 0x25b   :  { %v3175_v22 = vadd.f32 0.0009, %v3167_v15  ;;  %v3199_v1 = vadd.f32 0.0009, %v3135_v18 }
 0x25d   :  { %v3608_v48 = vpop.eup %3607  ;;  %v3183_v29 = vmul.f32 %v3175_v22, %v3159_v56  ;;  %v3207_v54 = vmul.f32 %v3199_v1, %v3191_v59  ;;  %v192_v34 = vpop.xlane.xlu1 %191 }
 0x25e   :  { %v3222_v24 = vmul.f32 %v3608_v48, %v3182_v11  ;;  %135 = vadd.xlane.f32.xlu0 %v134_v55  ;;  %v287_v40 = vpop.xlane.xlu0 %286  ;;  %v235_v51 = vadd.f32 %v192_v34, %v189_v31  ;;  %v6306_v31 = vld [vmem:[#allocation13_spill] sm:$0xff] }
 0x25f   :  { %3609 = vrcp.f32 %v3207_v54 }
 0x260   :  { %v3243_v49 = vsel %vm3224_vm6, %v3222_v24, 0.0 }
 0x261   :  { %3244 = vadd.xlane.f32.xlu1 %v3243_v49  ;;  %v216_v0 = vpop.xlane.xlu1 %215  ;;  %v162_v49 = vadd.f32 %v6306_v31, %v5706_v41 }
 0x262   :  { %v5723_v10 = vpop.xlane.xlu0 %138  ;;  %v248_v48 = vadd.f32 %v216_v0, %v213_v17 }
 0x263   :  { %v163_v17 = vadd.f32 %v162_v49, %v5713_v47 }
 0x265   :  { %v266_v2 = vpop.xlane.xlu1 %265 }
 0x266   :  { %v195_v5 = vpop.xlane.xlu0 %194  ;;  %v309_v35 = vadd.f32 %v266_v2, %v263_v37 }
 0x267   :  { %v236_v20 = vadd.f32 %v235_v51, %v195_v5 }
 0x269   :  { %v3610_v26 = vpop.eup %3609  ;;  %v290_v60 = vpop.xlane.xlu1 %289 }
 0x26a   :  { %v3223_v36 = vmul.f32 %v3610_v26, %v3183_v29  ;;  %v269_v58 = vpop.xlane.xlu0 %268  ;;  %v322_v55 = vadd.f32 %v290_v60, %v287_v40 }
 0x26b   :  { %v310_v56 = vadd.f32 %v309_v35, %v269_v58 }
 0x26c   :  { %v3246_v43 = vsel %vm3224_vm6, %v3223_v36, 0.0 }
 0x26d   :  { %3247 = vadd.xlane.f32.xlu1 %v3246_v43  ;;  %v5725_v30 = vpop.xlane.xlu1 %141 }
 0x26e   :  { %v5727_v12 = vpop.xlane.xlu0 %144 }
 0x271   :  { %159 = vadd.xlane.f32.xlu1 %v158_v7  ;;  %v219_v27 = vpop.xlane.xlu1 %218 }
 0x272   :  { %v222_v21 = vpop.xlane.xlu0 %221  ;;  %v249_v7 = vadd.f32 %v248_v48, %v219_v27  ;;  %v174_v27 = vadd.f32 %v5725_v30, %v5723_v10 }
 0x275   :  { %v293_v50 = vpop.xlane.xlu1 %292 }
 0x276   :  { %v296_v44 = vpop.xlane.xlu0 %295  ;;  %v323_v2 = vadd.f32 %v322_v55, %v293_v50 }
 0x279   :  { %v198_v45 = vpop.xlane.xlu1 %197 }
 0x27a   :  { %v201_v38 = vpop.xlane.xlu0 %200  ;;  %v237_v4 = vadd.f32 %v236_v20, %v198_v45 }
 0x27c   :  { %v238_v18 = vadd.f32 %v237_v4, %v201_v38  ;;  %v250_v38 = vadd.f32 %v249_v7, %v222_v21 }
 0x27d   :  { %v272_v16 = vpop.xlane.xlu1 %271 }
 0x27e   :  { %v275_v9 = vpop.xlane.xlu0 %274  ;;  %v311_v34 = vadd.f32 %v310_v56, %v272_v16  ;;  %v175_v56 = vadd.f32 %v174_v27, %v5727_v12 }
 0x280   :  { %v312_v0 = vadd.f32 %v311_v34, %v275_v9 }
 0x281   :  { %v5729_v32 = vpop.xlane.xlu1 %147 }
 0x282   :  { %v5731_v63 = vpop.xlane.xlu0 %150  ;;  %v176_v12 = vadd.f32 %v175_v56, %v5729_v32 }
 0x285   :  { %v225_v25 = vpop.xlane.xlu1 %224 }
 0x286   :  { %v5733_v28 = vpop.xlane.xlu0 %227  ;;  %v251_v47 = vadd.f32 %v250_v38, %v225_v25 }
 0x289   :  { %v299_v8 = vpop.xlane.xlu1 %298 }
 0x28a   :  { %v5735_v23 = vpop.xlane.xlu0 %301 }
 0x28d   :  { %v204_v14 = vpop.xlane.xlu1 %203 }
 0x28e   :  { %v207_v11 = vpop.xlane.xlu0 %206  ;;  %v239_v22 = vadd.f32 %v238_v18, %v204_v14  ;;  %v324_v14 = vadd.f32 %v323_v2, %v296_v44 }
 0x290   :  { %v240_v26 = vadd.f32 %v239_v22, %v207_v11  ;;  %v164_v11 = vadd.f32 %v163_v17, %v5710_v46  ;;  %v325_v9 = vadd.f32 %v324_v14, %v299_v8 }
 0x291   :  { %v278_v13 = vpop.xlane.xlu1 %277 }
 0x292   :  { %v281_v61 = vpop.xlane.xlu0 %280  ;;  %v313_v20 = vadd.f32 %v312_v0, %v278_v13  ;;  %v165_v21 = vadd.f32 %v164_v11, %v5717_v57  ;;  %v326_v10 = vadd.f32 %v325_v9, %v5735_v23 }
 0x294   :  { %v314_v44 = vadd.f32 %v313_v20, %v281_v61 }
 0x295   :  { %v5737_v42 = vpop.xlane.xlu1 %153 }
 0x296   :  { %v5741_v52 = vpop.xlane.xlu0 %132 }
 0x297   :  { %v166_v48 = vadd.f32 %v165_v21, %v5741_v52 }
 0x299   :  { %v5739_v6 = vpop.xlane.xlu1 %230 }
 0x29a   :  { %v210_v19 = vpop.xlane.xlu0 %209 }
 0x29b   :  { %v241_v40 = vadd.f32 %v240_v26, %v210_v19 }
 0x29d   :  { %v5743_v62 = vpop.xlane.xlu1 %304 }
 0x29e   :  { %v327_v23 = vadd.f32 %v326_v10, %v5743_v62 }
 0x2a1   :  { %v5745_v53 = vpop.xlane.xlu1 %156 }
 0x2a5   :  { %v5747_v39 = vpop.xlane.xlu1 %233 }
 0x2a9   :  { %v3227_v15 = vpop.xlane.xlu1 %3226 }
 0x2aa   :  { %v3250_v24 = vsel %vm3249_vm7, %v3227_v15, 0.0 }
 0x2ab   :  { %v3251_v36 = vrot.slane %v3250_v24, 4 }
 0x2ad   :  { %v3252_v60 = vadd.f32 %v3251_v36, %v3250_v24 }
 0x2af   :  { %v3253_v50 = vrot.slane %v3252_v60, 2 }
 0x2b1   :  { %v3254_v46 = vadd.f32 %v3253_v50, %v3252_v60  ;;  %v3314_v60 = vlaneseq }
 0x2b3   :  { %v3255_v24 = vrot.slane %v3254_v46, 1 }
 0x2b6   :  { %v3230_v33 = vpop.xlane.xlu0 %3229 }
 0x2b7   :  { %v3257_v59 = vsel %vm3249_vm7, %v3230_v33, 0.0  ;;  %v242_v33 = vrot.slane %v241_v40, 4 }
 0x2b8   :  { %v3258_v54 = vrot.slane %v3257_v59, 4 }
 0x2b9   :  { %v243_v18 = vadd.f32 %v242_v33, %v241_v40 }
 0x2ba   :  { %v3259_v5 = vadd.f32 %v3258_v54, %v3257_v59  ;;  %v252_v59 = vadd.f32 %v251_v47, %v5733_v28  ;;  %v5772_v47 = vand.u32 127, %v3314_v60 }
 0x2bb   :  { %v244_v57 = vrot.slane %v243_v18, 2 }
 0x2bc   :  { %v3260_v41 = vrot.slane %v3259_v5, 2  ;;  %v253_v28 = vadd.f32 %v252_v59, %v5739_v6  ;;  %vm3317_vm8 = vcmp.eq.s32.totalorder %v5772_v47, 1  ;;  %vm3318_vm9 = vcmp.eq.s32.totalorder %v5772_v47, 2 }
 0x2bd   :  { %v245_v7 = vadd.f32 %v244_v57, %v243_v18  ;;  %vm3316_vm10 = vcmp.eq.s32.totalorder %v5772_v47, 0 }
 0x2be   :  { %v3233_v3 = vpop.xlane.xlu0 %3232  ;;  %v3261_v19 = vadd.f32 %v3260_v41, %v3259_v5  ;;  %v254_v6 = vadd.f32 %v253_v28, %v5747_v39 }
 0x2bf   :  { %v3264_v29 = vsel %vm3249_vm7, %v3233_v3, 0.0  ;;  %v246_v33 = vrot.slane %v245_v7, 1 }
 0x2c0   :  { %v3265_v43 = vrot.slane %v3264_v29, 4  ;;  %v3262_v8 = vrot.slane %v3261_v19, 1 }
 0x2c2   :  { %v3266_v45 = vadd.f32 %v3265_v43, %v3264_v29 }
 0x2c4   :  { %v3267_v4 = vrot.slane %v3266_v45, 2 }
 0x2c6   :  { %v3268_v13 = vadd.f32 %v3267_v4, %v3266_v45 }
 0x2c8   :  { %v3269_v29 = vrot.slane %v3268_v13, 1 }
 0x2ca   :  { %v3270_v17 = vadd.f32 %v3269_v29, %v3268_v13 }
 0x2cd   :  { %v3236_v1 = vpop.xlane.xlu0 %3235 }
 0x2ce   :  { %v3271_v37 = vsel %vm3249_vm7, %v3236_v1, 0.0 }
 0x2cf   :  { %v3272_v58 = vrot.slane %v3271_v37, 4 }
 0x2d1   :  { %v3273_v16 = vadd.f32 %v3272_v58, %v3271_v37  ;;  %v3263_v37 = vadd.f32 %v3262_v8, %v3261_v19  ;;  %v3256_v58 = vadd.f32 %v3255_v24, %v3254_v46 }
 0x2d3   :  { %v3274_v35 = vrot.slane %v3273_v16, 2  ;;  %v3306_v38 = vadd.f32 %v3263_v37, %v3256_v58 }
 0x2d5   :  { %v3275_v1 = vadd.f32 %v3274_v35, %v3273_v16  ;;  %v177_v16 = vadd.f32 %v176_v12, %v5731_v63  ;;  %v3307_v27 = vadd.f32 %v3306_v38, %v3270_v17 }
 0x2d7   :  { %v3276_v36 = vrot.slane %v3275_v1, 1 }
 0x2d8   :  { %v3239_v51 = vpop.xlane.xlu1 %3238 }
 0x2d9   :  { %v3278_v61 = vsel %vm3249_vm7, %v3239_v51, 0.0  ;;  %v3277_v14 = vadd.f32 %v3276_v36, %v3275_v1 }
 0x2da   :  { %v3279_v52 = vrot.slane %v3278_v61, 4 }
 0x2db   :  { %v3308_v39 = vadd.f32 %v3307_v27, %v3277_v14 }
 0x2dc   :  { %v308_v15 = vpop.xlane.xlu1 %307  ;;  %v3280_v51 = vadd.f32 %v3279_v52, %v3278_v61 }
 0x2dd   :  { %v328_v0 = vadd.f32 %v327_v23, %v308_v15  ;;  %v247_v15 = vadd.f32 %v246_v33, %v245_v7 }
 0x2de   :  { %v3281_v19 = vrot.slane %v3280_v51, 2 }
 0x2df   :  { %v329_v50 = vrot.slane %v328_v0, 4 }
 0x2e0   :  { %v3282_v59 = vadd.f32 %v3281_v19, %v3280_v51 }
 0x2e1   :  { %v330_v56 = vadd.f32 %v329_v50, %v328_v0 }
 0x2e2   :  { %v3283_v24 = vrot.slane %v3282_v59, 1 }
 0x2e3   :  { %v3242_v3 = vpop.xlane.xlu0 %3241  ;;  %v331_v1 = vrot.slane %v330_v56, 2 }
 0x2e4   :  { %v3285_v30 = vsel %vm3249_vm7, %v3242_v3, 0.0  ;;  %v255_v3 = vrot.slane %v254_v6, 4  ;;  %v3284_v36 = vadd.f32 %v3283_v24, %v3282_v59 }
 0x2e5   :  { %v3286_v54 = vrot.slane %v3285_v30, 4  ;;  %v332_v23 = vadd.f32 %v331_v1, %v330_v56 }
 0x2e6   :  { %v256_v46 = vadd.f32 %v255_v3, %v254_v6 }
 0x2e7   :  { %v284_v22 = vpop.xlane.xlu0 %283  ;;  %v3287_v40 = vadd.f32 %v3286_v54, %v3285_v30 }
 0x2e8   :  { %v315_v25 = vadd.f32 %v314_v44, %v284_v22  ;;  %v178_v44 = vadd.f32 %v177_v16, %v5737_v42  ;;  %v3312_v22 = vmul.f32 0.0069444445, %v3308_v39  ;;  %v257_v12 = vrot.slane %v256_v46, 2 }
 0x2e9   :  { %v3288_v4 = vrot.slane %v3287_v40, 2 }
 0x2ea   :  { %v316_v55 = vrot.slane %v315_v25, 4  ;;  %v258_v37 = vadd.f32 %v257_v12, %v256_v46 }
 0x2eb   :  { %v136_v31 = vpop.xlane.xlu0 %135  ;;  %v3289_v63 = vadd.f32 %v3288_v4, %v3287_v40 }
 0x2ec   :  { %v317_v34 = vadd.f32 %v316_v55, %v315_v25  ;;  %v167_v26 = vadd.f32 %v166_v48, %v136_v31  ;;  %v179_v55 = vadd.f32 %v178_v44, %v5745_v53  ;;  %v333_v53 = vrot.slane %v332_v23, 1 }
 0x2ed   :  { %v3290_v48 = vrot.slane %v3289_v63, 1  ;;  %v259_v58 = vrot.slane %v258_v37, 1 }
 0x2ee   :  { %v3245_v49 = vpop.xlane.xlu1 %3244  ;;  %v318_v5 = vrot.slane %v317_v34, 2  ;;  %v168_v32 = vrot.slane %v167_v26, 4  ;;  %v334_v6 = vadd.f32 %v333_v53, %v332_v23 }
 0x2ef   :  { %v3292_v43 = vsel %vm3249_vm7, %v3245_v49, 0.0  ;;  %v3291_v49 = vadd.f32 %v3290_v48, %v3289_v63 }
 0x2f0   :  { %v3293_v2 = vrot.slane %v3292_v43, 4  ;;  %v319_v62 = vadd.f32 %v318_v5, %v317_v34  ;;  %v169_v45 = vadd.f32 %v168_v32, %v167_v26 }
 0x2f2   :  { %v3294_v41 = vadd.f32 %v3293_v2, %v3292_v43  ;;  %v320_v11 = vrot.slane %v319_v62, 1  ;;  %v170_v20 = vrot.slane %v169_v45, 2  ;;  %v3309_v2 = vadd.f32 %v3291_v49, %v3284_v36 }
 0x2f4   :  { %v171_v9 = vadd.f32 %v170_v20, %v169_v45  ;;  %v3295_v35 = vrot.slane %v3294_v41, 2  ;;  %v321_v21 = vadd.f32 %v320_v11, %v319_v62  ;;  %v260_v45 = vadd.f32 %v259_v58, %v258_v37 }
 0x2f6   :  { %v172_v18 = vrot.slane %v171_v9, 1  ;;  %v3296_v10 = vadd.f32 %v3295_v35, %v3294_v41  ;;  %v3319_v30 = vsel %vm3318_vm9, %v247_v15, %v321_v21  ;;  %v3320_v14 = vsel %vm3318_vm9, %v260_v45, %v334_v6 }
 0x2f8   :  { %v173_v13 = vadd.f32 %v172_v18, %v171_v9  ;;  %v3297_v29 = vrot.slane %v3296_v10, 1 }
 0x2fa   :  { %v3248_v25 = vpop.xlane.xlu1 %3247  ;;  %v3321_v8 = vsel %vm3317_vm8, %v173_v13, %v3319_v30  ;;  %v3298_v52 = vadd.f32 %v3297_v29, %v3296_v10 }
 0x2fb   :  { %v3299_v42 = vsel %vm3249_vm7, %v3248_v25, 0.0  ;;  %v3323_v61 = vsel %vm3316_vm10, %v3312_v22, %v3321_v8 }
 0x2fc   :  { %v3300_v57 = vrot.slane %v3299_v42, 4  ;;  %3325 = vst [vmem:[%s5801_s3] sm:$0xff] %v3323_v61  ;;  %v3310_v17 = vadd.f32 %v3309_v2, %v3298_v52 }
 0x2fe   :  { %v3301_v54 = vadd.f32 %v3300_v57, %v3299_v42  ;;  %v160_v31 = vpop.xlane.xlu1 %159 }
 0x2ff   :  { %v180_v28 = vadd.f32 %v179_v55, %v160_v31 }
 0x300   :  { %v3302_v34 = vrot.slane %v3301_v54, 2 }
 0x301   :  { %v181_v26 = vrot.slane %v180_v28, 4 }
 0x302   :  { %v3303_v43 = vadd.f32 %v3302_v34, %v3301_v54 }
 0x303   :  { %v182_v7 = vadd.f32 %v181_v26, %v180_v28 }
 0x304   :  { %v3304_v5 = vrot.slane %v3303_v43, 1 }
 0x305   :  { %v183_v32 = vrot.slane %v182_v7, 2 }
 0x306   :  { %v3305_v0 = vadd.f32 %v3304_v5, %v3303_v43 }
 0x307   :  { %v184_v40 = vadd.f32 %v183_v32, %v182_v7 }
 0x308   :  { %v3311_v60 = vadd.f32 %v3310_v17, %v3305_v0 }
 0x309   :  { %v185_v62 = vrot.slane %v184_v40, 1 }
 0x30a   :  { %v3313_v51 = vmul.f32 0.0069444445, %v3311_v60 }
 0x30b   :  { %v186_v38 = vadd.f32 %v185_v62, %v184_v40 }
 0x30d   :  { %v3322_v41 = vsel %vm3317_vm8, %v186_v38, %v3320_v14 }
 0x30e   :  { %v3324_v16 = vsel %vm3316_vm10, %v3313_v51, %v3322_v41 }
 0x30f   :  { %3326 = vst [vmem:[%s5801_s3 + $0x8] sm:$0xff] %v3324_v16 }

</bundles_post_ra>
